<compile_context>
chip_gen: v7x
topology: tpu7x:2x2x1
jax: 0.10.0
libtpu: 0.0.40
codegen_flags: <defaults>
</compile_context>

<pallas_src>
import jax
import jax.numpy as jnp
from jax import lax
from jax.experimental import pallas as pl
from jax.experimental.pallas import tpu as pltpu


def _round_up(v, m):
    return ((v + m - 1) // m) * m


def _vmem_estimate(Tc, Bb, Dpp, Hp):
    """Rough per-core VMEM footprint (bytes) for the chosen tiling."""
    G = 8 * Hp
    x_bytes = 2 * Tc * Bb * Dpp * 2                 # double-buffered bf16 x
    out_bytes = 2 * 2 * Tc * Bb * Hp * 4            # two f32 output streams
    w_bytes = 2 * (Dpp * G * 2 + 2 * Hp * G * 2 + G * 4)
    scr_bytes = Tc * Bb * G * 4 + 2 * Bb * 2 * Hp * 4
    return x_bytes + out_bytes + w_bytes + scr_bytes + (1 << 20)


# ----------------------------------------------------------------------------
# Fused bidirectional LSTM kernel (time-chunked, pipelined).
#
# Fused gate column layout (width 8*Hp), PyTorch gate order i,f,g,o:
#   [ i_f | i_b | f_f | f_b | g_f | g_b | o_f | o_b ]   (each block Hp wide)
# so each gate slice is a lane-aligned 2*Hp block whose [fwd | bwd] halves
# line up with the fused h/c state layout (Bb, 2*Hp) = [h_f | h_b].
# ----------------------------------------------------------------------------
def _pblstm_kernel(len_ref, x_ref, wx_ref, b_ref, whh_ref,
                   outf_ref, outb_ref, gx_scr, h_scr, c_scr):
    t_id = pl.program_id(1)
    n_t = pl.num_programs(1)
    Tc, Bb, Dpp = x_ref.shape
    Hp = outf_ref.shape[-1]
    Tp = n_t * Tc

    @pl.when(t_id == 0)
    def _init():
        h_scr[...] = jnp.zeros_like(h_scr)
        c_scr[...] = jnp.zeros_like(c_scr)

    # Hoisted input projection: ONE bf16 MXU matmul per chunk covering all Tc
    # timesteps and both directions (x is pre-packed [x[t] | x[Tp-1-t]]).
    x2 = x_ref[...].reshape(Tc * Bb, Dpp)
    gx_scr[...] = (
        jnp.dot(x2, wx_ref[...], preferred_element_type=jnp.float32)
        + b_ref[...]
    )

    len_col = len_ref[...]                                   # (Bb, 1) int32
    fwd_lanes = lax.broadcasted_iota(jnp.int32, (1, 2 * Hp), 1) < Hp
    t0 = t_id * Tc

    def sig(v):                       # sigmoid via a single EUP tanh
        return 0.5 * jnp.tanh(0.5 * v) + 0.5

    def step(lt, carry):
        h, c = carry                                         # (Bb, 2*Hp) f32
        row = pl.multiple_of(lt * Bb, Bb)
        gx = gx_scr[pl.ds(row, Bb), :]                       # (Bb, 8*Hp)
        g = gx + jnp.dot(h.astype(jnp.bfloat16), whh_ref[...],
                         preferred_element_type=jnp.float32)

        i_g = sig(g[:, 0 * Hp:2 * Hp])
        f_g = sig(g[:, 2 * Hp:4 * Hp])
        g_g = jnp.tanh(g[:, 4 * Hp:6 * Hp])
        o_g = sig(g[:, 6 * Hp:8 * Hp])
        c_new = f_g * c + i_g * g_g
        h_new = o_g * jnp.tanh(c_new)

        tf = t0 + lt                  # global time processed by the fwd LSTM
        tb = Tp - 1 - tf              # global time processed by the bwd LSTM
        mf = (len_col > tf).astype(jnp.float32)              # (Bb, 1)
        mb = (len_col > tb).astype(jnp.float32)              # (Bb, 1)

        # Forward half of the state flows untouched; backward half resets at
        # padded positions -> packed-sequence semantics (start at len-1 with
        # zero state).  Single full-width select, no slice+concat on carry.
        smask = jnp.where(fwd_lanes, 1.0, mb)                # (Bb, 2*Hp)
        h_new = h_new * smask
        c_new = c_new * smask

        outf_ref[lt] = h_new[:, :Hp] * mf
        outb_ref[Tc - 1 - lt] = h_new[:, Hp:]
        return h_new, c_new

    h_fin, c_fin = lax.fori_loop(0, Tc, step, (h_scr[...], c_scr[...]),
                                 unroll=4)
    h_scr[...] = h_fin
    c_scr[...] = c_fin


def _pblstm_pallas(len_col, x_packed, wx, bias, whh, Tc, Bb, vmem_limit):
    """x_packed: (Tp, Bp, Dpp) bf16 time-major packed input."""
    Tp, Bp, Dpp = x_packed.shape
    Hp = whh.shape[0] // 2
    G = 8 * Hp
    nT = Tp // Tc
    nB = Bp // Bb

    grid_spec = pltpu.PrefetchScalarGridSpec(
        num_scalar_prefetch=0,
        grid=(nB, nT),
        in_specs=[
            pl.BlockSpec((Bb, 1), lambda b, t: (b, 0)),               # lengths
            pl.BlockSpec((Tc, Bb, Dpp), lambda b, t: (t, b, 0)),      # packed x
            pl.BlockSpec((Dpp, G), lambda b, t: (0, 0)),              # W_ih fused
            pl.BlockSpec((1, G), lambda b, t: (0, 0)),                # bias
            pl.BlockSpec((2 * Hp, G), lambda b, t: (0, 0)),           # W_hh fused
        ],
        out_specs=[
            pl.BlockSpec((Tc, Bb, Hp), lambda b, t: (t, b, 0)),           # h fwd
            pl.BlockSpec((Tc, Bb, Hp), lambda b, t: (nT - 1 - t, b, 0)),  # h bwd
        ],
        scratch_shapes=[
            pltpu.VMEM((Tc * Bb, G), jnp.float32),   # precomputed x-gates
            pltpu.VMEM((Bb, 2 * Hp), jnp.float32),   # h state [fwd | bwd]
            pltpu.VMEM((Bb, 2 * Hp), jnp.float32),   # c state [fwd | bwd]
        ],
    )
    return pl.pallas_call(
        _pblstm_kernel,
        out_shape=(jax.ShapeDtypeStruct((Tp, Bp, Hp), jnp.float32),
                   jax.ShapeDtypeStruct((Tp, Bp, Hp), jnp.float32)),
        grid_spec=grid_spec,
        compiler_params=pltpu.CompilerParams(
            dimension_semantics=("parallel", "arbitrary"),
            vmem_limit_bytes=vmem_limit),
    )(len_col, x_packed, wx, bias, whh)


# ----------------------------------------------------------------------------
# Fused / padded / bf16 weight construction from PyTorch-style params.
# Packed-x row layout: rows [0, Din) = forward x, rows [Din, 2*Din) = x rev.
# ----------------------------------------------------------------------------
def _fuse_weights(params, H, Hp, Din, Dpp):
    G = 8 * Hp
    wx = jnp.zeros((Dpp, G), jnp.float32)
    whh = jnp.zeros((2 * Hp, G), jnp.float32)
    bias = jnp.zeros((1, G), jnp.float32)
    for g in range(4):                     # PyTorch gate order i, f, g, o
        cf = 2 * g * Hp                    # fused columns of forward gate g
        cb = (2 * g + 1) * Hp              # fused columns of backward gate g
        wx = wx.at[:Din, cf:cf + H].set(params["w_ih_f"][:, g * H:(g + 1) * H])
        wx = wx.at[Din:2 * Din, cb:cb + H].set(params["w_ih_b"][:, g * H:(g + 1) * H])
        whh = whh.at[:H, cf:cf + H].set(params["w_hh_f"][:, g * H:(g + 1) * H])
        whh = whh.at[Hp:Hp + H, cb:cb + H].set(params["w_hh_b"][:, g * H:(g + 1) * H])
        bias = bias.at[:, cf:cf + H].set(params["b_f"][:, g * H:(g + 1) * H])
        bias = bias.at[:, cb:cb + H].set(params["b_b"][:, g * H:(g + 1) * H])
    return wx.astype(jnp.bfloat16), whh.astype(jnp.bfloat16), bias


# ----------------------------------------------------------------------------
# pBLSTM forward (wrapper / glue): pyramidal time-halving + fused BiLSTM.
# ----------------------------------------------------------------------------
def pblstm_forward(x, lengths, params, *, time_chunk=128, batch_blocks=1,
                   vmem_budget_bytes=48 * 2 ** 20):
    """x: (B, T, F) padded batch-first; lengths: (B,) int.

    Returns (out, reduced_lengths); out is (B, T//2, 2H), zero beyond each
    sequence's reduced length (packed-sequence equivalent).
    batch_blocks=2 shards batch across v7x's two TensorCores.
    """
    B, T, F = x.shape
    Din = params["w_ih_f"].shape[0]
    H = params["w_hh_f"].shape[0]
    assert Din == 2 * F

    T2 = (T // 2) * 2
    Tr = T2 // 2
    assert Tr >= 1
    xr = x[:, :T2, :].reshape(B, Tr, Din)                  # (B, Tr, 2F)
    reduced_lengths = (lengths // 2).astype(jnp.int32)

    # Zero invalid timesteps (robust to NaN/Inf padding; matches packed-seq).
    valid = jnp.arange(Tr)[None, :] < reduced_lengths[:, None]
    xr = jnp.where(valid[:, :, None], xr, 0.0)

    nB = max(1, int(batch_blocks))
    Bb = _round_up(-(-B // nB), 8)
    Bp = nB * Bb
    Dpp = _round_up(2 * Din, 128)
    Hp = _round_up(H, 128)

    Tc = max(1, min(time_chunk, Tr))
    while _vmem_estimate(Tc, Bb, Dpp, Hp) > vmem_budget_bytes and Tc > 8:
        Tc = max(8, Tc // 2)
    nT = -(-Tr // Tc)
    Tp = nT * Tc

    # Time-major, padded, then feature-packed [x[t] | x[Tp-1-t]] in bf16.
    x_tm = jnp.transpose(xr, (1, 0, 2))                    # (Tr, B, Din)
    x_tm = jnp.pad(x_tm, ((0, Tp - Tr), (0, Bp - B), (0, 0)))
    x_packed = jnp.concatenate([x_tm, x_tm[::-1]], axis=-1)
    x_packed = jnp.pad(x_packed, ((0, 0), (0, 0), (0, Dpp - 2 * Din)))
    x_packed = x_packed.astype(jnp.bfloat16)

    len_col = jnp.zeros((Bp, 1), jnp.int32).at[:B, 0].set(reduced_lengths)

    wx, whh, bias = _fuse_weights(params, H, Hp, Din, Dpp)

    est = _vmem_estimate(Tc, Bb, Dpp, Hp)
    vmem_limit = int(min(100 * 2 ** 20,
                         max(32 * 2 ** 20, int(1.3 * est) + (4 << 20))))

    out_f, out_b = _pblstm_pallas(len_col, x_packed, wx, bias, whh,
                                  Tc, Bb, vmem_limit)

    h_f = jnp.transpose(out_f[:Tr, :B, :H], (1, 0, 2))     # (B, Tr, H)
    h_b = jnp.transpose(out_b[:Tr, :B, :H], (1, 0, 2))     # (B, Tr, H)
    out = jnp.concatenate([h_f, h_b], axis=-1)             # (B, Tr, 2H)
    return out, reduced_lengths


# ----------------------------------------------------------------------------
# Pure-JAX reference (packed-sequence semantics via explicit reversal).
# ----------------------------------------------------------------------------
def _lstm_direction_ref(x_tm, w_ih, w_hh, b):
    H = w_hh.shape[0]

    def step(carry, x_t):
        h, c = carry
        gates = x_t @ w_ih + h @ w_hh + b
        i = jax.nn.sigmoid(gates[:, 0 * H:1 * H])
        f = jax.nn.sigmoid(gates[:, 1 * H:2 * H])
        g = jnp.tanh(gates[:, 2 * H:3 * H])
        o = jax.nn.sigmoid(gates[:, 3 * H:4 * H])
        c = f * c + i * g
        h = o * jnp.tanh(c)
        return (h, c), h

    B = x_tm.shape[1]
    init = (jnp.zeros((B, H), jnp.float32), jnp.zeros((B, H), jnp.float32))
    _, hs = lax.scan(step, init, x_tm)
    return hs


def pblstm_forward_ref(x, lengths, params):
    B, T, F = x.shape
    T2 = (T // 2) * 2
    Tr = T2 // 2
    xr = x[:, :T2, :].reshape(B, Tr, 2 * F)
    red = lengths // 2

    t_idx = jnp.arange(Tr)[None, :]
    valid = t_idx < red[:, None]
    xr = jnp.where(valid[:, :, None], xr, 0.0)

    h_f = _lstm_direction_ref(jnp.transpose(xr, (1, 0, 2)),
                              params["w_ih_f"], params["w_hh_f"], params["b_f"])
    h_f = jnp.transpose(h_f, (1, 0, 2))

    rev_idx = jnp.where(valid, red[:, None] - 1 - t_idx, t_idx)
    rev3 = jnp.broadcast_to(rev_idx[:, :, None], xr.shape).astype(jnp.int32)
    xr_rev = jnp.take_along_axis(xr, rev3, axis=1)
    h_b_rev = _lstm_direction_ref(jnp.transpose(xr_rev, (1, 0, 2)),
                                  params["w_ih_b"], params["w_hh_b"], params["b_b"])
    h_b_rev = jnp.transpose(h_b_rev, (1, 0, 2))
    rev3h = jnp.broadcast_to(rev_idx[:, :, None], h_b_rev.shape).astype(jnp.int32)
    h_b = jnp.take_along_axis(h_b_rev, rev3h, axis=1)

    out = jnp.concatenate([h_f, h_b], axis=-1)
    out = jnp.where(valid[:, :, None], out, 0.0)
    return out, red


# ----------------------------------------------------------------------------
# Deterministic parameter init (PyTorch LSTM shapes, gate order i,f,g,o).
# ----------------------------------------------------------------------------
def init_pblstm_params(key, input_dim, hidden_dim):
    din = 2 * input_dim                 # pBLSTM feeds input_dim * 2 into LSTM
    k = 1.0 / jnp.sqrt(jnp.float32(hidden_dim))
    ks = jax.random.split(key, 8)

    def u(kk, shape):
        return jax.random.uniform(kk, shape, jnp.float32, -k, k)

    w_ih_f = u(ks[0], (4 * hidden_dim, din))
    w_hh_f = u(ks[1], (4 * hidden_dim, hidden_dim))
    b_ih_f = u(ks[2], (4 * hidden_dim,))
    b_hh_f = u(ks[3], (4 * hidden_dim,))
    w_ih_b = u(ks[4], (4 * hidden_dim, din))
    w_hh_b = u(ks[5], (4 * hidden_dim, hidden_dim))
    b_ih_b = u(ks[6], (4 * hidden_dim,))
    b_hh_b = u(ks[7], (4 * hidden_dim,))

    return {
        "w_ih_f": w_ih_f.T, "w_hh_f": w_hh_f.T,
        "b_f": (b_ih_f + b_hh_f)[None, :],
        "w_ih_b": w_ih_b.T, "w_hh_b": w_hh_b.T,
        "b_b": (b_ih_b + b_hh_b)[None, :],
    }


if __name__ == "__main__":
    # Small shapes consistent with the module: batch=2, seq=9 (odd, to
    # exercise truncation), feature=16, hidden=32.
    B, T, F, H = 2, 9, 16, 32
    key = jax.random.PRNGKey(0)
    k_param, k_x = jax.random.split(key)

    params = init_pblstm_params(k_param, input_dim=F, hidden_dim=H)
    x = jax.random.normal(k_x, (B, T, F), jnp.float32)
    lengths = jnp.array([9, 7], dtype=jnp.int32)

    fwd = jax.jit(lambda xx, ll: pblstm_forward(xx, ll, params))
    out, red_lens = fwd(x, lengths)
    out = jax.block_until_ready(out)

    out_ref, red_ref = pblstm_forward_ref(x, lengths, params)
    out_ref = jax.block_until_ready(out_ref)

    assert out.shape == (B, T // 2, 2 * H), out.shape
    assert jnp.all(red_lens == lengths // 2)
    max_err = float(jnp.max(jnp.abs(out - out_ref)))
    # bf16 MXU operands with f32 accumulation / state: allow ~2e-2.
    assert jnp.allclose(out, out_ref, atol=2e-2, rtol=2e-2), max_err

    print("KERNEL_OK")
</pallas_src>

<mosaic_0001>
module attributes {stable_mosaic.version = 11 : i64} {
  func.func @_pblstm_kernel(%arg0: i32, %arg1: i32, %arg2: memref<8x1xi32, #tpu.memory_space<vmem>>, %arg3: memref<4x8x128xbf16, #tpu.memory_space<vmem>>, %arg4: memref<128x1024xbf16, #tpu.memory_space<vmem>>, %arg5: memref<1x1024xf32, #tpu.memory_space<vmem>>, %arg6: memref<256x1024xbf16, #tpu.memory_space<vmem>>, %arg7: memref<4x8x128xf32, #tpu.memory_space<vmem>>, %arg8: memref<4x8x128xf32, #tpu.memory_space<vmem>>, %arg9: memref<32x1024xf32, #tpu.memory_space<vmem>>, %arg10: memref<8x256xf32, #tpu.memory_space<vmem>>, %arg11: memref<8x256xf32, #tpu.memory_space<vmem>>) attributes {dimension_semantics = [#tpu.dimension_semantics<parallel>, #tpu.dimension_semantics<arbitrary>], iteration_bounds = array<i64: 1, 1>, scalar_prefetch = 0 : i64, scratch_operands = 3 : i64, tpu.core_type = #tpu.core_type<tc>, window_params = [{transform_indices = @transform_0, window_bounds = array<i64: 8, 1>}, {transform_indices = @transform_1, window_bounds = array<i64: 4, 8, 128>}, {pipeline_mode = #tpu.pipeline_mode<synchronous>, transform_indices = @transform_2, window_bounds = array<i64: 128, 1024>}, {pipeline_mode = #tpu.pipeline_mode<synchronous>, transform_indices = @transform_3, window_bounds = array<i64: 1, 1024>}, {pipeline_mode = #tpu.pipeline_mode<synchronous>, transform_indices = @transform_4, window_bounds = array<i64: 256, 1024>}, {transform_indices = @transform_5, window_bounds = array<i64: 4, 8, 128>}, {transform_indices = @transform_6, window_bounds = array<i64: 4, 8, 128>}]} {
    %c0_i32 = arith.constant 0 : i32
    %0 = arith.cmpi eq, %arg1, %c0_i32 : i32
    %1 = arith.extui %0 : i1 to i32
    %c0_i32_0 = arith.constant 0 : i32
    %2 = arith.cmpi ne, %1, %c0_i32_0 : i32
    scf.if %2 {
      %cst_104 = arith.constant 0.000000e+00 : f32
      %300 = vector.broadcast %cst_104 : f32 to vector<8x256xf32>
      %c0_105 = arith.constant 0 : index
      %c0_106 = arith.constant 0 : index
      %301 = vector.load %arg10[%c0_105, %c0_106] : memref<8x256xf32, #tpu.memory_space<vmem>>, vector<8x256xf32>
      tpu.vector_store %arg10[%c0_105, %c0_106], %300 {strides = array<i32>} : memref<8x256xf32, #tpu.memory_space<vmem>>, vector<8x256xf32>,
      %cst_107 = arith.constant 0.000000e+00 : f32
      %302 = vector.broadcast %cst_107 : f32 to vector<8x256xf32>
      %c0_108 = arith.constant 0 : index
      %c0_109 = arith.constant 0 : index
      %303 = vector.load %arg11[%c0_108, %c0_109] : memref<8x256xf32, #tpu.memory_space<vmem>>, vector<8x256xf32>
      tpu.vector_store %arg11[%c0_108, %c0_109], %302 {strides = array<i32>} : memref<8x256xf32, #tpu.memory_space<vmem>>, vector<8x256xf32>,
    } else {
    }
    %c0 = arith.constant 0 : index
    %c0_1 = arith.constant 0 : index
    %c0_2 = arith.constant 0 : index
    %3 = vector.load %arg3[%c0, %c0_1, %c0_2] : memref<4x8x128xbf16, #tpu.memory_space<vmem>>, vector<4x8x128xbf16>
    %4 = vector.shape_cast %3 : vector<4x8x128xbf16> to vector<32x128xbf16>
    %c0_3 = arith.constant 0 : index
    %c0_4 = arith.constant 0 : index
    %5 = vector.load %arg4[%c0_3, %c0_4] : memref<128x1024xbf16, #tpu.memory_space<vmem>>, vector<128x1024xbf16>
    %cst = arith.constant dense<0.000000e+00> : vector<32x1024xf32>
    %6 = tpu.matmul %4, %5, %cst {dimension_numbers = #tpu.dot_dimension_numbers<[1], [0], [0], [1], [0, 0, 1, 1], [], []>} : vector<32x128xbf16>, vector<128x1024xbf16>, vector<32x1024xf32> -> vector<32x1024xf32>
    %c0_5 = arith.constant 0 : index
    %c0_6 = arith.constant 0 : index
    %7 = vector.load %arg5[%c0_5, %c0_6] : memref<1x1024xf32, #tpu.memory_space<vmem>>, vector<1x1024xf32>
    %8 = vector.broadcast %7 : vector<1x1024xf32> to vector<32x1024xf32>
    %9 = arith.addf %6, %8 : vector<32x1024xf32>
    %c0_7 = arith.constant 0 : index
    %c0_8 = arith.constant 0 : index
    %10 = vector.load %arg9[%c0_7, %c0_8] : memref<32x1024xf32, #tpu.memory_space<vmem>>, vector<32x1024xf32>
    tpu.vector_store %arg9[%c0_7, %c0_8], %9 {strides = array<i32>} : memref<32x1024xf32, #tpu.memory_space<vmem>>, vector<32x1024xf32>,
    %c0_9 = arith.constant 0 : index
    %c0_10 = arith.constant 0 : index
    %11 = vector.load %arg2[%c0_9, %c0_10] : memref<8x1xi32, #tpu.memory_space<vmem>>, vector<8x1xi32>
    %12 = tpu.iota {dimensions = array<i32: 1>} : vector<1x256xi32>
    %c128_i32 = arith.constant 128 : i32
    %13 = vector.broadcast %c128_i32 : i32 to vector<1x256xi32>
    %14 = arith.cmpi slt, %12, %13 : vector<1x256xi32>
    %c4_i32 = arith.constant 4 : i32
    %15 = arith.muli %arg1, %c4_i32 : i32
    %c0_11 = arith.constant 0 : index
    %c0_12 = arith.constant 0 : index
    %16 = vector.load %arg10[%c0_11, %c0_12] : memref<8x256xf32, #tpu.memory_space<vmem>>, vector<8x256xf32>
    %c0_13 = arith.constant 0 : index
    %c0_14 = arith.constant 0 : index
    %17 = vector.load %arg11[%c0_13, %c0_14] : memref<8x256xf32, #tpu.memory_space<vmem>>, vector<8x256xf32>
    %c0_i32_15 = arith.constant 0 : i32
    %c8_i32 = arith.constant 8 : i32
    %18 = arith.muli %c0_i32_15, %c8_i32 : i32
    %19 = tpu.assume_multiple %18, 8 : i32
    %20 = arith.index_cast %19 : i32 to index
    %c0_16 = arith.constant 0 : index
    %21 = vector.load %arg9[%20, %c0_16] : memref<32x1024xf32, #tpu.memory_space<vmem>>, vector<8x1024xf32>
    %22 = arith.truncf %16 : vector<8x256xf32> to vector<8x256xbf16>
    %c0_17 = arith.constant 0 : index
    %c0_18 = arith.constant 0 : index
    %23 = vector.load %arg6[%c0_17, %c0_18] : memref<256x1024xbf16, #tpu.memory_space<vmem>>, vector<256x1024xbf16>
    %cst_19 = arith.constant dense<0.000000e+00> : vector<8x1024xf32>
    %24 = tpu.matmul %22, %23, %cst_19 {dimension_numbers = #tpu.dot_dimension_numbers<[1], [0], [0], [1], [0, 0, 1, 1], [], []>} : vector<8x256xbf16>, vector<256x1024xbf16>, vector<8x1024xf32> -> vector<8x1024xf32>
    %25 = arith.addf %21, %24 : vector<8x1024xf32>
    %26 = vector.extract_strided_slice %25 {offsets = [0, 0], sizes = [8, 256], strides = [1, 1]} : vector<8x1024xf32> to vector<8x256xf32>
    %cst_20 = arith.constant 5.000000e-01 : f32
    %27 = vector.broadcast %cst_20 : f32 to vector<8x256xf32>
    %28 = arith.mulf %27, %26 : vector<8x256xf32>
    %29 = math.tanh %28 : vector<8x256xf32>
    %cst_21 = arith.constant 5.000000e-01 : f32
    %30 = vector.broadcast %cst_21 : f32 to vector<8x256xf32>
    %31 = arith.mulf %30, %29 : vector<8x256xf32>
    %cst_22 = arith.constant 5.000000e-01 : f32
    %32 = vector.broadcast %cst_22 : f32 to vector<8x256xf32>
    %33 = arith.addf %31, %32 : vector<8x256xf32>
    %34 = vector.extract_strided_slice %25 {offsets = [0, 256], sizes = [8, 256], strides = [1, 1]} : vector<8x1024xf32> to vector<8x256xf32>
    %cst_23 = arith.constant 5.000000e-01 : f32
    %35 = vector.broadcast %cst_23 : f32 to vector<8x256xf32>
    %36 = arith.mulf %35, %34 : vector<8x256xf32>
    %37 = math.tanh %36 : vector<8x256xf32>
    %cst_24 = arith.constant 5.000000e-01 : f32
    %38 = vector.broadcast %cst_24 : f32 to vector<8x256xf32>
    %39 = arith.mulf %38, %37 : vector<8x256xf32>
    %cst_25 = arith.constant 5.000000e-01 : f32
    %40 = vector.broadcast %cst_25 : f32 to vector<8x256xf32>
    %41 = arith.addf %39, %40 : vector<8x256xf32>
    %42 = vector.extract_strided_slice %25 {offsets = [0, 512], sizes = [8, 256], strides = [1, 1]} : vector<8x1024xf32> to vector<8x256xf32>
    %43 = math.tanh %42 : vector<8x256xf32>
    %44 = vector.extract_strided_slice %25 {offsets = [0, 768], sizes = [8, 256], strides = [1, 1]} : vector<8x1024xf32> to vector<8x256xf32>
    %cst_26 = arith.constant 5.000000e-01 : f32
    %45 = vector.broadcast %cst_26 : f32 to vector<8x256xf32>
    %46 = arith.mulf %45, %44 : vector<8x256xf32>
    %47 = math.tanh %46 : vector<8x256xf32>
    %cst_27 = arith.constant 5.000000e-01 : f32
    %48 = vector.broadcast %cst_27 : f32 to vector<8x256xf32>
    %49 = arith.mulf %48, %47 : vector<8x256xf32>
    %cst_28 = arith.constant 5.000000e-01 : f32
    %50 = vector.broadcast %cst_28 : f32 to vector<8x256xf32>
    %51 = arith.addf %49, %50 : vector<8x256xf32>
    %52 = arith.mulf %41, %17 : vector<8x256xf32>
    %53 = arith.mulf %33, %43 : vector<8x256xf32>
    %54 = arith.addf %52, %53 : vector<8x256xf32>
    %55 = math.tanh %54 : vector<8x256xf32>
    %56 = arith.mulf %51, %55 : vector<8x256xf32>
    %57 = arith.addi %15, %c0_i32_15 : i32
    %c3_i32 = arith.constant 3 : i32
    %58 = arith.subi %c3_i32, %57 : i32
    %59 = vector.broadcast %57 : i32 to vector<8x1xi32>
    %60 = arith.cmpi sgt, %11, %59 : vector<8x1xi32>
    %61 = arith.extui %60 : vector<8x1xi1> to vector<8x1xi32>
    %62 = arith.sitofp %61 : vector<8x1xi32> to vector<8x1xf32>
    %63 = vector.broadcast %58 : i32 to vector<8x1xi32>
    %64 = arith.cmpi sgt, %11, %63 : vector<8x1xi32>
    %65 = arith.extui %64 : vector<8x1xi1> to vector<8x1xi32>
    %66 = arith.sitofp %65 : vector<8x1xi32> to vector<8x1xf32>
    %cst_29 = arith.constant 1.000000e+00 : f32
    %67 = vector.shape_cast %14 : vector<1x256xi1> to vector<1x256xi1>
    %68 = vector.broadcast %67 : vector<1x256xi1> to vector<8x256xi1>
    %69 = vector.broadcast %cst_29 : f32 to vector<8x256xf32>
    %70 = vector.shape_cast %66 : vector<8x1xf32> to vector<8x1xf32>
    %71 = vector.broadcast %70 : vector<8x1xf32> to vector<8x256xf32>
    %72 = arith.select %68, %69, %71 : vector<8x256xi1>, vector<8x256xf32>
    %73 = arith.mulf %56, %72 : vector<8x256xf32>
    %74 = arith.mulf %54, %72 : vector<8x256xf32>
    %75 = vector.extract_strided_slice %73 {offsets = [0, 0], sizes = [8, 128], strides = [1, 1]} : vector<8x256xf32> to vector<8x128xf32>
    %76 = vector.broadcast %62 : vector<8x1xf32> to vector<8x128xf32>
    %77 = arith.mulf %75, %76 : vector<8x128xf32>
    %78 = arith.index_cast %c0_i32_15 : i32 to index
    %c0_30 = arith.constant 0 : index
    %c0_31 = arith.constant 0 : index
    %79 = vector.load %arg7[%78, %c0_30, %c0_31] : memref<4x8x128xf32, #tpu.memory_space<vmem>>, vector<1x8x128xf32>
    %80 = vector.shape_cast %79 : vector<1x8x128xf32> to vector<8x128xf32>
    %81 = vector.shape_cast %77 : vector<8x128xf32> to vector<1x8x128xf32>
    tpu.vector_store %arg7[%78, %c0_30, %c0_31], %81 {strides = array<i32>} : memref<4x8x128xf32, #tpu.memory_space<vmem>>, vector<1x8x128xf32>,
    %82 = vector.extract_strided_slice %73 {offsets = [0, 128], sizes = [8, 128], strides = [1, 1]} : vector<8x256xf32> to vector<8x128xf32>
    %c3_i32_32 = arith.constant 3 : i32
    %83 = arith.subi %c3_i32_32, %c0_i32_15 : i32
    %84 = arith.index_cast %83 : i32 to index
    %c0_33 = arith.constant 0 : index
    %c0_34 = arith.constant 0 : index
    %85 = vector.load %arg8[%84, %c0_33, %c0_34] : memref<4x8x128xf32, #tpu.memory_space<vmem>>, vector<1x8x128xf32>
    %86 = vector.shape_cast %85 : vector<1x8x128xf32> to vector<8x128xf32>
    %87 = vector.shape_cast %82 : vector<8x128xf32> to vector<1x8x128xf32>
    tpu.vector_store %arg8[%84, %c0_33, %c0_34], %87 {strides = array<i32>} : memref<4x8x128xf32, #tpu.memory_space<vmem>>, vector<1x8x128xf32>,
    %c1_i32 = arith.constant 1 : i32
    %c8_i32_35 = arith.constant 8 : i32
    %88 = arith.muli %c1_i32, %c8_i32_35 : i32
    %89 = tpu.assume_multiple %88, 8 : i32
    %90 = arith.index_cast %89 : i32 to index
    %c0_36 = arith.constant 0 : index
    %91 = vector.load %arg9[%90, %c0_36] : memref<32x1024xf32, #tpu.memory_space<vmem>>, vector<8x1024xf32>
    %92 = arith.truncf %73 : vector<8x256xf32> to vector<8x256xbf16>
    %c0_37 = arith.constant 0 : index
    %c0_38 = arith.constant 0 : index
    %93 = vector.load %arg6[%c0_37, %c0_38] : memref<256x1024xbf16, #tpu.memory_space<vmem>>, vector<256x1024xbf16>
    %cst_39 = arith.constant dense<0.000000e+00> : vector<8x1024xf32>
    %94 = tpu.matmul %92, %93, %cst_39 {dimension_numbers = #tpu.dot_dimension_numbers<[1], [0], [0], [1], [0, 0, 1, 1], [], []>} : vector<8x256xbf16>, vector<256x1024xbf16>, vector<8x1024xf32> -> vector<8x1024xf32>
    %95 = arith.addf %91, %94 : vector<8x1024xf32>
    %96 = vector.extract_strided_slice %95 {offsets = [0, 0], sizes = [8, 256], strides = [1, 1]} : vector<8x1024xf32> to vector<8x256xf32>
    %cst_40 = arith.constant 5.000000e-01 : f32
    %97 = vector.broadcast %cst_40 : f32 to vector<8x256xf32>
    %98 = arith.mulf %97, %96 : vector<8x256xf32>
    %99 = math.tanh %98 : vector<8x256xf32>
    %cst_41 = arith.constant 5.000000e-01 : f32
    %100 = vector.broadcast %cst_41 : f32 to vector<8x256xf32>
    %101 = arith.mulf %100, %99 : vector<8x256xf32>
    %cst_42 = arith.constant 5.000000e-01 : f32
    %102 = vector.broadcast %cst_42 : f32 to vector<8x256xf32>
    %103 = arith.addf %101, %102 : vector<8x256xf32>
    %104 = vector.extract_strided_slice %95 {offsets = [0, 256], sizes = [8, 256], strides = [1, 1]} : vector<8x1024xf32> to vector<8x256xf32>
    %cst_43 = arith.constant 5.000000e-01 : f32
    %105 = vector.broadcast %cst_43 : f32 to vector<8x256xf32>
    %106 = arith.mulf %105, %104 : vector<8x256xf32>
    %107 = math.tanh %106 : vector<8x256xf32>
    %cst_44 = arith.constant 5.000000e-01 : f32
    %108 = vector.broadcast %cst_44 : f32 to vector<8x256xf32>
    %109 = arith.mulf %108, %107 : vector<8x256xf32>
    %cst_45 = arith.constant 5.000000e-01 : f32
    %110 = vector.broadcast %cst_45 : f32 to vector<8x256xf32>
    %111 = arith.addf %109, %110 : vector<8x256xf32>
    %112 = vector.extract_strided_slice %95 {offsets = [0, 512], sizes = [8, 256], strides = [1, 1]} : vector<8x1024xf32> to vector<8x256xf32>
    %113 = math.tanh %112 : vector<8x256xf32>
    %114 = vector.extract_strided_slice %95 {offsets = [0, 768], sizes = [8, 256], strides = [1, 1]} : vector<8x1024xf32> to vector<8x256xf32>
    %cst_46 = arith.constant 5.000000e-01 : f32
    %115 = vector.broadcast %cst_46 : f32 to vector<8x256xf32>
    %116 = arith.mulf %115, %114 : vector<8x256xf32>
    %117 = math.tanh %116 : vector<8x256xf32>
    %cst_47 = arith.constant 5.000000e-01 : f32
    %118 = vector.broadcast %cst_47 : f32 to vector<8x256xf32>
    %119 = arith.mulf %118, %117 : vector<8x256xf32>
    %cst_48 = arith.constant 5.000000e-01 : f32
    %120 = vector.broadcast %cst_48 : f32 to vector<8x256xf32>
    %121 = arith.addf %119, %120 : vector<8x256xf32>
    %122 = arith.mulf %111, %74 : vector<8x256xf32>
    %123 = arith.mulf %103, %113 : vector<8x256xf32>
    %124 = arith.addf %122, %123 : vector<8x256xf32>
    %125 = math.tanh %124 : vector<8x256xf32>
    %126 = arith.mulf %121, %125 : vector<8x256xf32>
    %127 = arith.addi %15, %c1_i32 : i32
    %c3_i32_49 = arith.constant 3 : i32
    %128 = arith.subi %c3_i32_49, %127 : i32
    %129 = vector.broadcast %127 : i32 to vector<8x1xi32>
    %130 = arith.cmpi sgt, %11, %129 : vector<8x1xi32>
    %131 = arith.extui %130 : vector<8x1xi1> to vector<8x1xi32>
    %132 = arith.sitofp %131 : vector<8x1xi32> to vector<8x1xf32>
    %133 = vector.broadcast %128 : i32 to vector<8x1xi32>
    %134 = arith.cmpi sgt, %11, %133 : vector<8x1xi32>
    %135 = arith.extui %134 : vector<8x1xi1> to vector<8x1xi32>
    %136 = arith.sitofp %135 : vector<8x1xi32> to vector<8x1xf32>
    %cst_50 = arith.constant 1.000000e+00 : f32
    %137 = vector.shape_cast %14 : vector<1x256xi1> to vector<1x256xi1>
    %138 = vector.broadcast %137 : vector<1x256xi1> to vector<8x256xi1>
    %139 = vector.broadcast %cst_50 : f32 to vector<8x256xf32>
    %140 = vector.shape_cast %136 : vector<8x1xf32> to vector<8x1xf32>
    %141 = vector.broadcast %140 : vector<8x1xf32> to vector<8x256xf32>
    %142 = arith.select %138, %139, %141 : vector<8x256xi1>, vector<8x256xf32>
    %143 = arith.mulf %126, %142 : vector<8x256xf32>
    %144 = arith.mulf %124, %142 : vector<8x256xf32>
    %145 = vector.extract_strided_slice %143 {offsets = [0, 0], sizes = [8, 128], strides = [1, 1]} : vector<8x256xf32> to vector<8x128xf32>
    %146 = vector.broadcast %132 : vector<8x1xf32> to vector<8x128xf32>
    %147 = arith.mulf %145, %146 : vector<8x128xf32>
    %148 = arith.index_cast %c1_i32 : i32 to index
    %c0_51 = arith.constant 0 : index
    %c0_52 = arith.constant 0 : index
    %149 = vector.load %arg7[%148, %c0_51, %c0_52] : memref<4x8x128xf32, #tpu.memory_space<vmem>>, vector<1x8x128xf32>
    %150 = vector.shape_cast %149 : vector<1x8x128xf32> to vector<8x128xf32>
    %151 = vector.shape_cast %147 : vector<8x128xf32> to vector<1x8x128xf32>
    tpu.vector_store %arg7[%148, %c0_51, %c0_52], %151 {strides = array<i32>} : memref<4x8x128xf32, #tpu.memory_space<vmem>>, vector<1x8x128xf32>,
    %152 = vector.extract_strided_slice %143 {offsets = [0, 128], sizes = [8, 128], strides = [1, 1]} : vector<8x256xf32> to vector<8x128xf32>
    %c3_i32_53 = arith.constant 3 : i32
    %153 = arith.subi %c3_i32_53, %c1_i32 : i32
    %154 = arith.index_cast %153 : i32 to index
    %c0_54 = arith.constant 0 : index
    %c0_55 = arith.constant 0 : index
    %155 = vector.load %arg8[%154, %c0_54, %c0_55] : memref<4x8x128xf32, #tpu.memory_space<vmem>>, vector<1x8x128xf32>
    %156 = vector.shape_cast %155 : vector<1x8x128xf32> to vector<8x128xf32>
    %157 = vector.shape_cast %152 : vector<8x128xf32> to vector<1x8x128xf32>
    tpu.vector_store %arg8[%154, %c0_54, %c0_55], %157 {strides = array<i32>} : memref<4x8x128xf32, #tpu.memory_space<vmem>>, vector<1x8x128xf32>,
    %c2_i32 = arith.constant 2 : i32
    %c8_i32_56 = arith.constant 8 : i32
    %158 = arith.muli %c2_i32, %c8_i32_56 : i32
    %159 = tpu.assume_multiple %158, 8 : i32
    %160 = arith.index_cast %159 : i32 to index
    %c0_57 = arith.constant 0 : index
    %161 = vector.load %arg9[%160, %c0_57] : memref<32x1024xf32, #tpu.memory_space<vmem>>, vector<8x1024xf32>
    %162 = arith.truncf %143 : vector<8x256xf32> to vector<8x256xbf16>
    %c0_58 = arith.constant 0 : index
    %c0_59 = arith.constant 0 : index
    %163 = vector.load %arg6[%c0_58, %c0_59] : memref<256x1024xbf16, #tpu.memory_space<vmem>>, vector<256x1024xbf16>
    %cst_60 = arith.constant dense<0.000000e+00> : vector<8x1024xf32>
    %164 = tpu.matmul %162, %163, %cst_60 {dimension_numbers = #tpu.dot_dimension_numbers<[1], [0], [0], [1], [0, 0, 1, 1], [], []>} : vector<8x256xbf16>, vector<256x1024xbf16>, vector<8x1024xf32> -> vector<8x1024xf32>
    %165 = arith.addf %161, %164 : vector<8x1024xf32>
    %166 = vector.extract_strided_slice %165 {offsets = [0, 0], sizes = [8, 256], strides = [1, 1]} : vector<8x1024xf32> to vector<8x256xf32>
    %cst_61 = arith.constant 5.000000e-01 : f32
    %167 = vector.broadcast %cst_61 : f32 to vector<8x256xf32>
    %168 = arith.mulf %167, %166 : vector<8x256xf32>
    %169 = math.tanh %168 : vector<8x256xf32>
    %cst_62 = arith.constant 5.000000e-01 : f32
    %170 = vector.broadcast %cst_62 : f32 to vector<8x256xf32>
    %171 = arith.mulf %170, %169 : vector<8x256xf32>
    %cst_63 = arith.constant 5.000000e-01 : f32
    %172 = vector.broadcast %cst_63 : f32 to vector<8x256xf32>
    %173 = arith.addf %171, %172 : vector<8x256xf32>
    %174 = vector.extract_strided_slice %165 {offsets = [0, 256], sizes = [8, 256], strides = [1, 1]} : vector<8x1024xf32> to vector<8x256xf32>
    %cst_64 = arith.constant 5.000000e-01 : f32
    %175 = vector.broadcast %cst_64 : f32 to vector<8x256xf32>
    %176 = arith.mulf %175, %174 : vector<8x256xf32>
    %177 = math.tanh %176 : vector<8x256xf32>
    %cst_65 = arith.constant 5.000000e-01 : f32
    %178 = vector.broadcast %cst_65 : f32 to vector<8x256xf32>
    %179 = arith.mulf %178, %177 : vector<8x256xf32>
    %cst_66 = arith.constant 5.000000e-01 : f32
    %180 = vector.broadcast %cst_66 : f32 to vector<8x256xf32>
    %181 = arith.addf %179, %180 : vector<8x256xf32>
    %182 = vector.extract_strided_slice %165 {offsets = [0, 512], sizes = [8, 256], strides = [1, 1]} : vector<8x1024xf32> to vector<8x256xf32>
    %183 = math.tanh %182 : vector<8x256xf32>
    %184 = vector.extract_strided_slice %165 {offsets = [0, 768], sizes = [8, 256], strides = [1, 1]} : vector<8x1024xf32> to vector<8x256xf32>
    %cst_67 = arith.constant 5.000000e-01 : f32
    %185 = vector.broadcast %cst_67 : f32 to vector<8x256xf32>
    %186 = arith.mulf %185, %184 : vector<8x256xf32>
    %187 = math.tanh %186 : vector<8x256xf32>
    %cst_68 = arith.constant 5.000000e-01 : f32
    %188 = vector.broadcast %cst_68 : f32 to vector<8x256xf32>
    %189 = arith.mulf %188, %187 : vector<8x256xf32>
    %cst_69 = arith.constant 5.000000e-01 : f32
    %190 = vector.broadcast %cst_69 : f32 to vector<8x256xf32>
    %191 = arith.addf %189, %190 : vector<8x256xf32>
    %192 = arith.mulf %181, %144 : vector<8x256xf32>
    %193 = arith.mulf %173, %183 : vector<8x256xf32>
    %194 = arith.addf %192, %193 : vector<8x256xf32>
    %195 = math.tanh %194 : vector<8x256xf32>
    %196 = arith.mulf %191, %195 : vector<8x256xf32>
    %197 = arith.addi %15, %c2_i32 : i32
    %c3_i32_70 = arith.constant 3 : i32
    %198 = arith.subi %c3_i32_70, %197 : i32
    %199 = vector.broadcast %197 : i32 to vector<8x1xi32>
    %200 = arith.cmpi sgt, %11, %199 : vector<8x1xi32>
    %201 = arith.extui %200 : vector<8x1xi1> to vector<8x1xi32>
    %202 = arith.sitofp %201 : vector<8x1xi32> to vector<8x1xf32>
    %203 = vector.broadcast %198 : i32 to vector<8x1xi32>
    %204 = arith.cmpi sgt, %11, %203 : vector<8x1xi32>
    %205 = arith.extui %204 : vector<8x1xi1> to vector<8x1xi32>
    %206 = arith.sitofp %205 : vector<8x1xi32> to vector<8x1xf32>
    %cst_71 = arith.constant 1.000000e+00 : f32
    %207 = vector.shape_cast %14 : vector<1x256xi1> to vector<1x256xi1>
    %208 = vector.broadcast %207 : vector<1x256xi1> to vector<8x256xi1>
    %209 = vector.broadcast %cst_71 : f32 to vector<8x256xf32>
    %210 = vector.shape_cast %206 : vector<8x1xf32> to vector<8x1xf32>
    %211 = vector.broadcast %210 : vector<8x1xf32> to vector<8x256xf32>
    %212 = arith.select %208, %209, %211 : vector<8x256xi1>, vector<8x256xf32>
    %213 = arith.mulf %196, %212 : vector<8x256xf32>
    %214 = arith.mulf %194, %212 : vector<8x256xf32>
    %215 = vector.extract_strided_slice %213 {offsets = [0, 0], sizes = [8, 128], strides = [1, 1]} : vector<8x256xf32> to vector<8x128xf32>
    %216 = vector.broadcast %202 : vector<8x1xf32> to vector<8x128xf32>
    %217 = arith.mulf %215, %216 : vector<8x128xf32>
    %218 = arith.index_cast %c2_i32 : i32 to index
    %c0_72 = arith.constant 0 : index
    %c0_73 = arith.constant 0 : index
    %219 = vector.load %arg7[%218, %c0_72, %c0_73] : memref<4x8x128xf32, #tpu.memory_space<vmem>>, vector<1x8x128xf32>
    %220 = vector.shape_cast %219 : vector<1x8x128xf32> to vector<8x128xf32>
    %221 = vector.shape_cast %217 : vector<8x128xf32> to vector<1x8x128xf32>
    tpu.vector_store %arg7[%218, %c0_72, %c0_73], %221 {strides = array<i32>} : memref<4x8x128xf32, #tpu.memory_space<vmem>>, vector<1x8x128xf32>,
    %222 = vector.extract_strided_slice %213 {offsets = [0, 128], sizes = [8, 128], strides = [1, 1]} : vector<8x256xf32> to vector<8x128xf32>
    %c3_i32_74 = arith.constant 3 : i32
    %223 = arith.subi %c3_i32_74, %c2_i32 : i32
    %224 = arith.index_cast %223 : i32 to index
    %c0_75 = arith.constant 0 : index
    %c0_76 = arith.constant 0 : index
    %225 = vector.load %arg8[%224, %c0_75, %c0_76] : memref<4x8x128xf32, #tpu.memory_space<vmem>>, vector<1x8x128xf32>
    %226 = vector.shape_cast %225 : vector<1x8x128xf32> to vector<8x128xf32>
    %227 = vector.shape_cast %222 : vector<8x128xf32> to vector<1x8x128xf32>
    tpu.vector_store %arg8[%224, %c0_75, %c0_76], %227 {strides = array<i32>} : memref<4x8x128xf32, #tpu.memory_space<vmem>>, vector<1x8x128xf32>,
    %c3_i32_77 = arith.constant 3 : i32
    %c8_i32_78 = arith.constant 8 : i32
    %228 = arith.muli %c3_i32_77, %c8_i32_78 : i32
    %229 = tpu.assume_multiple %228, 8 : i32
    %230 = arith.index_cast %229 : i32 to index
    %c0_79 = arith.constant 0 : index
    %231 = vector.load %arg9[%230, %c0_79] : memref<32x1024xf32, #tpu.memory_space<vmem>>, vector<8x1024xf32>
    %232 = arith.truncf %213 : vector<8x256xf32> to vector<8x256xbf16>
    %c0_80 = arith.constant 0 : index
    %c0_81 = arith.constant 0 : index
    %233 = vector.load %arg6[%c0_80, %c0_81] : memref<256x1024xbf16, #tpu.memory_space<vmem>>, vector<256x1024xbf16>
    %cst_82 = arith.constant dense<0.000000e+00> : vector<8x1024xf32>
    %234 = tpu.matmul %232, %233, %cst_82 {dimension_numbers = #tpu.dot_dimension_numbers<[1], [0], [0], [1], [0, 0, 1, 1], [], []>} : vector<8x256xbf16>, vector<256x1024xbf16>, vector<8x1024xf32> -> vector<8x1024xf32>
    %235 = arith.addf %231, %234 : vector<8x1024xf32>
    %236 = vector.extract_strided_slice %235 {offsets = [0, 0], sizes = [8, 256], strides = [1, 1]} : vector<8x1024xf32> to vector<8x256xf32>
    %cst_83 = arith.constant 5.000000e-01 : f32
    %237 = vector.broadcast %cst_83 : f32 to vector<8x256xf32>
    %238 = arith.mulf %237, %236 : vector<8x256xf32>
    %239 = math.tanh %238 : vector<8x256xf32>
    %cst_84 = arith.constant 5.000000e-01 : f32
    %240 = vector.broadcast %cst_84 : f32 to vector<8x256xf32>
    %241 = arith.mulf %240, %239 : vector<8x256xf32>
    %cst_85 = arith.constant 5.000000e-01 : f32
    %242 = vector.broadcast %cst_85 : f32 to vector<8x256xf32>
    %243 = arith.addf %241, %242 : vector<8x256xf32>
    %244 = vector.extract_strided_slice %235 {offsets = [0, 256], sizes = [8, 256], strides = [1, 1]} : vector<8x1024xf32> to vector<8x256xf32>
    %cst_86 = arith.constant 5.000000e-01 : f32
    %245 = vector.broadcast %cst_86 : f32 to vector<8x256xf32>
    %246 = arith.mulf %245, %244 : vector<8x256xf32>
    %247 = math.tanh %246 : vector<8x256xf32>
    %cst_87 = arith.constant 5.000000e-01 : f32
    %248 = vector.broadcast %cst_87 : f32 to vector<8x256xf32>
    %249 = arith.mulf %248, %247 : vector<8x256xf32>
    %cst_88 = arith.constant 5.000000e-01 : f32
    %250 = vector.broadcast %cst_88 : f32 to vector<8x256xf32>
    %251 = arith.addf %249, %250 : vector<8x256xf32>
    %252 = vector.extract_strided_slice %235 {offsets = [0, 512], sizes = [8, 256], strides = [1, 1]} : vector<8x1024xf32> to vector<8x256xf32>
    %253 = math.tanh %252 : vector<8x256xf32>
    %254 = vector.extract_strided_slice %235 {offsets = [0, 768], sizes = [8, 256], strides = [1, 1]} : vector<8x1024xf32> to vector<8x256xf32>
    %cst_89 = arith.constant 5.000000e-01 : f32
    %255 = vector.broadcast %cst_89 : f32 to vector<8x256xf32>
    %256 = arith.mulf %255, %254 : vector<8x256xf32>
    %257 = math.tanh %256 : vector<8x256xf32>
    %cst_90 = arith.constant 5.000000e-01 : f32
    %258 = vector.broadcast %cst_90 : f32 to vector<8x256xf32>
    %259 = arith.mulf %258, %257 : vector<8x256xf32>
    %cst_91 = arith.constant 5.000000e-01 : f32
    %260 = vector.broadcast %cst_91 : f32 to vector<8x256xf32>
    %261 = arith.addf %259, %260 : vector<8x256xf32>
    %262 = arith.mulf %251, %214 : vector<8x256xf32>
    %263 = arith.mulf %243, %253 : vector<8x256xf32>
    %264 = arith.addf %262, %263 : vector<8x256xf32>
    %265 = math.tanh %264 : vector<8x256xf32>
    %266 = arith.mulf %261, %265 : vector<8x256xf32>
    %267 = arith.addi %15, %c3_i32_77 : i32
    %c3_i32_92 = arith.constant 3 : i32
    %268 = arith.subi %c3_i32_92, %267 : i32
    %269 = vector.broadcast %267 : i32 to vector<8x1xi32>
    %270 = arith.cmpi sgt, %11, %269 : vector<8x1xi32>
    %271 = arith.extui %270 : vector<8x1xi1> to vector<8x1xi32>
    %272 = arith.sitofp %271 : vector<8x1xi32> to vector<8x1xf32>
    %273 = vector.broadcast %268 : i32 to vector<8x1xi32>
    %274 = arith.cmpi sgt, %11, %273 : vector<8x1xi32>
    %275 = arith.extui %274 : vector<8x1xi1> to vector<8x1xi32>
    %276 = arith.sitofp %275 : vector<8x1xi32> to vector<8x1xf32>
    %cst_93 = arith.constant 1.000000e+00 : f32
    %277 = vector.shape_cast %14 : vector<1x256xi1> to vector<1x256xi1>
    %278 = vector.broadcast %277 : vector<1x256xi1> to vector<8x256xi1>
    %279 = vector.broadcast %cst_93 : f32 to vector<8x256xf32>
    %280 = vector.shape_cast %276 : vector<8x1xf32> to vector<8x1xf32>
    %281 = vector.broadcast %280 : vector<8x1xf32> to vector<8x256xf32>
    %282 = arith.select %278, %279, %281 : vector<8x256xi1>, vector<8x256xf32>
    %283 = arith.mulf %266, %282 : vector<8x256xf32>
    %284 = arith.mulf %264, %282 : vector<8x256xf32>
    %285 = vector.extract_strided_slice %283 {offsets = [0, 0], sizes = [8, 128], strides = [1, 1]} : vector<8x256xf32> to vector<8x128xf32>
    %286 = vector.broadcast %272 : vector<8x1xf32> to vector<8x128xf32>
    %287 = arith.mulf %285, %286 : vector<8x128xf32>
    %288 = arith.index_cast %c3_i32_77 : i32 to index
    %c0_94 = arith.constant 0 : index
    %c0_95 = arith.constant 0 : index
    %289 = vector.load %arg7[%288, %c0_94, %c0_95] : memref<4x8x128xf32, #tpu.memory_space<vmem>>, vector<1x8x128xf32>
    %290 = vector.shape_cast %289 : vector<1x8x128xf32> to vector<8x128xf32>
    %291 = vector.shape_cast %287 : vector<8x128xf32> to vector<1x8x128xf32>
    tpu.vector_store %arg7[%288, %c0_94, %c0_95], %291 {strides = array<i32>} : memref<4x8x128xf32, #tpu.memory_space<vmem>>, vector<1x8x128xf32>,
    %292 = vector.extract_strided_slice %283 {offsets = [0, 128], sizes = [8, 128], strides = [1, 1]} : vector<8x256xf32> to vector<8x128xf32>
    %c3_i32_96 = arith.constant 3 : i32
    %293 = arith.subi %c3_i32_96, %c3_i32_77 : i32
    %294 = arith.index_cast %293 : i32 to index
    %c0_97 = arith.constant 0 : index
    %c0_98 = arith.constant 0 : index
    %295 = vector.load %arg8[%294, %c0_97, %c0_98] : memref<4x8x128xf32, #tpu.memory_space<vmem>>, vector<1x8x128xf32>
    %296 = vector.shape_cast %295 : vector<1x8x128xf32> to vector<8x128xf32>
    %297 = vector.shape_cast %292 : vector<8x128xf32> to vector<1x8x128xf32>
    tpu.vector_store %arg8[%294, %c0_97, %c0_98], %297 {strides = array<i32>} : memref<4x8x128xf32, #tpu.memory_space<vmem>>, vector<1x8x128xf32>,
    %c4_i32_99 = arith.constant 4 : i32
    %c0_100 = arith.constant 0 : index
    %c0_101 = arith.constant 0 : index
    %298 = vector.load %arg10[%c0_100, %c0_101] : memref<8x256xf32, #tpu.memory_space<vmem>>, vector<8x256xf32>
    tpu.vector_store %arg10[%c0_100, %c0_101], %283 {strides = array<i32>} : memref<8x256xf32, #tpu.memory_space<vmem>>, vector<8x256xf32>,
    %c0_102 = arith.constant 0 : index
    %c0_103 = arith.constant 0 : index
    %299 = vector.load %arg11[%c0_102, %c0_103] : memref<8x256xf32, #tpu.memory_space<vmem>>, vector<8x256xf32>
    tpu.vector_store %arg11[%c0_102, %c0_103], %284 {strides = array<i32>} : memref<8x256xf32, #tpu.memory_space<vmem>>, vector<8x256xf32>,
    return
  }
  func.func @transform_0(%arg0: i32, %arg1: i32) -> (i32, i32) {
    %c0_i32 = arith.constant 0 : i32
    %c0_i32_0 = arith.constant 0 : i32
    return %arg0, %c0_i32 : i32, i32
  }
  func.func @transform_1(%arg0: i32, %arg1: i32) -> (i32, i32, i32) {
    %c0_i32 = arith.constant 0 : i32
    %c0_i32_0 = arith.constant 0 : i32
    return %arg1, %arg0, %c0_i32 : i32, i32, i32
  }
  func.func @transform_2(%arg0: i32, %arg1: i32) -> (i32, i32) {
    %c0_i32 = arith.constant 0 : i32
    %c0_i32_0 = arith.constant 0 : i32
    %c0_i32_1 = arith.constant 0 : i32
    return %c0_i32, %c0_i32_0 : i32, i32
  }
  func.func @transform_3(%arg0: i32, %arg1: i32) -> (i32, i32) {
    %c0_i32 = arith.constant 0 : i32
    %c0_i32_0 = arith.constant 0 : i32
    %c0_i32_1 = arith.constant 0 : i32
    return %c0_i32, %c0_i32_0 : i32, i32
  }
  func.func @transform_4(%arg0: i32, %arg1: i32) -> (i32, i32) {
    %c0_i32 = arith.constant 0 : i32
    %c0_i32_0 = arith.constant 0 : i32
    %c0_i32_1 = arith.constant 0 : i32
    return %c0_i32, %c0_i32_0 : i32, i32
  }
  func.func @transform_5(%arg0: i32, %arg1: i32) -> (i32, i32, i32) {
    %c0_i32 = arith.constant 0 : i32
    %c0_i32_0 = arith.constant 0 : i32
    return %arg1, %arg0, %c0_i32 : i32, i32, i32
  }
  func.func @transform_6(%arg0: i32, %arg1: i32) -> (i32, i32, i32) {
    %c0_i32 = arith.constant 0 : i32
    %0 = arith.subi %c0_i32, %arg1 : i32
    %c0_i32_0 = arith.constant 0 : i32
    %c0_i32_1 = arith.constant 0 : i32
    return %0, %arg0, %c0_i32_0 : i32, i32, i32
  }
}

</mosaic_0001>

<bundles_post_ra>
// kernel: _lambda_.1
= control target key start
LH: loop header
LB: loop body
LE: loop exit
PB: predicated region body
PF: predicated region fallthrough
CT: control target
= control target key end

     0   :  { %v5549_v3 = vmov 0   ;;  %s7758_s2 = inlined_call_operand.vmem [shape: bf16[128,1024], index: 2, kind: input, shape index: {}]   ;;  %s7759_s1 = inlined_call_operand.vmem [shape: bf16[4,8,128], index: 1, kind: input, shape index: {}]   ;;  %s7760_s4 = inlined_call_operand.vmem [shape: bf16[256,1024], index: 4, kind: input, shape index: {}]   ;;  %s7761_s0 = inlined_call_operand.vmem [shape: s32[8,1], index: 0, kind: input, shape index: {}]   ;;  %s7762_s3 = inlined_call_operand.vmem [shape: f32[1,1024], index: 3, kind: input, shape index: {}]   ;;  %s7763_s5 = inlined_call_operand.vmem [shape: f32[4,8,128], index: 5, kind: output, shape index: {0}]   ;;  %s7764_s6 = inlined_call_operand.vmem [shape: f32[4,8,128], index: 6, kind: output, shape index: {1}]  }
   0x1   :  { %v49_v0 = vld [vmem:[%s7758_s2] sm:$0xff]  ;;  %v50_v2 = vld [vmem:[%s7758_s2 + $0x8] sm:$0xff]  ;;  %519 = vmatprep.mubr.bf16.mxu0 %v5549_v3  ;;  %572 = vmatprep.mubr.bf16.mxu1 %v5549_v3  ;;  %v51_v63 = vld [vmem:[%s7758_s2 + $0x10] sm:$0xff] }
   0x2   :  { %v53_v1 = vld [vmem:[%s7758_s2 + $0x20] sm:$0xff]  ;;  %v54_v5 = vld [vmem:[%s7758_s2 + $0x28] sm:$0xff]  ;;  %5455 = vset.pattern.permute.xlu0 %v5549_v3  ;;  %5456 = vset.pattern.permute.xlu1 %v5549_v3 }
   0x3   :  { %v4863_v4 = vcombine.high %v49_v0, %v53_v1  ;;  %v4862_v6 = vcombine.low %v49_v0, %v53_v1  ;;  %v57_v7 = vld [vmem:[%s7758_s2 + $0x40] sm:$0xff]  ;;  %v4865_v9 = vcombine.high %v50_v2, %v54_v5  ;;  %v4864_v10 = vcombine.low %v50_v2, %v54_v5  ;;  %v58_v12 = vld [vmem:[%s7758_s2 + $0x48] sm:$0xff]  ;;  %v55_v0 = vld [vmem:[%s7758_s2 + $0x30] sm:$0xff] }
   0x4   :  { %v61_v8 = vld [vmem:[%s7758_s2 + $0x60] sm:$0xff]  ;;  %v62_v13 = vld [vmem:[%s7758_s2 + $0x68] sm:$0xff]  ;;  %v52_v1 = vld [vmem:[%s7758_s2 + $0x18] sm:$0xff] }
   0x5   :  { %v4871_v11 = vcombine.high %v57_v7, %v61_v8  ;;  %v65_v14 = vld [vmem:[%s7758_s2 + $0x80] sm:$0xff]  ;;  %487 = vmatprep.subr.bf16.mxu0 %v4863_v4  ;;  %v4873_v15 = vcombine.high %v58_v12, %v62_v13  ;;  %v66_v17 = vld [vmem:[%s7758_s2 + $0x88] sm:$0xff]  ;;  %540 = vmatprep.subr.bf16.mxu1 %v4865_v9  ;;  %v4870_v19 = vcombine.low %v57_v7, %v61_v8  ;;  %v56_v2 = vld [vmem:[%s7758_s2 + $0x38] sm:$0xff] }
   0x6   :  { %v69_v16 = vld [vmem:[%s7758_s2 + $0xa0] sm:$0xff]  ;;  %v70_v18 = vld [vmem:[%s7758_s2 + $0xa8] sm:$0xff]  ;;  %488 = vmatpush1.bf16.msra.mxu0 %v4862_v6  ;;  %541 = vmatpush1.bf16.msra.mxu1 %v4864_v10  ;;  %v4872_v20 = vcombine.low %v58_v12, %v62_v13  ;;  %v4867_v6 = vcombine.high %v51_v63, %v55_v0  ;;  %v4869_v7 = vcombine.high %v52_v1, %v56_v2  ;;  %v59_v8 = vld [vmem:[%s7758_s2 + $0x50] sm:$0xff] }
   0x7   :  { %489 = vmatprep.subr.bf16.mxu0 %v4871_v11  ;;  %v4879_v21 = vcombine.high %v65_v14, %v69_v16  ;;  %542 = vmatprep.subr.bf16.mxu1 %v4873_v15  ;;  %v4881_v22 = vcombine.high %v66_v17, %v70_v18  ;;  %v73_v23 = vld [vmem:[%s7758_s2 + $0xc0] sm:$0xff]  ;;  %v74_v25 = vld [vmem:[%s7758_s2 + $0xc8] sm:$0xff]  ;;  %v4878_v27 = vcombine.low %v65_v14, %v69_v16  ;;  %v63_v9 = vld [vmem:[%s7758_s2 + $0x70] sm:$0xff] }
   0x8   :  { %v77_v24 = vld [vmem:[%s7758_s2 + $0xe0] sm:$0xff]  ;;  %v78_v26 = vld [vmem:[%s7758_s2 + $0xe8] sm:$0xff]  ;;  %v4880_v28 = vcombine.low %v66_v17, %v70_v18  ;;  %v60_v11 = vld [vmem:[%s7758_s2 + $0x58] sm:$0xff]  ;;  %v4866_v13 = vcombine.low %v51_v63, %v55_v0  ;;  %v4868_v14 = vcombine.low %v52_v1, %v56_v2  ;;  %v4875_v15 = vcombine.high %v59_v8, %v63_v9 }
   0x9   :  { %v4887_v29 = vcombine.high %v73_v23, %v77_v24  ;;  %v4889_v30 = vcombine.high %v74_v25, %v78_v26  ;;  %v81_v31 = vld [vmem:[%s7758_s2 + $0x100] sm:$0xff]  ;;  %v82_v33 = vld [vmem:[%s7758_s2 + $0x108] sm:$0xff]  ;;  %v4886_v35 = vcombine.low %v73_v23, %v77_v24  ;;  %v4888_v36 = vcombine.low %v74_v25, %v78_v26  ;;  %v64_v12 = vld [vmem:[%s7758_s2 + $0x78] sm:$0xff] }
   0xa   :  { %490 = vmatpush1.bf16.msra.mxu0 %v4870_v19  ;;  %543 = vmatpush1.bf16.msra.mxu1 %v4872_v20  ;;  %v85_v32 = vld [vmem:[%s7758_s2 + $0x120] sm:$0xff]  ;;  %v86_v34 = vld [vmem:[%s7758_s2 + $0x128] sm:$0xff]  ;;  %v4877_v16 = vcombine.high %v60_v11, %v64_v12  ;;  %v67_v17 = vld [vmem:[%s7758_s2 + $0x90] sm:$0xff] }
   0xb   :  { %491 = vmatprep.subr.bf16.mxu0 %v4879_v21  ;;  %544 = vmatprep.subr.bf16.mxu1 %v4881_v22  ;;  %v4895_v37 = vcombine.high %v81_v31, %v85_v32  ;;  %v4897_v38 = vcombine.high %v82_v33, %v86_v34  ;;  %v89_v39 = vld [vmem:[%s7758_s2 + $0x140] sm:$0xff]  ;;  %v90_v41 = vld [vmem:[%s7758_s2 + $0x148] sm:$0xff]  ;;  %v4894_v43 = vcombine.low %v81_v31, %v85_v32  ;;  %v71_v18 = vld [vmem:[%s7758_s2 + $0xb0] sm:$0xff] }
   0xc   :  { %v93_v40 = vld [vmem:[%s7758_s2 + $0x160] sm:$0xff]  ;;  %v94_v42 = vld [vmem:[%s7758_s2 + $0x168] sm:$0xff]  ;;  %v4896_v44 = vcombine.low %v82_v33, %v86_v34  ;;  %v68_v19 = vld [vmem:[%s7758_s2 + $0x98] sm:$0xff]  ;;  %v4874_v21 = vcombine.low %v59_v8, %v63_v9  ;;  %v4876_v22 = vcombine.low %v60_v11, %v64_v12  ;;  %v4883_v23 = vcombine.high %v67_v17, %v71_v18 }
   0xd   :  { %v4903_v45 = vcombine.high %v89_v39, %v93_v40  ;;  %v4905_v46 = vcombine.high %v90_v41, %v94_v42  ;;  %v97_v47 = vld [vmem:[%s7758_s2 + $0x180] sm:$0xff]  ;;  %v98_v49 = vld [vmem:[%s7758_s2 + $0x188] sm:$0xff]  ;;  %v4902_v51 = vcombine.low %v89_v39, %v93_v40  ;;  %v4904_v52 = vcombine.low %v90_v41, %v94_v42  ;;  %v72_v20 = vld [vmem:[%s7758_s2 + $0xb8] sm:$0xff] }
   0xe   :  { %492 = vmatpush1.bf16.msra.mxu0 %v4878_v27  ;;  %545 = vmatpush1.bf16.msra.mxu1 %v4880_v28  ;;  %v101_v48 = vld [vmem:[%s7758_s2 + $0x1a0] sm:$0xff]  ;;  %v102_v50 = vld [vmem:[%s7758_s2 + $0x1a8] sm:$0xff]  ;;  %v4885_v24 = vcombine.high %v68_v19, %v72_v20  ;;  %v75_v25 = vld [vmem:[%s7758_s2 + $0xd0] sm:$0xff]  ;;  %v4884_v31 = vcombine.low %v68_v19, %v72_v20 }
   0xf   :  { %493 = vmatprep.subr.bf16.mxu0 %v4887_v29  ;;  %546 = vmatprep.subr.bf16.mxu1 %v4889_v30  ;;  %v4911_v53 = vcombine.high %v97_v47, %v101_v48  ;;  %v4913_v54 = vcombine.high %v98_v49, %v102_v50  ;;  %v105_v55 = vld [vmem:[%s7758_s2 + $0x1c0] sm:$0xff]  ;;  %v106_v57 = vld [vmem:[%s7758_s2 + $0x1c8] sm:$0xff]  ;;  %v4910_v59 = vcombine.low %v97_v47, %v101_v48  ;;  %v79_v26 = vld [vmem:[%s7758_s2 + $0xf0] sm:$0xff] }
  0x10   :  { %v109_v56 = vld [vmem:[%s7758_s2 + $0x1e0] sm:$0xff]  ;;  %v110_v58 = vld [vmem:[%s7758_s2 + $0x1e8] sm:$0xff]  ;;  %v4912_v60 = vcombine.low %v98_v49, %v102_v50  ;;  %v76_v27 = vld [vmem:[%s7758_s2 + $0xd8] sm:$0xff]  ;;  %v4882_v30 = vcombine.low %v67_v17, %v71_v18  ;;  %v4891_v32 = vcombine.high %v75_v25, %v79_v26 }
  0x11   :  { %v4919_v61 = vcombine.high %v105_v55, %v109_v56  ;;  %v4921_v62 = vcombine.high %v106_v57, %v110_v58  ;;  %v4918_v4 = vcombine.low %v105_v55, %v109_v56  ;;  %v4920_v5 = vcombine.low %v106_v57, %v110_v58  ;;  %v5708_v10 = vld [vmem:[%s7759_s1] sm:$0xff]   ;;  %v80_v28 = vld [vmem:[%s7758_s2 + $0xf8] sm:$0xff]  ;;  %v5746_v29 = vld [vmem:[%s7759_s1 + $0x8] sm:$0xff]  }
  0x12   :  { %494 = vmatpush1.bf16.msra.mxu0 %v4886_v35  ;;  %547 = vmatpush1.bf16.msra.mxu1 %v4888_v36  ;;  %v4893_v33 = vcombine.high %v76_v27, %v80_v28  ;;  %v83_v34 = vld [vmem:[%s7758_s2 + $0x110] sm:$0xff]  ;;  %v84_v36 = vld [vmem:[%s7758_s2 + $0x118] sm:$0xff]  ;;  %v4892_v39 = vcombine.low %v76_v27, %v80_v28  ;;  %v755_v2 = vld [vmem:[%s7760_s4] sm:$0xff] }
  0x13   :  { %495 = vmatprep.subr.bf16.mxu0 %v4895_v37  ;;  %548 = vmatprep.subr.bf16.mxu1 %v4897_v38  ;;  %v87_v35 = vld [vmem:[%s7758_s2 + $0x130] sm:$0xff]  ;;  %v88_v37 = vld [vmem:[%s7758_s2 + $0x138] sm:$0xff]  ;;  %v4890_v38 = vcombine.low %v75_v25, %v79_v26  ;;  %v763_v12 = vld [vmem:[%s7760_s4 + $0x40] sm:$0xff] }
  0x14   :  { %v4899_v40 = vcombine.high %v83_v34, %v87_v35  ;;  %v4901_v41 = vcombine.high %v84_v36, %v88_v37  ;;  %v91_v42 = vld [vmem:[%s7758_s2 + $0x150] sm:$0xff]  ;;  %v4900_v47 = vcombine.low %v84_v36, %v88_v37  ;;  %v771_v20 = vld [vmem:[%s7760_s4 + $0x80] sm:$0xff] }
  0x15   :  { %v99_v50 = vld [vmem:[%s7758_s2 + $0x190] sm:$0xff]  ;;  %v779_v28 = vld [vmem:[%s7760_s4 + $0xc0] sm:$0xff] }
  0x16   :  { %496 = vmatpush1.bf16.msra.mxu0 %v4894_v43  ;;  %549 = vmatpush1.bf16.msra.mxu1 %v4896_v44  ;;  %v95_v43 = vld [vmem:[%s7758_s2 + $0x170] sm:$0xff]  ;;  %v92_v44 = vld [vmem:[%s7758_s2 + $0x158] sm:$0xff]  ;;  %v787_v36 = vld [vmem:[%s7760_s4 + $0x100] sm:$0xff] }
  0x17   :  { %497 = vmatprep.subr.bf16.mxu0 %v4903_v45  ;;  %550 = vmatprep.subr.bf16.mxu1 %v4905_v46  ;;  %v96_v45 = vld [vmem:[%s7758_s2 + $0x178] sm:$0xff]  ;;  %v4898_v46 = vcombine.low %v83_v34, %v87_v35  ;;  %v4907_v48 = vcombine.high %v91_v42, %v95_v43  ;;  %v107_v58 = vld [vmem:[%s7758_s2 + $0x1d0] sm:$0xff]  ;;  %v791_v37 = vld [vmem:[%s7760_s4 + $0x120] sm:$0xff] }
  0x18   :  { %v4909_v49 = vcombine.high %v92_v44, %v96_v45  ;;  %v4908_v55 = vcombine.low %v92_v44, %v96_v45  ;;  %v799_v44 = vld [vmem:[%s7760_s4 + $0x160] sm:$0xff]  ;;  %v5550_v45 = vmov 0.0|0.0  }
  0x1a   :  { %498 = vmatpush1.bf16.msra.mxu0 %v4902_v51  ;;  %551 = vmatpush1.bf16.msra.mxu1 %v4904_v52  ;;  %v103_v51 = vld [vmem:[%s7758_s2 + $0x1b0] sm:$0xff]  ;;  %v100_v52 = vld [vmem:[%s7758_s2 + $0x198] sm:$0xff] }
  0x1b   :  { %499 = vmatprep.subr.bf16.mxu0 %v4911_v53  ;;  %552 = vmatprep.subr.bf16.mxu1 %v4913_v54  ;;  %v104_v53 = vld [vmem:[%s7758_s2 + $0x1b8] sm:$0xff]  ;;  %v4906_v54 = vcombine.low %v91_v42, %v95_v43  ;;  %v4915_v56 = vcombine.high %v99_v50, %v103_v51  ;;  %v795_v43 = vld [vmem:[%s7760_s4 + $0x140] sm:$0xff] }
  0x1c   :  { %v4917_v57 = vcombine.high %v100_v52, %v104_v53  ;;  %v4916_v63 = vcombine.low %v100_v52, %v104_v53  ;;  %v807_v52 = vld [vmem:[%s7760_s4 + $0x1a0] sm:$0xff]  ;;  %v804_v53 = vld [vmem:[%s7760_s4 + $0x188] sm:$0xff] }
  0x1e   :  { %500 = vmatpush1.bf16.msra.mxu0 %v4910_v59  ;;  %553 = vmatpush1.bf16.msra.mxu1 %v4912_v60  ;;  %v111_v59 = vld [vmem:[%s7758_s2 + $0x1f0] sm:$0xff]  ;;  %v108_v60 = vld [vmem:[%s7758_s2 + $0x1d8] sm:$0xff] }
  0x1f   :  { %501 = vmatprep.subr.bf16.mxu0 %v4919_v61  ;;  %554 = vmatprep.subr.bf16.mxu1 %v4921_v62  ;;  %v112_v61 = vld [vmem:[%s7758_s2 + $0x1f8] sm:$0xff]  ;;  %v4914_v62 = vcombine.low %v99_v50, %v103_v51  ;;  %v4923_v0 = vcombine.high %v107_v58, %v111_v59  ;;  %v803_v51 = vld [vmem:[%s7760_s4 + $0x180] sm:$0xff] }
  0x20   :  { %v4925_v1 = vcombine.high %v108_v60, %v112_v61  ;;  %v4924_v8 = vcombine.low %v108_v60, %v112_v61  ;;  %v815_v60 = vld [vmem:[%s7760_s4 + $0x1e0] sm:$0xff]  ;;  %v812_v61 = vld [vmem:[%s7760_s4 + $0x1c8] sm:$0xff] }
  0x22   :  { %502 = vmatpush1.bf16.msra.mxu0 %v4918_v4  ;;  %555 = vmatpush1.bf16.msra.mxu1 %v4920_v5  ;;  %v759_v4 = vld [vmem:[%s7760_s4 + $0x20] sm:$0xff]  ;;  %v756_v5 = vld [vmem:[%s7760_s4 + $0x8] sm:$0xff] }
  0x23   :  { %593 = vmatprep.subr.bf16.mxu0 %v4867_v6  ;;  %646 = vmatprep.subr.bf16.mxu1 %v4869_v7  ;;  %v760_v6 = vld [vmem:[%s7760_s4 + $0x28] sm:$0xff]  ;;  %v4922_v7 = vcombine.low %v107_v58, %v111_v59  ;;  %v4927_v9 = vcombine.high %v755_v2, %v759_v4  ;;  %v811_v59 = vld [vmem:[%s7760_s4 + $0x1c0] sm:$0xff] }
  0x24   :  { %v4929_v11 = vcombine.high %v756_v5, %v760_v6  ;;  %v4928_v17 = vcombine.low %v756_v5, %v760_v6  ;;  %v823_v5 = vld [vmem:[%s7760_s4 + $0x220] sm:$0xff]  ;;  %v820_v6 = vld [vmem:[%s7760_s4 + $0x208] sm:$0xff] }
  0x25   :  { %520 = vmatmul.mubr.bf16.vlgmr.msra.gmra.mrb[0].mxu0 %v5708_v10  ;;  %573 = vmatmul.mubr.bf16.vlgmr.msra.gmra.mrb[0].mxu1 %v5708_v10 }
  0x26   :  { %594 = vmatpush1.bf16.msra.mxu0 %v4866_v13  ;;  %647 = vmatpush1.bf16.msra.mxu1 %v4868_v14  ;;  %v767_v13 = vld [vmem:[%s7760_s4 + $0x60] sm:$0xff]  ;;  %v764_v14 = vld [vmem:[%s7760_s4 + $0x48] sm:$0xff] }
  0x27   :  { %595 = vmatprep.subr.bf16.mxu0 %v4875_v15  ;;  %648 = vmatprep.subr.bf16.mxu1 %v4877_v16  ;;  %v768_v15 = vld [vmem:[%s7760_s4 + $0x68] sm:$0xff]  ;;  %v4926_v16 = vcombine.low %v755_v2, %v759_v4  ;;  %v4935_v18 = vcombine.high %v763_v12, %v767_v13  ;;  %v819_v4 = vld [vmem:[%s7760_s4 + $0x200] sm:$0xff] }
  0x28   :  { %529 = vmatprep.mubr.bf16.mxu0 %v5549_v3  ;;  %582 = vmatprep.mubr.bf16.mxu1 %v5549_v3  ;;  %v4937_v19 = vcombine.high %v764_v14, %v768_v15  ;;  %v4936_v25 = vcombine.low %v764_v14, %v768_v15  ;;  %v831_v14 = vld [vmem:[%s7760_s4 + $0x260] sm:$0xff]  ;;  %v828_v15 = vld [vmem:[%s7760_s4 + $0x248] sm:$0xff] }
  0x2a   :  { %596 = vmatpush1.bf16.msra.mxu0 %v4874_v21  ;;  %649 = vmatpush1.bf16.msra.mxu1 %v4876_v22  ;;  %v775_v21 = vld [vmem:[%s7760_s4 + $0xa0] sm:$0xff]  ;;  %v772_v22 = vld [vmem:[%s7760_s4 + $0x88] sm:$0xff] }
  0x2b   :  { %597 = vmatprep.subr.bf16.mxu0 %v4883_v23  ;;  %650 = vmatprep.subr.bf16.mxu1 %v4885_v24  ;;  %v776_v23 = vld [vmem:[%s7760_s4 + $0xa8] sm:$0xff]  ;;  %v4934_v24 = vcombine.low %v763_v12, %v767_v13  ;;  %v4943_v26 = vcombine.high %v771_v20, %v775_v21  ;;  %v827_v13 = vld [vmem:[%s7760_s4 + $0x240] sm:$0xff] }
  0x2c   :  { %v4945_v27 = vcombine.high %v772_v22, %v776_v23 }
  0x2d   :  { %530 = vmatmul.mubr.bf16.gmra.mrb[4].mxu0 %v5746_v29  ;;  %583 = vmatmul.mubr.bf16.gmra.mrb[4].mxu1 %v5746_v29 }
  0x2e   :  { %598 = vmatpush1.bf16.msra.mxu0 %v4882_v30  ;;  %651 = vmatpush1.bf16.msra.mxu1 %v4884_v31  ;;  %v783_v30 = vld [vmem:[%s7760_s4 + $0xe0] sm:$0xff]  ;;  %v784_v31 = vld [vmem:[%s7760_s4 + $0xe8] sm:$0xff] }
  0x2f   :  { %599 = vmatprep.subr.bf16.mxu0 %v4891_v32  ;;  %652 = vmatprep.subr.bf16.mxu1 %v4893_v33  ;;  %v4942_v32 = vcombine.low %v771_v20, %v775_v21  ;;  %v4944_v33 = vcombine.low %v772_v22, %v776_v23  ;;  %v4951_v34 = vcombine.high %v779_v28, %v783_v30  ;;  %v835_v21 = vld [vmem:[%s7760_s4 + $0x280] sm:$0xff]  ;;  %v836_v23 = vld [vmem:[%s7760_s4 + $0x288] sm:$0xff] }
  0x30   :  { %625 = vmatprep.mubr.bf16.mxu0 %v5549_v3  ;;  %678 = vmatprep.mubr.bf16.mxu1 %v5549_v3  ;;  %v839_v22 = vld [vmem:[%s7760_s4 + $0x2a0] sm:$0xff] }
  0x32   :  { %600 = vmatpush1.bf16.msra.mxu0 %v4890_v38  ;;  %653 = vmatpush1.bf16.msra.mxu1 %v4892_v39  ;;  %v792_v38 = vld [vmem:[%s7760_s4 + $0x128] sm:$0xff]  ;;  %v4950_v39 = vcombine.low %v779_v28, %v783_v30  ;;  %v843_v30 = vld [vmem:[%s7760_s4 + $0x2c0] sm:$0xff] }
  0x33   :  { %601 = vmatprep.subr.bf16.mxu0 %v4899_v40  ;;  %654 = vmatprep.subr.bf16.mxu1 %v4901_v41  ;;  %v4959_v41 = vcombine.high %v787_v36, %v791_v37 }
  0x36   :  { %602 = vmatpush1.bf16.msra.mxu0 %v4898_v46  ;;  %655 = vmatpush1.bf16.msra.mxu1 %v4900_v47  ;;  %v800_v46 = vld [vmem:[%s7760_s4 + $0x168] sm:$0xff]  ;;  %v4958_v47 = vcombine.low %v787_v36, %v791_v37  ;;  %v851_v37 = vld [vmem:[%s7760_s4 + $0x300] sm:$0xff] }
  0x37   :  { %603 = vmatprep.subr.bf16.mxu0 %v4907_v48  ;;  %656 = vmatprep.subr.bf16.mxu1 %v4909_v49  ;;  %v4967_v49 = vcombine.high %v795_v43, %v799_v44 }
  0x3a   :  { %604 = vmatpush1.bf16.msra.mxu0 %v4906_v54  ;;  %657 = vmatpush1.bf16.msra.mxu1 %v4908_v55  ;;  %v808_v54 = vld [vmem:[%s7760_s4 + $0x1a8] sm:$0xff]  ;;  %v4966_v55 = vcombine.low %v795_v43, %v799_v44  ;;  %v859_v44 = vld [vmem:[%s7760_s4 + $0x340] sm:$0xff] }
  0x3b   :  { %605 = vmatprep.subr.bf16.mxu0 %v4915_v56  ;;  %658 = vmatprep.subr.bf16.mxu1 %v4917_v57  ;;  %v4975_v57 = vcombine.high %v803_v51, %v807_v52  ;;  %v4977_v58 = vcombine.high %v804_v53, %v808_v54 }
  0x3e   :  { %606 = vmatpush1.bf16.msra.mxu0 %v4914_v62  ;;  %659 = vmatpush1.bf16.msra.mxu1 %v4916_v63  ;;  %v816_v62 = vld [vmem:[%s7760_s4 + $0x1e8] sm:$0xff]  ;;  %v4974_v63 = vcombine.low %v803_v51, %v807_v52  ;;  %v867_v52 = vld [vmem:[%s7760_s4 + $0x380] sm:$0xff] }
  0x3f   :  { %607 = vmatprep.subr.bf16.mxu0 %v4923_v0  ;;  %660 = vmatprep.subr.bf16.mxu1 %v4925_v1  ;;  %v4976_v0 = vcombine.low %v804_v53, %v808_v54  ;;  %v4983_v1 = vcombine.high %v811_v59, %v815_v60  ;;  %v4985_v2 = vcombine.high %v812_v61, %v816_v62  ;;  %v871_v53 = vld [vmem:[%s7760_s4 + $0x3a0] sm:$0xff]  ;;  %v868_v54 = vld [vmem:[%s7760_s4 + $0x388] sm:$0xff] }
  0x42   :  { %608 = vmatpush1.bf16.msra.mxu0 %v4922_v7  ;;  %661 = vmatpush1.bf16.msra.mxu1 %v4924_v8  ;;  %v824_v7 = vld [vmem:[%s7760_s4 + $0x228] sm:$0xff]  ;;  %v4982_v8 = vcombine.low %v811_v59, %v815_v60  ;;  %v875_v60 = vld [vmem:[%s7760_s4 + $0x3c0] sm:$0xff] }
  0x43   :  { %1523 = vmatprep.subr.bf16.mxu0 %v4927_v9  ;;  %1564 = vmatprep.subr.bf16.mxu1 %v4929_v11  ;;  %v4984_v9 = vcombine.low %v812_v61, %v816_v62  ;;  %v4991_v11 = vcombine.high %v819_v4, %v823_v5  ;;  %v4993_v12 = vcombine.high %v820_v6, %v824_v7  ;;  %v879_v61 = vld [vmem:[%s7760_s4 + $0x3e0] sm:$0xff]  ;;  %v876_v62 = vld [vmem:[%s7760_s4 + $0x3c8] sm:$0xff] }
  0x45   :  { %626 = vmatmul.mubr.bf16.vlgmr.msra.gmra.mrb[8].mxu0 %v5708_v10  ;;  %679 = vmatmul.mubr.bf16.vlgmr.msra.gmra.mrb[8].mxu1 %v5708_v10  ;;  %v780_v10 = vld [vmem:[%s7760_s4 + $0xc8] sm:$0xff] }
  0x46   :  { %1524 = vmatpush1.bf16.msra.mxu0 %v4926_v16  ;;  %1565 = vmatpush1.bf16.msra.mxu1 %v4928_v17  ;;  %v4953_v35 = vcombine.high %v780_v10, %v784_v31  ;;  %v4952_v40 = vcombine.low %v780_v10, %v784_v31  ;;  %v832_v16 = vld [vmem:[%s7760_s4 + $0x268] sm:$0xff]  ;;  %v4990_v17 = vcombine.low %v819_v4, %v823_v5  ;;  %v847_v10 = vld [vmem:[%s7760_s4 + $0x2e0] sm:$0xff]  ;;  %v757_v5 = vld [vmem:[%s7760_s4 + $0x10] sm:$0xff] }
  0x47   :  { %1525 = vmatprep.subr.bf16.mxu0 %v4935_v18  ;;  %1566 = vmatprep.subr.bf16.mxu1 %v4937_v19  ;;  %v4992_v18 = vcombine.low %v820_v6, %v824_v7  ;;  %v4999_v19 = vcombine.high %v827_v13, %v831_v14  ;;  %v5001_v20 = vcombine.high %v828_v15, %v832_v16  ;;  %v844_v31 = vld [vmem:[%s7760_s4 + $0x2c8] sm:$0xff]  ;;  %v761_v6 = vld [vmem:[%s7760_s4 + $0x30] sm:$0xff]  ;;  %v758_v7 = vld [vmem:[%s7760_s4 + $0x18] sm:$0xff] }
  0x48   :  { %635 = vmatprep.mubr.bf16.mxu0 %v5549_v3  ;;  %688 = vmatprep.mubr.bf16.mxu1 %v5549_v3  ;;  %v788_v3 = vld [vmem:[%s7760_s4 + $0x108] sm:$0xff] }
  0x49   :  { %v4961_v42 = vcombine.high %v788_v3, %v792_v38  ;;  %v4960_v48 = vcombine.low %v788_v3, %v792_v38  ;;  %v855_v3 = vld [vmem:[%s7760_s4 + $0x320] sm:$0xff]  ;;  %v852_v38 = vld [vmem:[%s7760_s4 + $0x308] sm:$0xff] }
  0x4a   :  { %1526 = vmatpush1.bf16.msra.mxu0 %v4934_v24  ;;  %1567 = vmatpush1.bf16.msra.mxu1 %v4936_v25  ;;  %v840_v24 = vld [vmem:[%s7760_s4 + $0x2a8] sm:$0xff]  ;;  %v4998_v25 = vcombine.low %v827_v13, %v831_v14  ;;  %v765_v14 = vld [vmem:[%s7760_s4 + $0x50] sm:$0xff] }
  0x4b   :  { %1527 = vmatprep.subr.bf16.mxu0 %v4943_v26  ;;  %1568 = vmatprep.subr.bf16.mxu1 %v4945_v27  ;;  %v5000_v26 = vcombine.low %v828_v15, %v832_v16  ;;  %v5007_v27 = vcombine.high %v835_v21, %v839_v22  ;;  %v5009_v28 = vcombine.high %v836_v23, %v840_v24  ;;  %v769_v15 = vld [vmem:[%s7760_s4 + $0x70] sm:$0xff]  ;;  %v766_v16 = vld [vmem:[%s7760_s4 + $0x58] sm:$0xff] }
  0x4d   :  { %636 = vmatmul.mubr.bf16.gmra.mrb[12].mxu0 %v5746_v29  ;;  %689 = vmatmul.mubr.bf16.gmra.mrb[12].mxu1 %v5746_v29  ;;  %v796_v29 = vld [vmem:[%s7760_s4 + $0x148] sm:$0xff] }
  0x4e   :  { %1528 = vmatpush1.bf16.msra.mxu0 %v4942_v32  ;;  %1569 = vmatpush1.bf16.msra.mxu1 %v4944_v33  ;;  %v4969_v50 = vcombine.high %v796_v29, %v800_v46  ;;  %v4968_v56 = vcombine.low %v796_v29, %v800_v46  ;;  %v848_v32 = vld [vmem:[%s7760_s4 + $0x2e8] sm:$0xff]  ;;  %v5006_v33 = vcombine.low %v835_v21, %v839_v22  ;;  %v863_v29 = vld [vmem:[%s7760_s4 + $0x360] sm:$0xff]  ;;  %v773_v22 = vld [vmem:[%s7760_s4 + $0x90] sm:$0xff] }
  0x4f   :  { %1529 = vmatprep.subr.bf16.mxu0 %v4951_v34  ;;  %1570 = vmatprep.subr.bf16.mxu1 %v4953_v35  ;;  %v5008_v34 = vcombine.low %v836_v23, %v840_v24  ;;  %v5015_v35 = vcombine.high %v843_v30, %v847_v10  ;;  %v5017_v36 = vcombine.high %v844_v31, %v848_v32  ;;  %v860_v46 = vld [vmem:[%s7760_s4 + $0x348] sm:$0xff]  ;;  %v777_v23 = vld [vmem:[%s7760_s4 + $0xb0] sm:$0xff]  ;;  %v774_v24 = vld [vmem:[%s7760_s4 + $0x98] sm:$0xff] }
  0x50   :  { %1555 = vmatprep.mubr.bf16.mxu0 %v5550_v45  ;;  %1596 = vmatprep.mubr.bf16.mxu1 %v5550_v45 }
  0x52   :  { %1530 = vmatpush1.bf16.msra.mxu0 %v4950_v39  ;;  %1571 = vmatpush1.bf16.msra.mxu1 %v4952_v40  ;;  %v856_v39 = vld [vmem:[%s7760_s4 + $0x328] sm:$0xff]  ;;  %v5014_v40 = vcombine.low %v843_v30, %v847_v10  ;;  %v781_v10 = vld [vmem:[%s7760_s4 + $0xd0] sm:$0xff] }
  0x53   :  { %1531 = vmatprep.subr.bf16.mxu0 %v4959_v41  ;;  %1572 = vmatprep.subr.bf16.mxu1 %v4961_v42  ;;  %v5016_v41 = vcombine.low %v844_v31, %v848_v32  ;;  %v5023_v42 = vcombine.high %v851_v37, %v855_v3  ;;  %v5025_v43 = vcombine.high %v852_v38, %v856_v39  ;;  %v785_v31 = vld [vmem:[%s7760_s4 + $0xf0] sm:$0xff]  ;;  %v782_v32 = vld [vmem:[%s7760_s4 + $0xd8] sm:$0xff] }
  0x56   :  { %1532 = vmatpush1.bf16.msra.mxu0 %v4958_v47  ;;  %1573 = vmatpush1.bf16.msra.mxu1 %v4960_v48  ;;  %v864_v47 = vld [vmem:[%s7760_s4 + $0x368] sm:$0xff]  ;;  %v5022_v48 = vcombine.low %v851_v37, %v855_v3  ;;  %v789_v3 = vld [vmem:[%s7760_s4 + $0x110] sm:$0xff] }
  0x57   :  { %1533 = vmatprep.subr.bf16.mxu0 %v4967_v49  ;;  %1574 = vmatprep.subr.bf16.mxu1 %v4969_v50  ;;  %v5024_v49 = vcombine.low %v852_v38, %v856_v39  ;;  %v5031_v50 = vcombine.high %v859_v44, %v863_v29  ;;  %v5033_v51 = vcombine.high %v860_v46, %v864_v47  ;;  %v793_v38 = vld [vmem:[%s7760_s4 + $0x130] sm:$0xff]  ;;  %v790_v39 = vld [vmem:[%s7760_s4 + $0x118] sm:$0xff] }
  0x5a   :  { %1534 = vmatpush1.bf16.msra.mxu0 %v4966_v55  ;;  %1575 = vmatpush1.bf16.msra.mxu1 %v4968_v56  ;;  %v872_v55 = vld [vmem:[%s7760_s4 + $0x3a8] sm:$0xff]  ;;  %v5030_v56 = vcombine.low %v859_v44, %v863_v29  ;;  %v797_v29 = vld [vmem:[%s7760_s4 + $0x150] sm:$0xff] }
  0x5b   :  { %1535 = vmatprep.subr.bf16.mxu0 %v4975_v57  ;;  %1576 = vmatprep.subr.bf16.mxu1 %v4977_v58  ;;  %v5032_v57 = vcombine.low %v860_v46, %v864_v47  ;;  %v5039_v58 = vcombine.high %v867_v52, %v871_v53  ;;  %v5041_v59 = vcombine.high %v868_v54, %v872_v55  ;;  %v801_v46 = vld [vmem:[%s7760_s4 + $0x170] sm:$0xff]  ;;  %v798_v47 = vld [vmem:[%s7760_s4 + $0x158] sm:$0xff] }
  0x5e   :  { %1536 = vmatpush1.bf16.msra.mxu0 %v4974_v63  ;;  %1577 = vmatpush1.bf16.msra.mxu1 %v4976_v0  ;;  %v880_v63 = vld [vmem:[%s7760_s4 + $0x3e8] sm:$0xff]  ;;  %v5038_v0 = vcombine.low %v867_v52, %v871_v53  ;;  %v805_v53 = vld [vmem:[%s7760_s4 + $0x190] sm:$0xff] }
  0x5f   :  { %1537 = vmatprep.subr.bf16.mxu0 %v4983_v1  ;;  %1578 = vmatprep.subr.bf16.mxu1 %v4985_v2  ;;  %v5040_v1 = vcombine.low %v868_v54, %v872_v55  ;;  %v5047_v2 = vcombine.high %v875_v60, %v879_v61  ;;  %v5049_v4 = vcombine.high %v876_v62, %v880_v63  ;;  %v809_v54 = vld [vmem:[%s7760_s4 + $0x1b0] sm:$0xff]  ;;  %v806_v55 = vld [vmem:[%s7760_s4 + $0x198] sm:$0xff] }
  0x62   :  { %1538 = vmatpush1.bf16.msra.mxu0 %v4982_v8  ;;  %1579 = vmatpush1.bf16.msra.mxu1 %v4984_v9  ;;  %v762_v8 = vld [vmem:[%s7760_s4 + $0x38] sm:$0xff]  ;;  %v5046_v9 = vcombine.low %v875_v60, %v879_v61  ;;  %v813_v61 = vld [vmem:[%s7760_s4 + $0x1d0] sm:$0xff] }
  0x63   :  { %1539 = vmatprep.subr.bf16.mxu0 %v4991_v11  ;;  %1580 = vmatprep.subr.bf16.mxu1 %v4993_v12  ;;  %v5048_v11 = vcombine.low %v876_v62, %v880_v63  ;;  %v4931_v12 = vcombine.high %v757_v5, %v761_v6  ;;  %v4933_v13 = vcombine.high %v758_v7, %v762_v8  ;;  %v817_v62 = vld [vmem:[%s7760_s4 + $0x1f0] sm:$0xff]  ;;  %v814_v63 = vld [vmem:[%s7760_s4 + $0x1d8] sm:$0xff] }
  0x66   :  { %1540 = vmatpush1.bf16.msra.mxu0 %v4990_v17  ;;  %1581 = vmatpush1.bf16.msra.mxu1 %v4992_v18  ;;  %v770_v17 = vld [vmem:[%s7760_s4 + $0x78] sm:$0xff]  ;;  %v4930_v18 = vcombine.low %v757_v5, %v761_v6  ;;  %v821_v5 = vld [vmem:[%s7760_s4 + $0x210] sm:$0xff] }
  0x67   :  { %1541 = vmatprep.subr.bf16.mxu0 %v4999_v19  ;;  %1582 = vmatprep.subr.bf16.mxu1 %v5001_v20  ;;  %v4932_v19 = vcombine.low %v758_v7, %v762_v8  ;;  %v4939_v20 = vcombine.high %v765_v14, %v769_v15  ;;  %v4941_v21 = vcombine.high %v766_v16, %v770_v17  ;;  %v825_v6 = vld [vmem:[%s7760_s4 + $0x230] sm:$0xff]  ;;  %v822_v8 = vld [vmem:[%s7760_s4 + $0x218] sm:$0xff] }
  0x6a   :  { %1542 = vmatpush1.bf16.msra.mxu0 %v4998_v25  ;;  %1583 = vmatpush1.bf16.msra.mxu1 %v5000_v26  ;;  %v778_v25 = vld [vmem:[%s7760_s4 + $0xb8] sm:$0xff]  ;;  %v4938_v26 = vcombine.low %v765_v14, %v769_v15  ;;  %v731_v14 = vld [vmem:[%s7761_s0] sm:$0xff] }
  0x6b   :  { %1543 = vmatprep.subr.bf16.mxu0 %v5007_v27  ;;  %1584 = vmatprep.subr.bf16.mxu1 %v5009_v28  ;;  %v4940_v27 = vcombine.low %v766_v16, %v770_v17  ;;  %v4947_v28 = vcombine.high %v773_v22, %v777_v23  ;;  %v4949_v30 = vcombine.high %v774_v24, %v778_v25  ;;  %vm1737_vm0 = vcmp.gt.s32.totalorder %v731_v14, 3  ;;  %v829_v16 = vld [vmem:[%s7760_s4 + $0x250] sm:$0xff] }
  0x6c   :  { %vm2756_vm1 = vcmp.gt.s32.totalorder %v731_v14, 1  ;;  %vm1733_vm2 = vcmp.gt.s32.totalorder %v731_v14, 0  ;;  %vm2760_vm3 = vcmp.gt.s32.totalorder %v731_v14, 2  ;;  %v833_v17 = vld [vmem:[%s7760_s4 + $0x270] sm:$0xff] }
  0x6e   :  { %1544 = vmatpush1.bf16.msra.mxu0 %v5006_v33  ;;  %1585 = vmatpush1.bf16.msra.mxu1 %v5008_v34  ;;  %v786_v33 = vld [vmem:[%s7760_s4 + $0xf8] sm:$0xff]  ;;  %v4946_v34 = vcombine.low %v773_v22, %v777_v23 }
  0x6f   :  { %1545 = vmatprep.subr.bf16.mxu0 %v5015_v35  ;;  %1586 = vmatprep.subr.bf16.mxu1 %v5017_v36  ;;  %v4948_v35 = vcombine.low %v774_v24, %v778_v25  ;;  %v4955_v36 = vcombine.high %v781_v10, %v785_v31  ;;  %v4957_v37 = vcombine.high %v782_v32, %v786_v33  ;;  %v830_v22 = vld [vmem:[%s7760_s4 + $0x258] sm:$0xff] }
  0x70   :  { %v834_v23 = vld [vmem:[%s7760_s4 + $0x278] sm:$0xff]  ;;  %v4994_v25 = vcombine.low %v821_v5, %v825_v6 }
  0x72   :  { %1546 = vmatpush1.bf16.msra.mxu0 %v5014_v40  ;;  %1587 = vmatpush1.bf16.msra.mxu1 %v5016_v41  ;;  %v794_v40 = vld [vmem:[%s7760_s4 + $0x138] sm:$0xff]  ;;  %v4954_v41 = vcombine.low %v781_v10, %v785_v31  ;;  %v837_v10 = vld [vmem:[%s7760_s4 + $0x290] sm:$0xff] }
  0x73   :  { %1547 = vmatprep.subr.bf16.mxu0 %v5023_v42  ;;  %1588 = vmatprep.subr.bf16.mxu1 %v5025_v43  ;;  %v4956_v42 = vcombine.low %v782_v32, %v786_v33  ;;  %v4963_v43 = vcombine.high %v789_v3, %v793_v38  ;;  %v4965_v44 = vcombine.high %v790_v39, %v794_v40  ;;  %v841_v31 = vld [vmem:[%s7760_s4 + $0x2b0] sm:$0xff]  ;;  %v838_v32 = vld [vmem:[%s7760_s4 + $0x298] sm:$0xff] }
  0x74   :  { %v842_v33 = vld [vmem:[%s7760_s4 + $0x2b8] sm:$0xff] }
  0x76   :  { %1548 = vmatpush1.bf16.msra.mxu0 %v5022_v48  ;;  %1589 = vmatpush1.bf16.msra.mxu1 %v5024_v49  ;;  %v802_v48 = vld [vmem:[%s7760_s4 + $0x178] sm:$0xff]  ;;  %v4962_v49 = vcombine.low %v789_v3, %v793_v38  ;;  %v5013_v3 = vcombine.high %v838_v32, %v842_v33  ;;  %v845_v38 = vld [vmem:[%s7760_s4 + $0x2d0] sm:$0xff] }
  0x77   :  { %1549 = vmatprep.subr.bf16.mxu0 %v5031_v50  ;;  %1590 = vmatprep.subr.bf16.mxu1 %v5033_v51  ;;  %v4964_v50 = vcombine.low %v790_v39, %v794_v40  ;;  %v4971_v51 = vcombine.high %v797_v29, %v801_v46  ;;  %v4973_v52 = vcombine.high %v798_v47, %v802_v48  ;;  %v849_v39 = vld [vmem:[%s7760_s4 + $0x2f0] sm:$0xff]  ;;  %v846_v40 = vld [vmem:[%s7760_s4 + $0x2d8] sm:$0xff] }
  0x7a   :  { %1550 = vmatpush1.bf16.msra.mxu0 %v5030_v56  ;;  %1591 = vmatpush1.bf16.msra.mxu1 %v5032_v57  ;;  %v810_v56 = vld [vmem:[%s7760_s4 + $0x1b8] sm:$0xff]  ;;  %v4970_v57 = vcombine.low %v797_v29, %v801_v46  ;;  %v853_v46 = vld [vmem:[%s7760_s4 + $0x310] sm:$0xff] }
  0x7b   :  { %1551 = vmatprep.subr.bf16.mxu0 %v5039_v58  ;;  %1592 = vmatprep.subr.bf16.mxu1 %v5041_v59  ;;  %v4972_v58 = vcombine.low %v798_v47, %v802_v48  ;;  %v4979_v59 = vcombine.high %v805_v53, %v809_v54  ;;  %v4981_v60 = vcombine.high %v806_v55, %v810_v56  ;;  %v857_v47 = vld [vmem:[%s7760_s4 + $0x330] sm:$0xff]  ;;  %v854_v48 = vld [vmem:[%s7760_s4 + $0x318] sm:$0xff] }
  0x7e   :  { %1552 = vmatpush1.bf16.msra.mxu0 %v5038_v0  ;;  %1593 = vmatpush1.bf16.msra.mxu1 %v5040_v1  ;;  %v818_v0 = vld [vmem:[%s7760_s4 + $0x1f8] sm:$0xff]  ;;  %v4978_v1 = vcombine.low %v805_v53, %v809_v54  ;;  %v861_v54 = vld [vmem:[%s7760_s4 + $0x350] sm:$0xff] }
  0x7f   :  { %1553 = vmatprep.subr.bf16.mxu0 %v5047_v2  ;;  %1594 = vmatprep.subr.bf16.mxu1 %v5049_v4  ;;  %v4980_v2 = vcombine.low %v806_v55, %v810_v56  ;;  %v4987_v4 = vcombine.high %v813_v61, %v817_v62  ;;  %v4989_v7 = vcombine.high %v814_v63, %v818_v0  ;;  %v865_v55 = vld [vmem:[%s7760_s4 + $0x370] sm:$0xff]  ;;  %v862_v56 = vld [vmem:[%s7760_s4 + $0x358] sm:$0xff] }
  0x82   :  { %1554 = vmatpush1.bf16.msra.mxu0 %v5046_v9  ;;  %1595 = vmatpush1.bf16.msra.mxu1 %v5048_v11  ;;  %v826_v9 = vld [vmem:[%s7760_s4 + $0x238] sm:$0xff]  ;;  %v4986_v11 = vcombine.low %v813_v61, %v817_v62  ;;  %v869_v62 = vld [vmem:[%s7760_s4 + $0x390] sm:$0xff] }
  0x83   :  { %1605 = vmatprep.subr.bf16.mxu0 %v4931_v12  ;;  %1646 = vmatprep.subr.bf16.mxu1 %v4933_v13  ;;  %v4988_v12 = vcombine.low %v814_v63, %v818_v0  ;;  %v4995_v13 = vcombine.high %v821_v5, %v825_v6  ;;  %v4997_v15 = vcombine.high %v822_v8, %v826_v9  ;;  %v873_v63 = vld [vmem:[%s7760_s4 + $0x3b0] sm:$0xff]  ;;  %v870_v0 = vld [vmem:[%s7760_s4 + $0x398] sm:$0xff] }
  0x84   :  { %v5043_v5 = vcombine.high %v869_v62, %v873_v63 }
  0x85   :  { %1556 = vmatmul.mubr.bf16.vlgmr.msra.gmra.mrb[16].mxu0 %v5550_v45  ;;  %1597 = vmatmul.mubr.bf16.vlgmr.msra.gmra.mrb[16].mxu1 %v5550_v45 }
  0x86   :  { %1606 = vmatpush1.bf16.msra.mxu0 %v4930_v18  ;;  %1647 = vmatpush1.bf16.msra.mxu1 %v4932_v19  ;;  %v5551_v18 = vmov 0.0  }
  0x87   :  { %1607 = vmatprep.subr.bf16.mxu0 %v4939_v20  ;;  %1648 = vmatprep.subr.bf16.mxu1 %v4941_v21  ;;  %v5055_v19 = vsel %vm1737_vm0, 1.0, %v5551_v18  ;;  %v5185_v20 = vsel %vm2756_vm1, 1.0, %v5551_v18  ;;  %v5054_v21 = vsel %vm1733_vm2, 1.0, %v5551_v18 }
  0x88   :  { %1637 = vmatprep.mubr.bf16.mxu0 %v5550_v45  ;;  %1678 = vmatprep.mubr.bf16.mxu1 %v5550_v45  ;;  %v5457_v24 = vpack.i.bf16 %v5185_v20, %v5054_v21 }
  0x89   :  { %1746 = vperm.xlu0 %5455, %v5055_v19   ;;  %3785 = vperm.xlu1 %5456, %v5185_v20   ;;  %v1777_v20 = vld [vmem:[%s7760_s4] sm:$0xff] }
  0x8a   :  { %1608 = vmatpush1.bf16.msra.mxu0 %v4938_v26  ;;  %1649 = vmatpush1.bf16.msra.mxu1 %v4940_v27  ;;  %v5186_v26 = vsel %vm2760_vm3, 1.0, %v5551_v18  ;;  %v4996_v27 = vcombine.low %v822_v8, %v826_v9  ;;  %v881_v8 = vld [vmem:[%s7760_s4 + $0x3f0] sm:$0xff]  ;;  %v878_v9 = vld [vmem:[%s7760_s4 + $0x3d8] sm:$0xff]  ;;  %v115_v18 = vlaneseq }
  0x8b   :  { %1609 = vmatprep.subr.bf16.mxu0 %v4947_v28  ;;  %1650 = vmatprep.subr.bf16.mxu1 %v4949_v30  ;;  %v5003_v28 = vcombine.high %v829_v16, %v833_v17  ;;  %v5005_v30 = vcombine.high %v830_v22, %v834_v23 }
  0x8d   :  { %2765 = vperm.xlu0 %5455, %v5186_v26   ;;  %5458 = vperm.xlu1 %5456, %v5457_v24  }
  0x8e   :  { %1610 = vmatpush1.bf16.msra.mxu0 %v4946_v34  ;;  %1651 = vmatpush1.bf16.msra.mxu1 %v4948_v35  ;;  %v5462_v34 = vpack.i.bf16 %v5054_v21, %v5186_v26  ;;  %v5002_v35 = vcombine.low %v829_v16, %v833_v17  ;;  %v1781_v21 = vld [vmem:[%s7760_s4 + $0x20] sm:$0xff] }
  0x8f   :  { %1611 = vmatprep.subr.bf16.mxu0 %v4955_v36  ;;  %1652 = vmatprep.subr.bf16.mxu1 %v4957_v37  ;;  %v5004_v36 = vcombine.low %v830_v22, %v834_v23  ;;  %v5011_v37 = vcombine.high %v837_v10, %v841_v31  ;;  %v1778_v22 = vld [vmem:[%s7760_s4 + $0x8] sm:$0xff]  ;;  %v6214_v23 = vcombine.low %v1777_v20, %v1781_v21  ;;  %v1789_v26 = vld [vmem:[%s7760_s4 + $0x60] sm:$0xff] }
  0x90   :  { %v6216_v24 = vcombine.high %v1777_v20, %v1781_v21 }
  0x91   :  { %5463 = vperm.xlu0 %5455, %v5462_v34   ;;  %4816 = vperm.xlu1 %5456, %v5055_v19   ;;  %v6203_v19 = vshrl.u32 %v115_v18, 7  ;;  %v1797_v34 = vld [vmem:[%s7760_s4 + $0xa0] sm:$0xff]  ;;  %v1822_v18 = vld [vmem:[%s7760_s4 + $0x168] sm:$0xff] }
  0x92   :  { %1612 = vmatpush1.bf16.msra.mxu0 %v4954_v41  ;;  %1653 = vmatpush1.bf16.msra.mxu1 %v4956_v42  ;;  %v850_v41 = vld [vmem:[%s7760_s4 + $0x2f8] sm:$0xff]  ;;  %v5010_v42 = vcombine.low %v837_v10, %v841_v31  ;;  %v1786_v10 = vld [vmem:[%s7760_s4 + $0x48] sm:$0xff] }
  0x93   :  { %1613 = vmatprep.subr.bf16.mxu0 %v4963_v43  ;;  %1654 = vmatprep.subr.bf16.mxu1 %v4965_v44  ;;  %v5012_v43 = vcombine.low %v838_v32, %v842_v33  ;;  %v5019_v44 = vcombine.high %v845_v38, %v849_v39  ;;  %v5021_v29 = vcombine.high %v846_v40, %v850_v41  ;;  %v1790_v31 = vld [vmem:[%s7760_s4 + $0x68] sm:$0xff]  ;;  %v1793_v32 = vld [vmem:[%s7760_s4 + $0x80] sm:$0xff] }
  0x94   :  { %v6243_v33 = vcombine.high %v1786_v10, %v1790_v31 }
  0x96   :  { %1614 = vmatpush1.bf16.msra.mxu0 %v4962_v49  ;;  %1655 = vmatpush1.bf16.msra.mxu1 %v4964_v50  ;;  %v858_v49 = vld [vmem:[%s7760_s4 + $0x338] sm:$0xff]  ;;  %v5018_v50 = vcombine.low %v845_v38, %v849_v39  ;;  %v6262_v38 = vld [vmem:[%s7762_s3] sm:$0xff]  ;;  %v125_v39 = vsub.s32 2, %v6203_v19 }
  0x97   :  { %1615 = vmatprep.subr.bf16.mxu0 %v4971_v51  ;;  %1656 = vmatprep.subr.bf16.mxu1 %v4973_v52  ;;  %v5020_v51 = vcombine.low %v846_v40, %v850_v41  ;;  %v5027_v52 = vcombine.high %v853_v46, %v857_v47  ;;  %v5029_v53 = vcombine.high %v854_v48, %v858_v49 }
  0x98   :  { %v6267_v40 = vcombine.low %v1786_v10, %v1790_v31  ;;  %v6269_v41 = vcombine.high %v1793_v32, %v1797_v34 }
  0x9a   :  { %1616 = vmatpush1.bf16.msra.mxu0 %v4970_v57  ;;  %1657 = vmatpush1.bf16.msra.mxu1 %v4972_v58  ;;  %v866_v57 = vld [vmem:[%s7760_s4 + $0x378] sm:$0xff]  ;;  %v5026_v58 = vcombine.low %v853_v46, %v857_v47  ;;  %v121_v46 = vsub.s32 1, %v6203_v19  ;;  %v1802_v47 = vld [vmem:[%s7760_s4 + $0xc8] sm:$0xff] }
  0x9b   :  { %1617 = vmatprep.subr.bf16.mxu0 %v4979_v59  ;;  %1658 = vmatprep.subr.bf16.mxu1 %v4981_v60  ;;  %v5028_v59 = vcombine.low %v854_v48, %v858_v49  ;;  %v5035_v60 = vcombine.high %v861_v54, %v865_v55  ;;  %v5037_v61 = vcombine.high %v862_v56, %v866_v57  ;;  %v1806_v48 = vld [vmem:[%s7760_s4 + $0xe8] sm:$0xff] }
  0x9e   :  { %1618 = vmatpush1.bf16.msra.mxu0 %v4978_v1  ;;  %1659 = vmatpush1.bf16.msra.mxu1 %v4980_v2  ;;  %v874_v1 = vld [vmem:[%s7760_s4 + $0x3b8] sm:$0xff]  ;;  %v5034_v2 = vcombine.low %v861_v54, %v865_v55 }
  0x9f   :  { %1619 = vmatprep.subr.bf16.mxu0 %v4987_v4  ;;  %1660 = vmatprep.subr.bf16.mxu1 %v4989_v7  ;;  %v5036_v4 = vcombine.low %v862_v56, %v866_v57  ;;  %v5045_v6 = vcombine.high %v870_v0, %v874_v1  ;;  %v877_v7 = vld [vmem:[%s7760_s4 + $0x3d0] sm:$0xff] }
  0xa0   :  { %v5051_v14 = vcombine.high %v877_v7, %v881_v8  ;;  %v5050_v16 = vcombine.low %v877_v7, %v881_v8  ;;  %v6338_v7 = vcombine.low %v1802_v47, %v1806_v48 }
  0xa2   :  { %1620 = vmatpush1.bf16.msra.mxu0 %v4986_v11  ;;  %1661 = vmatpush1.bf16.msra.mxu1 %v4988_v12  ;;  %v882_v11 = vld [vmem:[%s7760_s4 + $0x3f8] sm:$0xff]  ;;  %v5042_v12 = vcombine.low %v869_v62, %v873_v63 }
  0xa3   :  { %1621 = vmatprep.subr.bf16.mxu0 %v4995_v13  ;;  %1662 = vmatprep.subr.bf16.mxu1 %v4997_v15  ;;  %v5044_v13 = vcombine.low %v870_v0, %v874_v1  ;;  %v5053_v15 = vcombine.high %v878_v9, %v882_v11  ;;  %v5052_v17 = vcombine.low %v878_v9, %v882_v11  ;;  %v1810_v0 = vld [vmem:[%s7760_s4 + $0x108] sm:$0xff] }
  0xa4   :  { %v1814_v1 = vld [vmem:[%s7760_s4 + $0x128] sm:$0xff] }
  0xa6   :  { %1622 = vmatpush1.bf16.msra.mxu0 %v4994_v25  ;;  %1663 = vmatpush1.bf16.msra.mxu1 %v4996_v27  ;;  %v1785_v25 = vld [vmem:[%s7760_s4 + $0x40] sm:$0xff] }
  0xa7   :  { %1623 = vmatprep.subr.bf16.mxu0 %v5003_v28  ;;  %1664 = vmatprep.subr.bf16.mxu1 %v5005_v30  ;;  %v6231_v30 = vcombine.high %v1785_v25, %v1789_v26 }
  0xaa   :  { %1624 = vmatpush1.bf16.msra.mxu0 %v5002_v35  ;;  %1665 = vmatpush1.bf16.msra.mxu1 %v5004_v36  ;;  %v1794_v35 = vld [vmem:[%s7760_s4 + $0x88] sm:$0xff] }
  0xab   :  { %1625 = vmatprep.subr.bf16.mxu0 %v5011_v37  ;;  %1666 = vmatprep.subr.bf16.mxu1 %v5013_v3  ;;  %v1798_v36 = vld [vmem:[%s7760_s4 + $0xa8] sm:$0xff]  ;;  %v117_v37 = vsub.s32 0, %v6203_v19  ;;  %v6257_v3 = vcombine.low %v1785_v25, %v1789_v26 }
  0xad   :  { %v6289_v49 = vrot.slane %v6262_v38, %v117_v37 }
  0xae   :  { %1626 = vmatpush1.bf16.msra.mxu0 %v5010_v42  ;;  %1667 = vmatpush1.bf16.msra.mxu1 %v5012_v43  ;;  %v129_v42 = vsub.s32 3, %v6203_v19  ;;  %v6273_v43 = vcombine.high %v1794_v35, %v1798_v36 }
  0xaf   :  { %1627 = vmatprep.subr.bf16.mxu0 %v5019_v44  ;;  %1668 = vmatprep.subr.bf16.mxu1 %v5021_v29  ;;  %v1801_v44 = vld [vmem:[%s7760_s4 + $0xc0] sm:$0xff] }
  0xb0   :  { %v1805_v29 = vld [vmem:[%s7760_s4 + $0xe0] sm:$0xff]  ;;  %v6310_v57 = vrot.slane %v6262_v38, %v129_v42  ;;  %v1826_v42 = vld [vmem:[%s7760_s4 + $0x188] sm:$0xff] }
  0xb1   :  { %v6303_v54 = vcombine.high %v1801_v44, %v1805_v29 }
  0xb2   :  { %1628 = vmatpush1.bf16.msra.mxu0 %v5018_v50  ;;  %1669 = vmatpush1.bf16.msra.mxu1 %v5020_v51  ;;  %v6292_v50 = vcombine.low %v1793_v32, %v1797_v34  ;;  %v1825_v32 = vld [vmem:[%s7760_s4 + $0x180] sm:$0xff] }
  0xb3   :  { %1629 = vmatprep.subr.bf16.mxu0 %v5027_v52  ;;  %1670 = vmatprep.subr.bf16.mxu1 %v5029_v53  ;;  %v6297_v52 = vrot.slane %v6262_v38, %v125_v39  ;;  %v6301_v53 = vcombine.low %v1794_v35, %v1798_v36  ;;  %v1829_v34 = vld [vmem:[%s7760_s4 + $0x1a0] sm:$0xff] }
  0xb6   :  { %1630 = vmatpush1.bf16.msra.mxu0 %v5026_v58  ;;  %1671 = vmatpush1.bf16.msra.mxu1 %v5028_v59  ;;  %v6313_v58 = vcombine.high %v1802_v47, %v1806_v48  ;;  %v1809_v59 = vld [vmem:[%s7760_s4 + $0x100] sm:$0xff] }
  0xb7   :  { %1631 = vmatprep.subr.bf16.mxu0 %v5035_v60  ;;  %1672 = vmatprep.subr.bf16.mxu1 %v5037_v61  ;;  %v1813_v60 = vld [vmem:[%s7760_s4 + $0x120] sm:$0xff]  ;;  %v6322_v61 = vrot.slane %v6262_v38, %v121_v46 }
  0xb8   :  { %v6369_v20 = vcombine.low %v1809_v59, %v1813_v60 }
  0xba   :  { %1632 = vmatpush1.bf16.msra.mxu0 %v5034_v2  ;;  %1673 = vmatpush1.bf16.msra.mxu1 %v5036_v4 }
  0xbb   :  { %1633 = vmatprep.subr.bf16.mxu0 %v5043_v5  ;;  %1674 = vmatprep.subr.bf16.mxu1 %v5045_v6  ;;  %v6336_v6 = vcombine.low %v1801_v44, %v1805_v29  ;;  %v1830_v44 = vld [vmem:[%s7760_s4 + $0x1a8] sm:$0xff] }
  0xbe   :  { %1634 = vmatpush1.bf16.msra.mxu0 %v5042_v12  ;;  %1675 = vmatpush1.bf16.msra.mxu1 %v5044_v13  ;;  %v6348_v12 = vcombine.high %v1809_v59, %v1813_v60 }
  0xbf   :  { %1635 = vmatprep.subr.bf16.mxu0 %v5051_v14  ;;  %1676 = vmatprep.subr.bf16.mxu1 %v5053_v15  ;;  %v6354_v14 = vcombine.high %v1810_v0, %v1814_v1  ;;  %v1817_v15 = vld [vmem:[%s7760_s4 + $0x140] sm:$0xff] }
  0xc2   :  { %1636 = vmatpush1.bf16.msra.mxu0 %v5050_v16  ;;  %1677 = vmatpush1.bf16.msra.mxu1 %v5052_v17  ;;  %v1821_v16 = vld [vmem:[%s7760_s4 + $0x160] sm:$0xff]  ;;  %v1818_v17 = vld [vmem:[%s7760_s4 + $0x148] sm:$0xff] }
  0xc3   :  { %2545 = vmatprep.subr.bf16.mxu0 %v6216_v24  ;;  %v6381_v31 = vcombine.high %v1818_v17, %v1822_v18  ;;  %v6408_v59 = vcombine.low %v1817_v15, %v1821_v16  ;;  %v6410_v60 = vcombine.low %v1818_v17, %v1822_v18  ;;  %v133_v17 = vsub.s32 4, %v6203_v19 }
  0xc4   :  { %v141_v18 = vsub.s32 6, %v6203_v19 }
  0xc5   :  { %1638 = vmatmul.mubr.bf16.vlgmr.msra.gmra.mrb[20].mxu0 %v5550_v45  ;;  %1679 = vmatmul.mubr.bf16.vlgmr.msra.gmra.mrb[20].mxu1 %v5550_v45  ;;  %v1782_v45 = vld [vmem:[%s7760_s4 + $0x28] sm:$0xff] }
  0xc6   :  { %v6227_v27 = vcombine.low %v1778_v22, %v1782_v45  ;;  %v6229_v28 = vcombine.high %v1778_v22, %v1782_v45  ;;  %2546 = vmatpush1.bf16.msra.mxu0 %v6214_v23  ;;  %v6373_v22 = vcombine.low %v1810_v0, %v1814_v1  ;;  %v6375_v45 = vcombine.high %v1817_v15, %v1821_v16 }
  0xc7   :  { %2547 = vmatprep.subr.bf16.mxu0 %v6231_v30  ;;  %v6429_v15 = vcombine.low %v1825_v32, %v1829_v34  ;;  %v6433_v16 = vcombine.low %v1826_v42, %v1830_v44 }
  0xc8   :  { %2586 = vmatprep.subr.bf16.mxu1 %v6229_v28 }
  0xc9   :  { %2587 = vmatpush1.bf16.msra.mxu1 %v6227_v27 }
  0xca   :  { %2588 = vmatprep.subr.bf16.mxu1 %v6243_v33  ;;  %2548 = vmatpush1.bf16.msra.mxu0 %v6257_v3 }
  0xcb   :  { %2549 = vmatprep.subr.bf16.mxu0 %v6269_v41 }
  0xcd   :  { %2589 = vmatpush1.bf16.msra.mxu1 %v6267_v40 }
  0xce   :  { %2590 = vmatprep.subr.bf16.mxu1 %v6273_v43  ;;  %2550 = vmatpush1.bf16.msra.mxu0 %v6292_v50 }
  0xcf   :  { %2551 = vmatprep.subr.bf16.mxu0 %v6303_v54 }
  0xd1   :  { %2591 = vmatpush1.bf16.msra.mxu1 %v6301_v53 }
  0xd2   :  { %2592 = vmatprep.subr.bf16.mxu1 %v6313_v58  ;;  %2552 = vmatpush1.bf16.msra.mxu0 %v6336_v6 }
  0xd3   :  { %2553 = vmatprep.subr.bf16.mxu0 %v6348_v12 }
  0xd5   :  { %2593 = vmatpush1.bf16.msra.mxu1 %v6338_v7 }
  0xd6   :  { %2594 = vmatprep.subr.bf16.mxu1 %v6354_v14  ;;  %2554 = vmatpush1.bf16.msra.mxu0 %v6369_v20 }
  0xd7   :  { %2555 = vmatprep.subr.bf16.mxu0 %v6375_v45 }
  0xd9   :  { %2595 = vmatpush1.bf16.msra.mxu1 %v6373_v22 }
  0xda   :  { %2596 = vmatprep.subr.bf16.mxu1 %v6381_v31  ;;  %2556 = vmatpush1.bf16.msra.mxu0 %v6408_v59 }
  0xdd   :  { %2597 = vmatpush1.bf16.msra.mxu1 %v6410_v60 }
  0xf8   :  { %v6294_v51 = vpop.f32.mrb[0].mxu0  ;;  %v6307_v56 = vpop.f32.mrb[0].mxu1 }
  0xf9   :  { %v6305_v55 = vpop.f32.mrb[1].mxu0  ;;  %v6324_v63 = vpop.f32.mrb[1].mxu1 }
  0xfa   :  { %v525_v62 = vpop.f32.mrb[2].mxu0  ;;  %v578_v5 = vpop.f32.mrb[2].mxu1 }
  0xfb   :  { %v6333_v2 = vadd.f32 %v525_v62, %v6289_v49  ;;  %v527_v4 = vpop.f32.mrb[3].mxu0  ;;  %v6344_v9 = vadd.f32 %v578_v5, %v6297_v52  ;;  %v580_v11 = vpop.f32.mrb[3].mxu1 }
  0xfc   :  { %v6341_v8 = vadd.f32 %v527_v4, %v6322_v61  ;;  %v6351_v13 = vadd.f32 %v580_v11, %v6310_v57  ;;  %v6420_v4 = vcombine.high %v1825_v32, %v1829_v34  ;;  %v6426_v11 = vcombine.high %v1826_v42, %v1830_v44  ;;  %v1833_v32 = vld [vmem:[%s7760_s4 + $0x1c0] sm:$0xff]  ;;  %v1838_v44 = vld [vmem:[%s7760_s4 + $0x1e8] sm:$0xff] }
  0xfd   :  { %7843 = vst [vmem:[#allocation5_spill] sm:$0xff] %v6333_v2  ;;  %7845 = vst [vmem:[#allocation7_spill] sm:$0xff] %v6344_v9  ;;  %v1837_v34 = vld [vmem:[%s7760_s4 + $0x1e0] sm:$0xff]  ;;  %v6457_v42 = vrot.slane %v6262_v38, %v141_v18 }
  0xfe   :  { %7844 = vst [vmem:[#allocation6_spill] sm:$0xff] %v6341_v8  ;;  %7846 = vst [vmem:[#allocation8_spill] sm:$0xff] %v6351_v13  ;;  %2557 = vmatprep.subr.bf16.mxu0 %v6420_v4  ;;  %2598 = vmatprep.subr.bf16.mxu1 %v6426_v11 }
  0xff   :  { %2558 = vmatpush1.bf16.msra.mxu0 %v6429_v15  ;;  %2599 = vmatpush1.bf16.msra.mxu1 %v6433_v16 }
 0x100   :  { %v531_v21 = vpop.f32.mrb[4].mxu0  ;;  %v584_v10 = vpop.f32.mrb[4].mxu1 }
 0x101   :  { %v6378_v25 = vadd.f32 %v531_v21, %v6289_v49  ;;  %v533_v26 = vpop.f32.mrb[5].mxu0  ;;  %v6393_v37 = vadd.f32 %v584_v10, %v6297_v52  ;;  %v586_v39 = vpop.f32.mrb[5].mxu1  ;;  %v145_v21 = vsub.s32 7, %v6203_v19  ;;  %v6443_v10 = vrot.slane %v6262_v38, %v133_v17 }
 0x102   :  { %v6390_v35 = vadd.f32 %v533_v26, %v6322_v61  ;;  %v535_v36 = vpop.f32.mrb[6].mxu0  ;;  %v6405_v47 = vadd.f32 %v586_v39, %v6310_v57  ;;  %v588_v48 = vpop.f32.mrb[6].mxu1  ;;  %v137_v26 = vsub.s32 5, %v6203_v19  ;;  %v6459_v19 = vcombine.high %v1833_v32, %v1837_v34 }
 0x103   :  { %7847 = vst [vmem:[#allocation9_spill] sm:$0xff] %v6378_v25  ;;  %7849 = vst [vmem:[#allocation11_spill] sm:$0xff] %v6393_v37  ;;  %v6402_v29 = vadd.f32 %v535_v36, %v6289_v49  ;;  %v537_v46 = vpop.f32.mrb[7].mxu0  ;;  %v6416_v0 = vadd.f32 %v588_v48, %v6297_v52  ;;  %v590_v1 = vpop.f32.mrb[7].mxu1  ;;  %v1834_v36 = vld [vmem:[%s7760_s4 + $0x1c8] sm:$0xff]  ;;  %v6471_v17 = vcombine.low %v1833_v32, %v1837_v34  ;;  %v1841_v32 = vld [vmem:[%s7760_s4 + $0x200] sm:$0xff] }
 0x104   :  { %7848 = vst [vmem:[#allocation10_spill] sm:$0xff] %v6390_v35  ;;  %7851 = vst [vmem:[#allocation13_spill] sm:$0xff] %v6405_v47  ;;  %v6413_v62 = vadd.f32 %v537_v46, %v6322_v61  ;;  %v6423_v5 = vadd.f32 %v590_v1, %v6310_v57  ;;  %v6469_v1 = vrot.slane %v6262_v38, %v145_v21  ;;  %2559 = vmatprep.subr.bf16.mxu0 %v6459_v19  ;;  %v1846_v37 = vld [vmem:[%s7760_s4 + $0x228] sm:$0xff] }
 0x105   :  { %7850 = vst [vmem:[#allocation12_spill] sm:$0xff] %v6402_v29  ;;  %7853 = vst [vmem:[#allocation15_spill] sm:$0xff] %v6416_v0  ;;  %v6478_v18 = vrot.slane %v6262_v38, %v137_v26  ;;  %2560 = vmatpush1.bf16.msra.mxu0 %v6471_v17  ;;  %v1845_v38 = vld [vmem:[%s7760_s4 + $0x220] sm:$0xff]  ;;  %v1842_v26 = vld [vmem:[%s7760_s4 + $0x208] sm:$0xff] }
 0x106   :  { %7852 = vst [vmem:[#allocation14_spill] sm:$0xff] %v6413_v62  ;;  %7854 = vst [vmem:[#allocation16_spill] sm:$0xff] %v6423_v5  ;;  %v6473_v5 = vcombine.low %v1834_v36, %v1838_v44  ;;  %v6475_v62 = vcombine.high %v1834_v36, %v1838_v44  ;;  %v6504_v44 = vcombine.high %v1841_v32, %v1845_v38 }
 0x107   :  { %7855 = vst [vmem:[#allocation17_spill] sm:$0xff] %v6471_v17  ;;  %v6514_v13 = vcombine.low %v1842_v26, %v1846_v37 }
 0x108   :  { %7856 = vst [vmem:[#allocation18_spill] sm:$0xff] %v6473_v5  ;;  %2600 = vmatprep.subr.bf16.mxu1 %v6475_v62  ;;  %7860 = vst [vmem:[#allocation22_spill] sm:$0xff] %v6504_v44  ;;  %2561 = vmatprep.subr.bf16.mxu0 %v6504_v44 }
 0x109   :  { %2601 = vmatpush1.bf16.msra.mxu1 %v6473_v5  ;;  %7863 = vst [vmem:[#allocation25_spill] sm:$0xff] %v6514_v13 }
 0x118   :  { %v6454_v39 = vpop.f32.mrb[8].mxu0  ;;  %v6466_v48 = vpop.f32.mrb[8].mxu1 }
 0x119   :  { %v6464_v46 = vpop.f32.mrb[9].mxu0  ;;  %v6480_v29 = vpop.f32.mrb[9].mxu1 }
 0x11a   :  { %v631_v0 = vpop.f32.mrb[10].mxu0  ;;  %v684_v21 = vpop.f32.mrb[10].mxu1 }
 0x11b   :  { %v6484_v47 = vadd.f32 %v631_v0, %v6443_v10  ;;  %v633_v35 = vpop.f32.mrb[11].mxu0  ;;  %v6501_v34 = vadd.f32 %v684_v21, %v6457_v42  ;;  %v686_v36 = vpop.f32.mrb[11].mxu1  ;;  %v1849_v21 = vld [vmem:[%s7760_s4 + $0x240] sm:$0xff] }
 0x11c   :  { %v6498_v0 = vadd.f32 %v633_v35, %v6478_v18  ;;  %v6510_v25 = vadd.f32 %v686_v36, %v6469_v1  ;;  %v6516_v35 = vcombine.high %v1842_v26, %v1846_v37  ;;  %v1853_v36 = vld [vmem:[%s7760_s4 + $0x260] sm:$0xff]  ;;  %v1854_v26 = vld [vmem:[%s7760_s4 + $0x268] sm:$0xff] }
 0x11d   :  { %7857 = vst [vmem:[#allocation19_spill] sm:$0xff] %v6484_v47  ;;  %7859 = vst [vmem:[#allocation21_spill] sm:$0xff] %v6501_v34  ;;  %v6512_v47 = vcombine.low %v1841_v32, %v1845_v38  ;;  %v1850_v32 = vld [vmem:[%s7760_s4 + $0x248] sm:$0xff]  ;;  %v6531_v38 = vcombine.high %v1849_v21, %v1853_v36  ;;  %v6539_v8 = vcombine.low %v1849_v21, %v1853_v36 }
 0x11e   :  { %7858 = vst [vmem:[#allocation20_spill] sm:$0xff] %v6498_v0  ;;  %7861 = vst [vmem:[#allocation23_spill] sm:$0xff] %v6510_v25  ;;  %2602 = vmatprep.subr.bf16.mxu1 %v6516_v35  ;;  %v6541_v9 = vcombine.low %v1850_v32, %v1854_v26  ;;  %v6543_v2 = vcombine.high %v1850_v32, %v1854_v26 }
 0x11f   :  { %7862 = vst [vmem:[#allocation24_spill] sm:$0xff] %v6512_v47  ;;  %7864 = vst [vmem:[#allocation26_spill] sm:$0xff] %v6516_v35  ;;  %2562 = vmatpush1.bf16.msra.mxu0 %v6512_v47  ;;  %2603 = vmatpush1.bf16.msra.mxu1 %v6514_v13 }
 0x120   :  { %v637_v37 = vpop.f32.mrb[12].mxu0  ;;  %7865 = vst [vmem:[#allocation27_spill] sm:$0xff] %v6531_v38  ;;  %v690_v34 = vpop.f32.mrb[12].mxu1  ;;  %7867 = vst [vmem:[#allocation29_spill] sm:$0xff] %v6539_v8  ;;  %2563 = vmatprep.subr.bf16.mxu0 %v6531_v38  ;;  %2604 = vmatprep.subr.bf16.mxu1 %v6543_v2 }
 0x121   :  { %v6537_v25 = vadd.f32 %v637_v37, %v6443_v10  ;;  %v639_v0 = vpop.f32.mrb[13].mxu0  ;;  %7868 = vst [vmem:[#allocation30_spill] sm:$0xff] %v6541_v9  ;;  %7869 = vst [vmem:[#allocation31_spill] sm:$0xff] %v6543_v2  ;;  %v6549_v35 = vadd.f32 %v690_v34, %v6457_v42  ;;  %v692_v44 = vpop.f32.mrb[13].mxu1  ;;  %v1861_v34 = vld [vmem:[%s7760_s4 + $0x2a0] sm:$0xff] }
 0x122   :  { %v6546_v47 = vadd.f32 %v639_v0, %v6478_v18  ;;  %v641_v13 = vpop.f32.mrb[14].mxu0  ;;  %v6556_v21 = vadd.f32 %v692_v44, %v6469_v1  ;;  %v694_v36 = vpop.f32.mrb[14].mxu1  ;;  %v1857_v0 = vld [vmem:[%s7760_s4 + $0x280] sm:$0xff] }
 0x123   :  { %7866 = vst [vmem:[#allocation28_spill] sm:$0xff] %v6537_v25  ;;  %7871 = vst [vmem:[#allocation33_spill] sm:$0xff] %v6549_v35  ;;  %v6553_v37 = vadd.f32 %v641_v13, %v6443_v10  ;;  %v643_v25 = vpop.f32.mrb[15].mxu0  ;;  %2564 = vmatpush1.bf16.msra.mxu0 %v6539_v8  ;;  %v1858_v13 = vld [vmem:[%s7760_s4 + $0x288] sm:$0xff]  ;;  %v6573_v32 = vadd.f32 %v694_v36, %v6457_v42  ;;  %v696_v26 = vpop.f32.mrb[15].mxu1  ;;  %2605 = vmatpush1.bf16.msra.mxu1 %v6541_v9  ;;  %v1865_v36 = vld [vmem:[%s7760_s4 + $0x2c0] sm:$0xff] }
 0x124   :  { %7870 = vst [vmem:[#allocation32_spill] sm:$0xff] %v6546_v47  ;;  %7873 = vst [vmem:[#allocation35_spill] sm:$0xff] %v6556_v21  ;;  %v6570_v44 = vadd.f32 %v643_v25, %v6478_v18  ;;  %v1862_v21 = vld [vmem:[%s7760_s4 + $0x2a8] sm:$0xff]  ;;  %v6582_v47 = vadd.f32 %v696_v26, %v6469_v1  ;;  %v6584_v35 = vcombine.low %v1857_v0, %v1861_v34  ;;  %v1869_v26 = vld [vmem:[%s7760_s4 + $0x2e0] sm:$0xff] }
 0x125   :  { %7872 = vst [vmem:[#allocation34_spill] sm:$0xff] %v6553_v37  ;;  %7875 = vst [vmem:[#allocation37_spill] sm:$0xff] %v6573_v32  ;;  %v6576_v37 = vcombine.high %v1857_v0, %v1861_v34  ;;  %v6586_v8 = vcombine.low %v1858_v13, %v1862_v21  ;;  %v6588_v25 = vcombine.high %v1858_v13, %v1862_v21  ;;  %v1866_v0 = vld [vmem:[%s7760_s4 + $0x2c8] sm:$0xff]  ;;  %v1873_v32 = vld [vmem:[%s7760_s4 + $0x300] sm:$0xff] }
 0x126   :  { %7874 = vst [vmem:[#allocation36_spill] sm:$0xff] %v6570_v44  ;;  %7877 = vst [vmem:[#allocation39_spill] sm:$0xff] %v6582_v47  ;;  %v6603_v21 = vcombine.high %v1865_v36, %v1869_v26  ;;  %v1870_v34 = vld [vmem:[%s7760_s4 + $0x2e8] sm:$0xff]  ;;  %v6608_v13 = vcombine.low %v1865_v36, %v1869_v26 }
 0x127   :  { %7876 = vst [vmem:[#allocation38_spill] sm:$0xff] %v6576_v37  ;;  %7878 = vst [vmem:[#allocation40_spill] sm:$0xff] %v6584_v35  ;;  %2565 = vmatprep.subr.bf16.mxu0 %v6576_v37  ;;  %2606 = vmatprep.subr.bf16.mxu1 %v6588_v25  ;;  %v6610_v47 = vcombine.low %v1866_v0, %v1870_v34  ;;  %v6612_v44 = vcombine.high %v1866_v0, %v1870_v34  ;;  %v1874_v36 = vld [vmem:[%s7760_s4 + $0x308] sm:$0xff] }
 0x128   :  { %7879 = vst [vmem:[#allocation41_spill] sm:$0xff] %v6586_v8  ;;  %7880 = vst [vmem:[#allocation42_spill] sm:$0xff] %v6588_v25  ;;  %2566 = vmatpush1.bf16.msra.mxu0 %v6584_v35  ;;  %2607 = vmatpush1.bf16.msra.mxu1 %v6586_v8  ;;  %v1877_v8 = vld [vmem:[%s7760_s4 + $0x320] sm:$0xff]  ;;  %v1878_v0 = vld [vmem:[%s7760_s4 + $0x328] sm:$0xff]  ;;  %v577_v35 = vadd.f32 %v6324_v63, %v6310_v57  ;;  %v681_v57 = vadd.f32 %v6466_v48, %v6457_v42 }
 0x129   :  { %7881 = vst [vmem:[#allocation43_spill] sm:$0xff] %v6603_v21  ;;  %7882 = vst [vmem:[#allocation44_spill] sm:$0xff] %v6608_v13  ;;  %2567 = vmatprep.subr.bf16.mxu0 %v6603_v21  ;;  %2608 = vmatprep.subr.bf16.mxu1 %v6612_v44  ;;  %v6627_v26 = vcombine.high %v1873_v32, %v1877_v8  ;;  %v6632_v34 = vcombine.low %v1873_v32, %v1877_v8  ;;  %v1885_v21 = vld [vmem:[%s7760_s4 + $0x360] sm:$0xff]  ;;  %v1882_v8 = vld [vmem:[%s7760_s4 + $0x348] sm:$0xff] }
 0x12a   :  { %7883 = vst [vmem:[#allocation45_spill] sm:$0xff] %v6610_v47  ;;  %7884 = vst [vmem:[#allocation46_spill] sm:$0xff] %v6612_v44  ;;  %v6636_v44 = vcombine.high %v1874_v36, %v1878_v0 }
 0x12b   :  { %7885 = vst [vmem:[#allocation47_spill] sm:$0xff] %v6627_v26  ;;  %7886 = vst [vmem:[#allocation48_spill] sm:$0xff] %v6632_v34 }
 0x12c   :  { %2568 = vmatpush1.bf16.msra.mxu0 %v6608_v13  ;;  %2609 = vmatpush1.bf16.msra.mxu1 %v6610_v47  ;;  %v6634_v13 = vcombine.low %v1874_v36, %v1878_v0  ;;  %7888 = vst [vmem:[#allocation50_spill] sm:$0xff] %v6636_v44  ;;  %v1881_v47 = vld [vmem:[%s7760_s4 + $0x340] sm:$0xff]  ;;  %v1886_v36 = vld [vmem:[%s7760_s4 + $0x368] sm:$0xff] }
 0x12d   :  { %2569 = vmatprep.subr.bf16.mxu0 %v6627_v26  ;;  %2610 = vmatprep.subr.bf16.mxu1 %v6636_v44  ;;  %v6651_v32 = vcombine.high %v1881_v47, %v1885_v21  ;;  %v6656_v0 = vcombine.low %v1881_v47, %v1885_v21  ;;  %v6660_v44 = vcombine.high %v1882_v8, %v1886_v36  ;;  %v1893_v26 = vld [vmem:[%s7760_s4 + $0x3a0] sm:$0xff]  ;;  %v1890_v47 = vld [vmem:[%s7760_s4 + $0x388] sm:$0xff] }
 0x12e   :  { %7887 = vst [vmem:[#allocation49_spill] sm:$0xff] %v6634_v13 }
 0x12f   :  { %7889 = vst [vmem:[#allocation51_spill] sm:$0xff] %v6651_v32  ;;  %7890 = vst [vmem:[#allocation52_spill] sm:$0xff] %v6656_v0 }
 0x130   :  { %2570 = vmatpush1.bf16.msra.mxu0 %v6632_v34  ;;  %2611 = vmatpush1.bf16.msra.mxu1 %v6634_v13  ;;  %v6658_v34 = vcombine.low %v1882_v8, %v1886_v36  ;;  %7892 = vst [vmem:[#allocation54_spill] sm:$0xff] %v6660_v44  ;;  %v1889_v13 = vld [vmem:[%s7760_s4 + $0x380] sm:$0xff]  ;;  %v1894_v8 = vld [vmem:[%s7760_s4 + $0x3a8] sm:$0xff] }
 0x131   :  { %2571 = vmatprep.subr.bf16.mxu0 %v6651_v32  ;;  %2612 = vmatprep.subr.bf16.mxu1 %v6660_v44  ;;  %v6675_v21 = vcombine.high %v1889_v13, %v1893_v26  ;;  %v6680_v36 = vcombine.low %v1889_v13, %v1893_v26  ;;  %v6684_v44 = vcombine.high %v1890_v47, %v1894_v8  ;;  %v1901_v32 = vld [vmem:[%s7760_s4 + $0x3e0] sm:$0xff]  ;;  %v1898_v13 = vld [vmem:[%s7760_s4 + $0x3c8] sm:$0xff] }
 0x132   :  { %7891 = vst [vmem:[#allocation53_spill] sm:$0xff] %v6658_v34 }
 0x133   :  { %7893 = vst [vmem:[#allocation55_spill] sm:$0xff] %v6675_v21  ;;  %7894 = vst [vmem:[#allocation56_spill] sm:$0xff] %v6680_v36 }
 0x134   :  { %2572 = vmatpush1.bf16.msra.mxu0 %v6656_v0  ;;  %2613 = vmatpush1.bf16.msra.mxu1 %v6658_v34  ;;  %v6682_v0 = vcombine.low %v1890_v47, %v1894_v8  ;;  %7896 = vst [vmem:[#allocation58_spill] sm:$0xff] %v6684_v44  ;;  %v1897_v34 = vld [vmem:[%s7760_s4 + $0x3c0] sm:$0xff]  ;;  %v1902_v47 = vld [vmem:[%s7760_s4 + $0x3e8] sm:$0xff] }
 0x135   :  { %2573 = vmatprep.subr.bf16.mxu0 %v6675_v21  ;;  %2614 = vmatprep.subr.bf16.mxu1 %v6684_v44  ;;  %v6699_v26 = vcombine.high %v1897_v34, %v1901_v32  ;;  %v6704_v8 = vcombine.low %v1897_v34, %v1901_v32  ;;  %v6708_v44 = vcombine.high %v1898_v13, %v1902_v47  ;;  %v1783_v21 = vld [vmem:[%s7760_s4 + $0x30] sm:$0xff]  ;;  %v1780_v34 = vld [vmem:[%s7760_s4 + $0x18] sm:$0xff] }
 0x136   :  { %7895 = vst [vmem:[#allocation57_spill] sm:$0xff] %v6682_v0 }
 0x137   :  { %7897 = vst [vmem:[#allocation59_spill] sm:$0xff] %v6699_v26  ;;  %7898 = vst [vmem:[#allocation60_spill] sm:$0xff] %v6704_v8 }
 0x138   :  { %2574 = vmatpush1.bf16.msra.mxu0 %v6680_v36  ;;  %2615 = vmatpush1.bf16.msra.mxu1 %v6682_v0  ;;  %v6706_v36 = vcombine.low %v1898_v13, %v1902_v47  ;;  %7900 = vst [vmem:[#allocation62_spill] sm:$0xff] %v6708_v44  ;;  %v1779_v0 = vld [vmem:[%s7760_s4 + $0x10] sm:$0xff]  ;;  %v1784_v47 = vld [vmem:[%s7760_s4 + $0x38] sm:$0xff] }
 0x139   :  { %2575 = vmatprep.subr.bf16.mxu0 %v6699_v26  ;;  %2616 = vmatprep.subr.bf16.mxu1 %v6708_v44  ;;  %v6723_v32 = vcombine.low %v1779_v0, %v1783_v21  ;;  %v6725_v13 = vcombine.high %v1779_v0, %v1783_v21  ;;  %v6732_v44 = vcombine.high %v1780_v34, %v1784_v47 }
 0x13a   :  { %7899 = vst [vmem:[#allocation61_spill] sm:$0xff] %v6706_v36  ;;  %v522_v26 = vadd.f32 %v6294_v51, %v6289_v49  ;;  %v575_v0 = vadd.f32 %v6307_v56, %v6297_v52  ;;  %v628_v52 = vadd.f32 %v6454_v39, %v6443_v10  ;;  %v630_v56 = vadd.f32 %v6464_v46, %v6478_v18 }
 0x13b   :  { %7901 = vst [vmem:[#allocation63_spill] sm:$0xff] %v6725_v13  ;;  %7902 = vst [vmem:[#allocation64_spill] sm:$0xff] %v6732_v44 }
 0x13c   :  { %2576 = vmatpush1.bf16.msra.mxu0 %v6704_v8  ;;  %2617 = vmatpush1.bf16.msra.mxu1 %v6706_v36  ;;  %v6730_v8 = vcombine.low %v1780_v34, %v1784_v47  ;;  %v524_v36 = vadd.f32 %v6305_v55, %v6322_v61 }
 0x13d   :  { %2627 = vmatprep.subr.bf16.mxu0 %v6725_v13  ;;  %2668 = vmatprep.subr.bf16.mxu1 %v6732_v44 }
 0x158   :  { %v1557_v21 = vpop.f32.mrb[16].mxu0  ;;  %v1598_v34 = vpop.f32.mrb[16].mxu1 }
 0x159   :  { %v1687_v25 = vadd.f32 %v1557_v21, %v522_v26  ;;  %v1559_v47 = vpop.f32.mrb[17].mxu0  ;;  %v1689_v37 = vadd.f32 %v1598_v34, %v575_v0  ;;  %v1600_v9 = vpop.f32.mrb[17].mxu1 }
 0x15a   :  { %v1688_v13 = vadd.f32 %v1559_v47, %v524_v36  ;;  %v1561_v44 = vpop.f32.mrb[18].mxu0  ;;  %v1690_v2 = vadd.f32 %v1600_v9, %v577_v35  ;;  %v1602_v49 = vpop.f32.mrb[18].mxu1  ;;  %v683_v9 = vadd.f32 %v6480_v29, %v6469_v1 }
 0x15b   :  { %v1562_v38 = vpop.f32.mrb[19].mxu0  ;;  %v1603_v51 = vpop.f32.mrb[19].mxu1  ;;  %v1703_v5 = vmul.f32 0.5, %v1689_v37  ;;  %v1695_v61 = vmul.f32 0.5, %v1687_v25 }
 0x15c   :  { %v1704_v55 = vmul.f32 0.5, %v1690_v2  ;;  %v1696_v17 = vmul.f32 0.5, %v1688_v13 }
 0x15d   :  { %5469 = vtanh.f32 %v1703_v5 }
 0x15e   :  { %5471 = vtanh.f32 %v1704_v55 }
 0x15f   :  { %5473 = vtanh.f32 %v1695_v61 }
 0x160   :  { %5475 = vtanh.f32 %v1696_v17 }
 0x167   :  { %v5470_v25 = vpop.eup %5469 }
 0x168   :  { %v5472_v46 = vpop.eup %5471  ;;  %v1707_v26 = vmul.f32 0.5, %v5470_v25 }
 0x169   :  { %v5474_v42 = vpop.eup %5473  ;;  %v1708_v29 = vmul.f32 0.5, %v5472_v46 }
 0x16a   :  { %v5476_v48 = vpop.eup %5475  ;;  %v1699_v0 = vmul.f32 0.5, %v5474_v42  ;;  %v1709_v34 = vadd.f32 0.5, %v1707_v26 }
 0x16b   :  { %v1700_v21 = vmul.f32 0.5, %v5476_v48  ;;  %v1710_v47 = vadd.f32 0.5, %v1708_v29  ;;  %v6763_v48 = vpop.permute.xlu0 %1746  ;;  %v1787_v29 = vld [vmem:[%s7760_s4 + $0x50] sm:$0xff] }
 0x16c   :  { %v1701_v49 = vadd.f32 0.5, %v1699_v0  ;;  %v1788_v0 = vld [vmem:[%s7760_s4 + $0x58] sm:$0xff] }
 0x16d   :  { %v1702_v55 = vadd.f32 0.5, %v1700_v21  ;;  %v1792_v21 = vld [vmem:[%s7760_s4 + $0x78] sm:$0xff] }
 0x198   :  { %v1639_v63 = vpop.f32.mrb[20].mxu0  ;;  %v1680_v35 = vpop.f32.mrb[20].mxu1 }
 0x199   :  { %v1691_v2 = vadd.f32 %v1639_v63, %v628_v52  ;;  %v1641_v38 = vpop.f32.mrb[21].mxu0  ;;  %v1693_v5 = vadd.f32 %v1680_v35, %v681_v57  ;;  %v1682_v44 = vpop.f32.mrb[21].mxu1  ;;  %v1721_v52 = vmul.f32 0.0, %v1709_v34  ;;  %v1722_v57 = vmul.f32 0.0, %v1710_v47 }
 0x19a   :  { %v1692_v37 = vadd.f32 %v1641_v38, %v630_v56  ;;  %v1643_v17 = vpop.f32.mrb[22].mxu0  ;;  %v1694_v10 = vadd.f32 %v1682_v44, %v683_v9  ;;  %v1684_v36 = vpop.f32.mrb[22].mxu1 }
 0x19b   :  { %5477 = vtanh.f32 %v1691_v2  ;;  %v1644_v39 = vpop.f32.mrb[23].mxu0  ;;  %v1685_v18 = vpop.f32.mrb[23].mxu1  ;;  %v1713_v13 = vmul.f32 0.5, %v1693_v5 }
 0x19c   :  { %5479 = vtanh.f32 %v1692_v37  ;;  %v1714_v1 = vmul.f32 0.5, %v1694_v10  ;;  %v6757_v35 = vpop.permute.xlu1 %3785 }
 0x19d   :  { %5481 = vtanh.f32 %v1713_v13  ;;  %7903 = vst [vmem:[#allocation65_spill] sm:$0xff] %v6757_v35  ;;  %v1827_v35 = vld [vmem:[%s7760_s4 + $0x190] sm:$0xff] }
 0x19e   :  { %5483 = vtanh.f32 %v1714_v1  ;;  %v1791_v1 = vld [vmem:[%s7760_s4 + $0x70] sm:$0xff] }
 0x1a0   :  { %v6760_v17 = vpop.permute.xlu1 %5458 }
 0x1a1   :  { %v5460_v10 = vunpack.i.l.bf16 %v6760_v17 }
 0x1a5   :  { %v5478_v51 = vpop.eup %5477 }
 0x1a6   :  { %v5480_v61 = vpop.eup %5479  ;;  %v1723_v56 = vmul.f32 %v5478_v51, %v1701_v49  ;;  %v1795_v49 = vld [vmem:[%s7760_s4 + $0x90] sm:$0xff]  ;;  %v6789_v51 = vcombine.high %v1787_v29, %v1791_v1 }
 0x1a7   :  { %v1724_v63 = vmul.f32 %v5480_v61, %v1702_v55  ;;  %v5482_v38 = vpop.eup %5481  ;;  %v6791_v55 = vcombine.high %v1788_v0, %v1792_v21  ;;  %v1799_v61 = vld [vmem:[%s7760_s4 + $0xb0] sm:$0xff] }
 0x1a8   :  { %v6752_v9 = vadd.f32 %v1723_v56, %v1721_v52  ;;  %v5484_v5 = vpop.eup %5483  ;;  %v1717_v37 = vmul.f32 0.5, %v5482_v38  ;;  %v1796_v52 = vld [vmem:[%s7760_s4 + $0x98] sm:$0xff]  ;;  %v6810_v38 = vcombine.high %v1795_v49, %v1799_v61 }
 0x1a9   :  { %v6754_v2 = vadd.f32 %v1724_v63, %v1722_v57  ;;  %v1718_v44 = vmul.f32 0.5, %v5484_v5  ;;  %v1800_v56 = vld [vmem:[%s7760_s4 + $0xb8] sm:$0xff]  ;;  %v6806_v57 = vcombine.low %v1787_v29, %v1791_v1  ;;  %v6808_v63 = vcombine.low %v1788_v0, %v1792_v21 }
 0x1aa   :  { %5485 = vtanh.f32 %v6752_v9  ;;  %v1719_v25 = vadd.f32 0.5, %v1717_v37  ;;  %v6812_v5 = vcombine.high %v1796_v52, %v1800_v56  ;;  %v1803_v37 = vld [vmem:[%s7760_s4 + $0xd0] sm:$0xff]  ;;  %v1816_v29 = vld [vmem:[%s7760_s4 + $0x138] sm:$0xff] }
 0x1ab   :  { %5487 = vtanh.f32 %v6754_v2  ;;  %v1720_v36 = vadd.f32 0.5, %v1718_v44  ;;  %v1807_v44 = vld [vmem:[%s7760_s4 + $0xf0] sm:$0xff] }
 0x1ac   :  { %v6854_v1 = vcombine.low %v1803_v37, %v1807_v44 }
 0x1ae   :  { %7904 = vst [vmem:[#allocation66_spill] sm:$0xff] %v6854_v1 }
 0x1b4   :  { %v5486_v39 = vpop.eup %5485 }
 0x1b5   :  { %v5488_v46 = vpop.eup %5487  ;;  %v1729_v18 = vmul.f32 %v5486_v39, %v1719_v25  ;;  %v1804_v25 = vld [vmem:[%s7760_s4 + $0xd8] sm:$0xff]  ;;  %v6830_v39 = vcombine.low %v1795_v49, %v1799_v61  ;;  %v1819_v49 = vld [vmem:[%s7760_s4 + $0x150] sm:$0xff] }
 0x1b6   :  { %v1730_v42 = vmul.f32 %v5488_v46, %v1720_v36  ;;  %v6832_v36 = vcombine.low %v1796_v52, %v1800_v56  ;;  %v6836_v46 = vcombine.high %v1803_v37, %v1807_v44  ;;  %v1823_v61 = vld [vmem:[%s7760_s4 + $0x170] sm:$0xff]  ;;  %v1820_v52 = vld [vmem:[%s7760_s4 + $0x158] sm:$0xff] }
 0x1b7   :  { %v1760_v26 = vmul.f32 %v5460_v10, %v1729_v18  ;;  %v6784_v47 = vpack.c.bf16 %v1729_v18, %v1729_v18  ;;  %v1808_v10 = vld [vmem:[%s7760_s4 + $0xf8] sm:$0xff] }
 0x1b8   :  { %v1752_v13 = vmul.f32 %v6763_v48, %v1730_v42  ;;  %v6838_v18 = vcombine.high %v1804_v25, %v1808_v10  ;;  %v1811_v42 = vld [vmem:[%s7760_s4 + $0x110] sm:$0xff]  ;;  %v6856_v0 = vcombine.low %v1804_v25, %v1808_v10  ;;  %v1824_v56 = vld [vmem:[%s7760_s4 + $0x178] sm:$0xff]  ;;  %v6884_v25 = vcombine.high %v1819_v49, %v1823_v61 }
 0x1b9   :  { %1761 = vst [vmem:[%s7763_s5] sm:$0xff] %v1760_v26  ;;  %v1815_v26 = vld [vmem:[%s7760_s4 + $0x130] sm:$0xff]  ;;  %v6886_v10 = vcombine.high %v1820_v52, %v1824_v56 }
 0x1ba   :  { %5056 = vst [vmem:[%s7764_s6 + $0x18] sm:$0xff] %v1752_v13  ;;  %v1776_v34 = vpack.c.bf16 %v1752_v13, %v1752_v13  ;;  %v1812_v13 = vld [vmem:[%s7760_s4 + $0x118] sm:$0xff]  ;;  %7905 = vst [vmem:[#allocation67_spill] sm:$0xff] %v6856_v0  ;;  %v6860_v21 = vcombine.high %v1811_v42, %v1815_v26  ;;  %v6878_v37 = vcombine.low %v1811_v42, %v1815_v26 }
 0x1bb   :  { %v6880_v44 = vcombine.low %v1812_v13, %v1816_v29  ;;  %7910 = vst [vmem:[#allocation72_spill] sm:$0xff] %v6884_v25  ;;  %7911 = vst [vmem:[#allocation73_spill] sm:$0xff] %v6886_v10  ;;  %v1828_v42 = vld [vmem:[%s7760_s4 + $0x198] sm:$0xff] }
 0x1bc   :  { %2577 = vmatprep.mubr.bf16.mxu0 %v1776_v34  ;;  %2618 = vmatprep.mubr.bf16.mxu1 %v1776_v34  ;;  %7906 = vst [vmem:[#allocation68_spill] sm:$0xff] %v6860_v21  ;;  %7908 = vst [vmem:[#allocation70_spill] sm:$0xff] %v6878_v37  ;;  %v1832_v26 = vld [vmem:[%s7760_s4 + $0x1b8] sm:$0xff] }
 0x1bd   :  { %2578 = vmatmul.mubr.bf16.vlgmr.msra.gmra.mrb[24].mxu0 %v6784_v47  ;;  %2619 = vmatmul.mubr.bf16.vlgmr.msra.gmra.mrb[24].mxu1 %v6784_v47  ;;  %7909 = vst [vmem:[#allocation71_spill] sm:$0xff] %v6880_v44 }
 0x1be   :  { %2628 = vmatpush1.bf16.msra.mxu0 %v6723_v32  ;;  %2669 = vmatpush1.bf16.msra.mxu1 %v6730_v8 }
 0x1bf   :  { %2659 = vmatprep.mubr.bf16.mxu0 %v1776_v34  ;;  %2700 = vmatprep.mubr.bf16.mxu1 %v1776_v34  ;;  %v6862_v34 = vcombine.high %v1812_v13, %v1816_v29  ;;  %v6902_v13 = vcombine.low %v1819_v49, %v1823_v61  ;;  %v6904_v29 = vcombine.low %v1820_v52, %v1824_v56  ;;  %v1836_v49 = vld [vmem:[%s7760_s4 + $0x1d8] sm:$0xff] }
 0x1c0   :  { %2629 = vmatprep.subr.bf16.mxu0 %v6789_v51  ;;  %2670 = vmatprep.subr.bf16.mxu1 %v6791_v55  ;;  %v1840_v61 = vld [vmem:[%s7760_s4 + $0x1f8] sm:$0xff]  ;;  %v6928_v56 = vcombine.low %v1828_v42, %v1832_v26 }
 0x1c1   :  { %7907 = vst [vmem:[#allocation69_spill] sm:$0xff] %v6862_v34  ;;  %7912 = vst [vmem:[#allocation74_spill] sm:$0xff] %v6902_v13 }
 0x1c2   :  { %2630 = vmatpush1.bf16.msra.mxu0 %v6806_v57  ;;  %2671 = vmatpush1.bf16.msra.mxu1 %v6808_v63  ;;  %7913 = vst [vmem:[#allocation75_spill] sm:$0xff] %v6904_v29  ;;  %7917 = vst [vmem:[#allocation79_spill] sm:$0xff] %v6928_v56 }
 0x1c3   :  { %2631 = vmatprep.subr.bf16.mxu0 %v6810_v38  ;;  %2672 = vmatprep.subr.bf16.mxu1 %v6812_v5 }
 0x1c6   :  { %2632 = vmatpush1.bf16.msra.mxu0 %v6830_v39  ;;  %2673 = vmatpush1.bf16.msra.mxu1 %v6832_v36 }
 0x1c7   :  { %2633 = vmatprep.subr.bf16.mxu0 %v6836_v46  ;;  %2674 = vmatprep.subr.bf16.mxu1 %v6838_v18 }
 0x1ca   :  { %2634 = vmatpush1.bf16.msra.mxu0 %v6854_v1  ;;  %2675 = vmatpush1.bf16.msra.mxu1 %v6856_v0  ;;  %v1831_v0 = vld [vmem:[%s7760_s4 + $0x1b0] sm:$0xff] }
 0x1cb   :  { %2635 = vmatprep.subr.bf16.mxu0 %v6860_v21  ;;  %2676 = vmatprep.subr.bf16.mxu1 %v6862_v34  ;;  %v6908_v34 = vcombine.high %v1827_v35, %v1831_v0  ;;  %v6910_v21 = vcombine.high %v1828_v42, %v1832_v26  ;;  %v1835_v1 = vld [vmem:[%s7760_s4 + $0x1d0] sm:$0xff]  ;;  %v6926_v52 = vcombine.low %v1827_v35, %v1831_v0  ;;  %v1844_v35 = vld [vmem:[%s7760_s4 + $0x218] sm:$0xff] }
 0x1cc   :  { %v1848_v0 = vld [vmem:[%s7760_s4 + $0x238] sm:$0xff]  ;;  %v6952_v26 = vcombine.low %v1836_v49, %v1840_v61 }
 0x1cd   :  { %7914 = vst [vmem:[#allocation76_spill] sm:$0xff] %v6908_v34  ;;  %7915 = vst [vmem:[#allocation77_spill] sm:$0xff] %v6910_v21 }
 0x1ce   :  { %2636 = vmatpush1.bf16.msra.mxu0 %v6878_v37  ;;  %2677 = vmatpush1.bf16.msra.mxu1 %v6880_v44  ;;  %v1839_v44 = vld [vmem:[%s7760_s4 + $0x1f0] sm:$0xff]  ;;  %7916 = vst [vmem:[#allocation78_spill] sm:$0xff] %v6926_v52  ;;  %7921 = vst [vmem:[#allocation83_spill] sm:$0xff] %v6952_v26 }
 0x1cf   :  { %2637 = vmatprep.subr.bf16.mxu0 %v6884_v25  ;;  %2678 = vmatprep.subr.bf16.mxu1 %v6886_v10  ;;  %v6932_v10 = vcombine.high %v1835_v1, %v1839_v44  ;;  %v6934_v25 = vcombine.high %v1836_v49, %v1840_v61  ;;  %v1843_v37 = vld [vmem:[%s7760_s4 + $0x210] sm:$0xff]  ;;  %v6950_v42 = vcombine.low %v1835_v1, %v1839_v44  ;;  %v1852_v1 = vld [vmem:[%s7760_s4 + $0x258] sm:$0xff] }
 0x1d0   :  { %v1856_v44 = vld [vmem:[%s7760_s4 + $0x278] sm:$0xff]  ;;  %v6976_v61 = vcombine.low %v1844_v35, %v1848_v0 }
 0x1d1   :  { %7918 = vst [vmem:[#allocation80_spill] sm:$0xff] %v6932_v10  ;;  %7919 = vst [vmem:[#allocation81_spill] sm:$0xff] %v6934_v25 }
 0x1d2   :  { %2638 = vmatpush1.bf16.msra.mxu0 %v6902_v13  ;;  %2679 = vmatpush1.bf16.msra.mxu1 %v6904_v29  ;;  %v1847_v29 = vld [vmem:[%s7760_s4 + $0x230] sm:$0xff]  ;;  %7920 = vst [vmem:[#allocation82_spill] sm:$0xff] %v6950_v42  ;;  %7925 = vst [vmem:[#allocation87_spill] sm:$0xff] %v6976_v61 }
 0x1d3   :  { %2639 = vmatprep.subr.bf16.mxu0 %v6908_v34  ;;  %2680 = vmatprep.subr.bf16.mxu1 %v6910_v21  ;;  %v6956_v21 = vcombine.high %v1843_v37, %v1847_v29  ;;  %v6958_v34 = vcombine.high %v1844_v35, %v1848_v0  ;;  %v1851_v13 = vld [vmem:[%s7760_s4 + $0x250] sm:$0xff]  ;;  %v6974_v49 = vcombine.low %v1843_v37, %v1847_v29  ;;  %v1860_v37 = vld [vmem:[%s7760_s4 + $0x298] sm:$0xff] }
 0x1d4   :  { %v1864_v29 = vld [vmem:[%s7760_s4 + $0x2b8] sm:$0xff]  ;;  %v7000_v0 = vcombine.low %v1852_v1, %v1856_v44 }
 0x1d5   :  { %7922 = vst [vmem:[#allocation84_spill] sm:$0xff] %v6956_v21  ;;  %7923 = vst [vmem:[#allocation85_spill] sm:$0xff] %v6958_v34 }
 0x1d6   :  { %2640 = vmatpush1.bf16.msra.mxu0 %v6926_v52  ;;  %2681 = vmatpush1.bf16.msra.mxu1 %v6928_v56  ;;  %v1855_v56 = vld [vmem:[%s7760_s4 + $0x270] sm:$0xff]  ;;  %7924 = vst [vmem:[#allocation86_spill] sm:$0xff] %v6974_v49  ;;  %7929 = vst [vmem:[#allocation91_spill] sm:$0xff] %v7000_v0 }
 0x1d7   :  { %2641 = vmatprep.subr.bf16.mxu0 %v6932_v10  ;;  %2682 = vmatprep.subr.bf16.mxu1 %v6934_v25  ;;  %v6980_v25 = vcombine.high %v1851_v13, %v1855_v56  ;;  %v6982_v10 = vcombine.high %v1852_v1, %v1856_v44  ;;  %v1859_v52 = vld [vmem:[%s7760_s4 + $0x290] sm:$0xff]  ;;  %v6998_v35 = vcombine.low %v1851_v13, %v1855_v56  ;;  %v1868_v13 = vld [vmem:[%s7760_s4 + $0x2d8] sm:$0xff] }
 0x1d8   :  { %v1872_v56 = vld [vmem:[%s7760_s4 + $0x2f8] sm:$0xff]  ;;  %v7024_v44 = vcombine.low %v1860_v37, %v1864_v29 }
 0x1d9   :  { %7926 = vst [vmem:[#allocation88_spill] sm:$0xff] %v6980_v25  ;;  %7927 = vst [vmem:[#allocation89_spill] sm:$0xff] %v6982_v10 }
 0x1da   :  { %2642 = vmatpush1.bf16.msra.mxu0 %v6950_v42  ;;  %2683 = vmatpush1.bf16.msra.mxu1 %v6952_v26  ;;  %v1863_v26 = vld [vmem:[%s7760_s4 + $0x2b0] sm:$0xff]  ;;  %7928 = vst [vmem:[#allocation90_spill] sm:$0xff] %v6998_v35  ;;  %7933 = vst [vmem:[#allocation95_spill] sm:$0xff] %v7024_v44 }
 0x1db   :  { %2643 = vmatprep.subr.bf16.mxu0 %v6956_v21  ;;  %2684 = vmatprep.subr.bf16.mxu1 %v6958_v34  ;;  %v7004_v34 = vcombine.high %v1859_v52, %v1863_v26  ;;  %v7006_v21 = vcombine.high %v1860_v37, %v1864_v29  ;;  %v1867_v42 = vld [vmem:[%s7760_s4 + $0x2d0] sm:$0xff]  ;;  %v7022_v1 = vcombine.low %v1859_v52, %v1863_v26  ;;  %v1876_v52 = vld [vmem:[%s7760_s4 + $0x318] sm:$0xff] }
 0x1dc   :  { %v1880_v26 = vld [vmem:[%s7760_s4 + $0x338] sm:$0xff]  ;;  %v7048_v29 = vcombine.low %v1868_v13, %v1872_v56 }
 0x1dd   :  { %7930 = vst [vmem:[#allocation92_spill] sm:$0xff] %v7004_v34  ;;  %7931 = vst [vmem:[#allocation93_spill] sm:$0xff] %v7006_v21 }
 0x1de   :  { %2644 = vmatpush1.bf16.msra.mxu0 %v6974_v49  ;;  %2685 = vmatpush1.bf16.msra.mxu1 %v6976_v61  ;;  %v1871_v61 = vld [vmem:[%s7760_s4 + $0x2f0] sm:$0xff]  ;;  %7932 = vst [vmem:[#allocation94_spill] sm:$0xff] %v7022_v1  ;;  %7937 = vst [vmem:[#allocation99_spill] sm:$0xff] %v7048_v29 }
 0x1df   :  { %2645 = vmatprep.subr.bf16.mxu0 %v6980_v25  ;;  %2686 = vmatprep.subr.bf16.mxu1 %v6982_v10  ;;  %v7028_v10 = vcombine.high %v1867_v42, %v1871_v61  ;;  %v7030_v25 = vcombine.high %v1868_v13, %v1872_v56  ;;  %v1875_v49 = vld [vmem:[%s7760_s4 + $0x310] sm:$0xff]  ;;  %v7046_v37 = vcombine.low %v1867_v42, %v1871_v61  ;;  %v1884_v42 = vld [vmem:[%s7760_s4 + $0x358] sm:$0xff] }
 0x1e0   :  { %v1888_v61 = vld [vmem:[%s7760_s4 + $0x378] sm:$0xff]  ;;  %v7072_v56 = vcombine.low %v1876_v52, %v1880_v26 }
 0x1e1   :  { %7934 = vst [vmem:[#allocation96_spill] sm:$0xff] %v7028_v10  ;;  %7935 = vst [vmem:[#allocation97_spill] sm:$0xff] %v7030_v25 }
 0x1e2   :  { %2646 = vmatpush1.bf16.msra.mxu0 %v6998_v35  ;;  %2687 = vmatpush1.bf16.msra.mxu1 %v7000_v0  ;;  %v1879_v0 = vld [vmem:[%s7760_s4 + $0x330] sm:$0xff]  ;;  %7936 = vst [vmem:[#allocation98_spill] sm:$0xff] %v7046_v37  ;;  %7941 = vst [vmem:[#allocation103_spill] sm:$0xff] %v7072_v56 }
 0x1e3   :  { %2647 = vmatprep.subr.bf16.mxu0 %v7004_v34  ;;  %2688 = vmatprep.subr.bf16.mxu1 %v7006_v21  ;;  %v7052_v21 = vcombine.high %v1875_v49, %v1879_v0  ;;  %v7054_v34 = vcombine.high %v1876_v52, %v1880_v26  ;;  %v1883_v35 = vld [vmem:[%s7760_s4 + $0x350] sm:$0xff]  ;;  %v7070_v13 = vcombine.low %v1875_v49, %v1879_v0  ;;  %v1892_v49 = vld [vmem:[%s7760_s4 + $0x398] sm:$0xff] }
 0x1e4   :  { %v1896_v0 = vld [vmem:[%s7760_s4 + $0x3b8] sm:$0xff]  ;;  %v7096_v26 = vcombine.low %v1884_v42, %v1888_v61 }
 0x1e5   :  { %7938 = vst [vmem:[#allocation100_spill] sm:$0xff] %v7052_v21  ;;  %7939 = vst [vmem:[#allocation101_spill] sm:$0xff] %v7054_v34 }
 0x1e6   :  { %2648 = vmatpush1.bf16.msra.mxu0 %v7022_v1  ;;  %2689 = vmatpush1.bf16.msra.mxu1 %v7024_v44  ;;  %v1887_v44 = vld [vmem:[%s7760_s4 + $0x370] sm:$0xff]  ;;  %7940 = vst [vmem:[#allocation102_spill] sm:$0xff] %v7070_v13 }
 0x1e7   :  { %2649 = vmatprep.subr.bf16.mxu0 %v7028_v10  ;;  %2690 = vmatprep.subr.bf16.mxu1 %v7030_v25  ;;  %v7076_v25 = vcombine.high %v1883_v35, %v1887_v44  ;;  %v7078_v10 = vcombine.high %v1884_v42, %v1888_v61  ;;  %v1891_v1 = vld [vmem:[%s7760_s4 + $0x390] sm:$0xff]  ;;  %v7094_v52 = vcombine.low %v1883_v35, %v1887_v44  ;;  %v1900_v35 = vld [vmem:[%s7760_s4 + $0x3d8] sm:$0xff] }
 0x1e8   :  { %v1904_v44 = vld [vmem:[%s7760_s4 + $0x3f8] sm:$0xff]  ;;  %v7120_v61 = vcombine.low %v1892_v49, %v1896_v0 }
 0x1e9   :  { %7942 = vst [vmem:[#allocation104_spill] sm:$0xff] %v7076_v25  ;;  %7943 = vst [vmem:[#allocation105_spill] sm:$0xff] %v7078_v10 }
 0x1ea   :  { %2650 = vmatpush1.bf16.msra.mxu0 %v7046_v37  ;;  %2691 = vmatpush1.bf16.msra.mxu1 %v7048_v29  ;;  %v1895_v29 = vld [vmem:[%s7760_s4 + $0x3b0] sm:$0xff]  ;;  %7944 = vst [vmem:[#allocation106_spill] sm:$0xff] %v7094_v52 }
 0x1eb   :  { %2651 = vmatprep.subr.bf16.mxu0 %v7052_v21  ;;  %2692 = vmatprep.subr.bf16.mxu1 %v7054_v34  ;;  %v7100_v34 = vcombine.high %v1891_v1, %v1895_v29  ;;  %v7102_v21 = vcombine.high %v1892_v49, %v1896_v0  ;;  %v1899_v37 = vld [vmem:[%s7760_s4 + $0x3d0] sm:$0xff]  ;;  %v7118_v42 = vcombine.low %v1891_v1, %v1895_v29  ;;  %v7976_v1 = vld [vmem:[#allocation62_spill] sm:$0xff]  ;;  %v7978_v29 = vld [vmem:[#allocation61_spill] sm:$0xff] }
 0x1ec   :  { %v7980_v49 = vld [vmem:[#allocation64_spill] sm:$0xff] }
 0x1ee   :  { %2652 = vmatpush1.bf16.msra.mxu0 %v7070_v13  ;;  %2693 = vmatpush1.bf16.msra.mxu1 %v7072_v56  ;;  %v1903_v56 = vld [vmem:[%s7760_s4 + $0x3f0] sm:$0xff] }
 0x1ef   :  { %2653 = vmatprep.subr.bf16.mxu0 %v7076_v25  ;;  %2694 = vmatprep.subr.bf16.mxu1 %v7078_v10  ;;  %v7124_v10 = vcombine.high %v1899_v37, %v1903_v56  ;;  %v7126_v25 = vcombine.high %v1900_v35, %v1904_v44  ;;  %v7130_v13 = vcombine.low %v1899_v37, %v1903_v56  ;;  %v7977_v37 = vld [vmem:[#allocation60_spill] sm:$0xff]  ;;  %v7979_v56 = vld [vmem:[#allocation63_spill] sm:$0xff] }
 0x1f2   :  { %2654 = vmatpush1.bf16.msra.mxu0 %v7094_v52  ;;  %2695 = vmatpush1.bf16.msra.mxu1 %v7096_v26  ;;  %v7132_v52 = vcombine.low %v1900_v35, %v1904_v44  ;;  %v7981_v44 = vld [vmem:[#allocation5_spill] sm:$0xff] }
 0x1f3   :  { %2655 = vmatprep.subr.bf16.mxu0 %v7100_v34  ;;  %2696 = vmatprep.subr.bf16.mxu1 %v7102_v21 }
 0x1f6   :  { %2656 = vmatpush1.bf16.msra.mxu0 %v7118_v42  ;;  %2697 = vmatpush1.bf16.msra.mxu1 %v7120_v61 }
 0x1f7   :  { %2657 = vmatprep.subr.bf16.mxu0 %v7124_v10  ;;  %2698 = vmatprep.subr.bf16.mxu1 %v7126_v25 }
 0x1fa   :  { %2658 = vmatpush1.bf16.msra.mxu0 %v7130_v13  ;;  %2699 = vmatpush1.bf16.msra.mxu1 %v7132_v52 }
 0x1fb   :  { %3565 = vmatprep.subr.bf16.mxu0 %v6216_v24  ;;  %3606 = vmatprep.subr.bf16.mxu1 %v6229_v28  ;;  %v7946_v24 = vld [vmem:[#allocation18_spill] sm:$0xff] }
 0x1fc   :  { %v7948_v28 = vld [vmem:[#allocation26_spill] sm:$0xff] }
 0x1fd   :  { %2660 = vmatmul.mubr.bf16.vlgmr.msra.gmra.mrb[28].mxu0 %v6784_v47  ;;  %2701 = vmatmul.mubr.bf16.vlgmr.msra.gmra.mrb[28].mxu1 %v6784_v47  ;;  %v7975_v47 = vld [vmem:[#allocation59_spill] sm:$0xff] }
 0x1fe   :  { %3566 = vmatpush1.bf16.msra.mxu0 %v6214_v23  ;;  %3607 = vmatpush1.bf16.msra.mxu1 %v6227_v27  ;;  %v7945_v23 = vld [vmem:[#allocation17_spill] sm:$0xff]  ;;  %v7947_v27 = vld [vmem:[#allocation22_spill] sm:$0xff] }
 0x1ff   :  { %3567 = vmatprep.subr.bf16.mxu0 %v6231_v30  ;;  %3608 = vmatprep.subr.bf16.mxu1 %v6243_v33  ;;  %v7949_v30 = vld [vmem:[#allocation24_spill] sm:$0xff]  ;;  %v7950_v33 = vld [vmem:[#allocation25_spill] sm:$0xff] }
 0x202   :  { %3568 = vmatpush1.bf16.msra.mxu0 %v6257_v3  ;;  %3609 = vmatpush1.bf16.msra.mxu1 %v6267_v40  ;;  %v7951_v3 = vld [vmem:[#allocation27_spill] sm:$0xff] }
 0x203   :  { %3569 = vmatprep.subr.bf16.mxu0 %v6269_v41  ;;  %3610 = vmatprep.subr.bf16.mxu1 %v6273_v43  ;;  %v7952_v40 = vld [vmem:[#allocation31_spill] sm:$0xff]  ;;  %v7953_v41 = vld [vmem:[#allocation29_spill] sm:$0xff]  ;;  %v7954_v43 = vld [vmem:[#allocation30_spill] sm:$0xff] }
 0x206   :  { %3570 = vmatpush1.bf16.msra.mxu0 %v6292_v50  ;;  %3611 = vmatpush1.bf16.msra.mxu1 %v6301_v53  ;;  %v7955_v50 = vld [vmem:[#allocation38_spill] sm:$0xff] }
 0x207   :  { %3571 = vmatprep.subr.bf16.mxu0 %v6303_v54  ;;  %3612 = vmatprep.subr.bf16.mxu1 %v6313_v58  ;;  %v7956_v53 = vld [vmem:[#allocation42_spill] sm:$0xff]  ;;  %v7957_v54 = vld [vmem:[#allocation40_spill] sm:$0xff]  ;;  %v7958_v58 = vld [vmem:[#allocation41_spill] sm:$0xff] }
 0x20a   :  { %3572 = vmatpush1.bf16.msra.mxu0 %v6336_v6  ;;  %3613 = vmatpush1.bf16.msra.mxu1 %v6338_v7  ;;  %v7959_v6 = vld [vmem:[#allocation43_spill] sm:$0xff]  ;;  %v7960_v7 = vld [vmem:[#allocation46_spill] sm:$0xff] }
 0x20b   :  { %3573 = vmatprep.subr.bf16.mxu0 %v6348_v12  ;;  %3614 = vmatprep.subr.bf16.mxu1 %v6354_v14  ;;  %v7961_v12 = vld [vmem:[#allocation44_spill] sm:$0xff]  ;;  %v7962_v14 = vld [vmem:[#allocation45_spill] sm:$0xff] }
 0x20e   :  { %3574 = vmatpush1.bf16.msra.mxu0 %v6369_v20  ;;  %3615 = vmatpush1.bf16.msra.mxu1 %v6373_v22  ;;  %v7963_v20 = vld [vmem:[#allocation47_spill] sm:$0xff]  ;;  %v7964_v22 = vld [vmem:[#allocation50_spill] sm:$0xff] }
 0x20f   :  { %3575 = vmatprep.subr.bf16.mxu0 %v6375_v45  ;;  %3616 = vmatprep.subr.bf16.mxu1 %v6381_v31  ;;  %v7965_v45 = vld [vmem:[#allocation48_spill] sm:$0xff]  ;;  %v7966_v31 = vld [vmem:[#allocation49_spill] sm:$0xff] }
 0x212   :  { %3576 = vmatpush1.bf16.msra.mxu0 %v6408_v59  ;;  %3617 = vmatpush1.bf16.msra.mxu1 %v6410_v60  ;;  %v7967_v59 = vld [vmem:[#allocation51_spill] sm:$0xff]  ;;  %v7968_v60 = vld [vmem:[#allocation54_spill] sm:$0xff] }
 0x213   :  { %3577 = vmatprep.subr.bf16.mxu0 %v6420_v4  ;;  %3618 = vmatprep.subr.bf16.mxu1 %v6426_v11  ;;  %v7970_v4 = vld [vmem:[#allocation53_spill] sm:$0xff]  ;;  %v7971_v11 = vld [vmem:[#allocation55_spill] sm:$0xff] }
 0x216   :  { %3578 = vmatpush1.bf16.msra.mxu0 %v6429_v15  ;;  %3619 = vmatpush1.bf16.msra.mxu1 %v6433_v16  ;;  %v7972_v15 = vld [vmem:[#allocation58_spill] sm:$0xff]  ;;  %v7973_v16 = vld [vmem:[#allocation56_spill] sm:$0xff] }
 0x217   :  { %3579 = vmatprep.subr.bf16.mxu0 %v6459_v19  ;;  %3620 = vmatprep.subr.bf16.mxu1 %v6475_v62  ;;  %v7969_v62 = vld [vmem:[#allocation52_spill] sm:$0xff]  ;;  %v7974_v19 = vld [vmem:[#allocation57_spill] sm:$0xff] }
 0x21a   :  { %3580 = vmatpush1.bf16.msra.mxu0 %v7945_v23  ;;  %3621 = vmatpush1.bf16.msra.mxu1 %v7946_v24  ;;  %v7982_v24 = vld [vmem:[#allocation7_spill] sm:$0xff] }
 0x21b   :  { %3581 = vmatprep.subr.bf16.mxu0 %v7947_v27  ;;  %3622 = vmatprep.subr.bf16.mxu1 %v7948_v28 }
 0x21e   :  { %3582 = vmatpush1.bf16.msra.mxu0 %v7949_v30  ;;  %3623 = vmatpush1.bf16.msra.mxu1 %v7950_v33  ;;  %v7983_v33 = vld [vmem:[#allocation6_spill] sm:$0xff] }
 0x21f   :  { %3583 = vmatprep.subr.bf16.mxu0 %v7951_v3  ;;  %3624 = vmatprep.subr.bf16.mxu1 %v7952_v40  ;;  %v7984_v40 = vld [vmem:[#allocation8_spill] sm:$0xff] }
 0x222   :  { %3584 = vmatpush1.bf16.msra.mxu0 %v7953_v41  ;;  %3625 = vmatpush1.bf16.msra.mxu1 %v7954_v43 }
 0x223   :  { %3585 = vmatprep.subr.bf16.mxu0 %v7955_v50  ;;  %3626 = vmatprep.subr.bf16.mxu1 %v7956_v53 }
 0x226   :  { %3586 = vmatpush1.bf16.msra.mxu0 %v7957_v54  ;;  %3627 = vmatpush1.bf16.msra.mxu1 %v7958_v58 }
 0x227   :  { %3587 = vmatprep.subr.bf16.mxu0 %v7959_v6  ;;  %3628 = vmatprep.subr.bf16.mxu1 %v7960_v7 }
 0x22a   :  { %3588 = vmatpush1.bf16.msra.mxu0 %v7961_v12  ;;  %3629 = vmatpush1.bf16.msra.mxu1 %v7962_v14  ;;  %v1754_v12 = vmul.f32 %v6763_v48, %v6754_v2 }
 0x22b   :  { %3589 = vmatprep.subr.bf16.mxu0 %v7963_v20  ;;  %3630 = vmatprep.subr.bf16.mxu1 %v7964_v22 }
 0x22e   :  { %3590 = vmatpush1.bf16.msra.mxu0 %v7965_v45  ;;  %3631 = vmatpush1.bf16.msra.mxu1 %v7966_v31 }
 0x22f   :  { %3591 = vmatprep.subr.bf16.mxu0 %v7967_v59  ;;  %3632 = vmatprep.subr.bf16.mxu1 %v7968_v60 }
 0x232   :  { %3592 = vmatpush1.bf16.msra.mxu0 %v7969_v62  ;;  %3633 = vmatpush1.bf16.msra.mxu1 %v7970_v4  ;;  %v7985_v62 = vld [vmem:[#allocation19_spill] sm:$0xff] }
 0x233   :  { %3593 = vmatprep.subr.bf16.mxu0 %v7971_v11  ;;  %3634 = vmatprep.subr.bf16.mxu1 %v7972_v15  ;;  %v7986_v11 = vld [vmem:[#allocation21_spill] sm:$0xff] }
 0x236   :  { %3594 = vmatpush1.bf16.msra.mxu0 %v7973_v16  ;;  %3635 = vmatpush1.bf16.msra.mxu1 %v7974_v19 }
 0x237   :  { %3595 = vmatprep.subr.bf16.mxu0 %v7975_v47  ;;  %3636 = vmatprep.subr.bf16.mxu1 %v7976_v1  ;;  %v7987_v47 = vld [vmem:[#allocation20_spill] sm:$0xff] }
 0x23a   :  { %3596 = vmatpush1.bf16.msra.mxu0 %v7977_v37  ;;  %3637 = vmatpush1.bf16.msra.mxu1 %v7978_v29  ;;  %v7988_v37 = vld [vmem:[#allocation23_spill] sm:$0xff] }
 0x23b   :  { %3647 = vmatprep.subr.bf16.mxu0 %v7979_v56  ;;  %3688 = vmatprep.subr.bf16.mxu1 %v7980_v49 }
 0x290   :  { %v2579_v0 = vpop.f32.mrb[24].mxu0  ;;  %v2620_v35 = vpop.f32.mrb[24].mxu1 }
 0x291   :  { %v2709_v23 = vadd.f32 %v2579_v0, %v7981_v44  ;;  %v2711_v27 = vadd.f32 %v2620_v35, %v7982_v24  ;;  %v2581_v28 = vpop.f32.mrb[25].mxu0  ;;  %v2622_v30 = vpop.f32.mrb[25].mxu1 }
 0x292   :  { %v2710_v3 = vadd.f32 %v2581_v28, %v7983_v33  ;;  %v2712_v41 = vadd.f32 %v2622_v30, %v7984_v40  ;;  %v2583_v43 = vpop.f32.mrb[26].mxu0  ;;  %v2624_v50 = vpop.f32.mrb[26].mxu1 }
 0x293   :  { %v2584_v53 = vpop.f32.mrb[27].mxu0  ;;  %v2625_v54 = vpop.f32.mrb[27].mxu1  ;;  %v2725_v22 = vmul.f32 0.5, %v2711_v27  ;;  %v2717_v45 = vmul.f32 0.5, %v2709_v23 }
 0x294   :  { %v2726_v58 = vmul.f32 0.5, %v2712_v41  ;;  %v2718_v31 = vmul.f32 0.5, %v2710_v3 }
 0x296   :  { %5489 = vtanh.f32 %v2726_v58 }
 0x297   :  { %5491 = vtanh.f32 %v2725_v22 }
 0x298   :  { %5493 = vtanh.f32 %v2717_v45  ;;  %v5461_v45 = vunpack.i.h.bf16 %v6760_v17 }
 0x299   :  { %5495 = vtanh.f32 %v2718_v31 }
 0x2a0   :  { %v5490_v6 = vpop.eup %5489 }
 0x2a1   :  { %v2730_v7 = vmul.f32 0.5, %v5490_v6  ;;  %v5492_v56 = vpop.eup %5491 }
 0x2a2   :  { %v5494_v35 = vpop.eup %5493  ;;  %v2729_v23 = vmul.f32 0.5, %v5492_v56  ;;  %v8008_v56 = vld [vmem:[#allocation85_spill] sm:$0xff] }
 0x2a3   :  { %v2732_v14 = vadd.f32 0.5, %v2730_v7  ;;  %v5496_v44 = vpop.eup %5495  ;;  %v2721_v28 = vmul.f32 0.5, %v5494_v35  ;;  %v8011_v35 = vld [vmem:[#allocation88_spill] sm:$0xff] }
 0x2a4   :  { %v2722_v30 = vmul.f32 0.5, %v5496_v44  ;;  %v2731_v33 = vadd.f32 0.5, %v2729_v23  ;;  %v8012_v44 = vld [vmem:[#allocation89_spill] sm:$0xff]  ;;  %v8013_v23 = vld [vmem:[#allocation90_spill] sm:$0xff] }
 0x2a5   :  { %v2744_v20 = vmul.f32 %v2732_v14, %v1754_v12  ;;  %v2723_v3 = vadd.f32 0.5, %v2721_v28  ;;  %v8016_v28 = vld [vmem:[#allocation93_spill] sm:$0xff] }
 0x2a6   :  { %v2724_v41 = vadd.f32 0.5, %v2722_v30  ;;  %v2743_v50 = vmul.f32 %v2731_v33, %v6752_v9  ;;  %v8017_v30 = vld [vmem:[#allocation94_spill] sm:$0xff]  ;;  %v8018_v33 = vld [vmem:[#allocation95_spill] sm:$0xff] }
 0x2d0   :  { %v2661_v59 = vpop.f32.mrb[28].mxu0  ;;  %v2702_v60 = vpop.f32.mrb[28].mxu1 }
 0x2d1   :  { %v2713_v4 = vadd.f32 %v2661_v59, %v7985_v62  ;;  %v2715_v15 = vadd.f32 %v2702_v60, %v7986_v11  ;;  %v2663_v16 = vpop.f32.mrb[29].mxu0  ;;  %v2704_v19 = vpop.f32.mrb[29].mxu1 }
 0x2d2   :  { %v2714_v1 = vadd.f32 %v2663_v16, %v7987_v47  ;;  %v2716_v2 = vadd.f32 %v2704_v19, %v7988_v37  ;;  %v2665_v48 = vpop.f32.mrb[30].mxu0  ;;  %v2706_v29 = vpop.f32.mrb[30].mxu1  ;;  %v8001_v19 = vld [vmem:[#allocation78_spill] sm:$0xff]  ;;  %v8002_v47 = vld [vmem:[#allocation79_spill] sm:$0xff]  ;;  %v8004_v37 = vld [vmem:[#allocation81_spill] sm:$0xff] }
 0x2d3   :  { %5497 = vtanh.f32 %v2713_v4  ;;  %v2666_v49 = vpop.f32.mrb[31].mxu0  ;;  %v2707_v0 = vpop.f32.mrb[31].mxu1  ;;  %v2735_v24 = vmul.f32 0.5, %v2715_v15  ;;  %v8006_v48 = vld [vmem:[#allocation83_spill] sm:$0xff]  ;;  %v8007_v29 = vld [vmem:[#allocation84_spill] sm:$0xff] }
 0x2d4   :  { %5499 = vtanh.f32 %v2714_v1  ;;  %v2736_v27 = vmul.f32 0.5, %v2716_v2  ;;  %v7224_v11 = vpop.permute.xlu0 %2765  ;;  %v8003_v1 = vld [vmem:[#allocation80_spill] sm:$0xff]  ;;  %v8005_v2 = vld [vmem:[#allocation82_spill] sm:$0xff]  ;;  %v8010_v0 = vld [vmem:[#allocation87_spill] sm:$0xff] }
 0x2d5   :  { %5501 = vtanh.f32 %v2735_v24  ;;  %v8009_v49 = vld [vmem:[#allocation86_spill] sm:$0xff]  ;;  %v8014_v24 = vld [vmem:[#allocation91_spill] sm:$0xff] }
 0x2d6   :  { %5503 = vtanh.f32 %v2736_v27  ;;  %v8015_v27 = vld [vmem:[#allocation92_spill] sm:$0xff] }
 0x2dd   :  { %v5498_v40 = vpop.eup %5497 }
 0x2de   :  { %v5500_v43 = vpop.eup %5499  ;;  %v2745_v53 = vmul.f32 %v5498_v40, %v2723_v3  ;;  %v8019_v3 = vld [vmem:[#allocation96_spill] sm:$0xff]  ;;  %v8020_v40 = vld [vmem:[#allocation97_spill] sm:$0xff] }
 0x2df   :  { %v2746_v54 = vmul.f32 %v5500_v43, %v2724_v41  ;;  %v5502_v7 = vpop.eup %5501  ;;  %v8021_v41 = vld [vmem:[#allocation98_spill] sm:$0xff]  ;;  %v8022_v43 = vld [vmem:[#allocation99_spill] sm:$0xff] }
 0x2e0   :  { %v7217_v58 = vadd.f32 %v2745_v53, %v2743_v50  ;;  %v5504_v12 = vpop.eup %5503  ;;  %v2739_v14 = vmul.f32 0.5, %v5502_v7  ;;  %v8023_v50 = vld [vmem:[#allocation100_spill] sm:$0xff]  ;;  %v8024_v53 = vld [vmem:[#allocation101_spill] sm:$0xff]  ;;  %v8026_v7 = vld [vmem:[#allocation103_spill] sm:$0xff] }
 0x2e1   :  { %v7219_v6 = vadd.f32 %v2746_v54, %v2744_v20  ;;  %v2740_v22 = vmul.f32 0.5, %v5504_v12  ;;  %v8025_v54 = vld [vmem:[#allocation102_spill] sm:$0xff]  ;;  %v8027_v12 = vld [vmem:[#allocation104_spill] sm:$0xff] }
 0x2e2   :  { %5505 = vtanh.f32 %v7217_v58  ;;  %v2741_v31 = vadd.f32 0.5, %v2739_v14  ;;  %v8028_v14 = vld [vmem:[#allocation105_spill] sm:$0xff] }
 0x2e3   :  { %5507 = vtanh.f32 %v7219_v6  ;;  %v2742_v60 = vadd.f32 0.5, %v2740_v22  ;;  %v8029_v22 = vld [vmem:[#allocation106_spill] sm:$0xff] }
 0x2ec   :  { %v5506_v59 = vpop.eup %5505 }
 0x2ed   :  { %v5508_v9 = vpop.eup %5507  ;;  %v2751_v62 = vmul.f32 %v5506_v59, %v2741_v31  ;;  %v3826_v59 = vld [vmem:[%s7760_s4 + $0x48] sm:$0xff] }
 0x2ee   :  { %v2752_v4 = vmul.f32 %v5508_v9, %v2742_v60  ;;  %v3830_v60 = vld [vmem:[%s7760_s4 + $0x68] sm:$0xff]  ;;  %v3833_v9 = vld [vmem:[%s7760_s4 + $0x80] sm:$0xff] }
 0x2ef   :  { %v2779_v20 = vmul.f32 %v5461_v45, %v2751_v62  ;;  %v7233_v16 = vpack.c.bf16 %v2751_v62, %v2751_v62  ;;  %v5332_v62 = vcombine.high %v3826_v59, %v3830_v60 }
 0x2f0   :  { %v2771_v15 = vmul.f32 %v7224_v11, %v2752_v4  ;;  %v3837_v4 = vld [vmem:[%s7760_s4 + $0xa0] sm:$0xff] }
 0x2f1   :  { %5187 = vst [vmem:[%s7763_s5 + $0x8] sm:$0xff] %v2779_v20  ;;  %v3834_v20 = vld [vmem:[%s7760_s4 + $0x88] sm:$0xff] }
 0x2f2   :  { %5188 = vst [vmem:[%s7764_s6 + $0x10] sm:$0xff] %v2771_v15  ;;  %v2796_v17 = vpack.c.bf16 %v2771_v15, %v2771_v15  ;;  %v3838_v15 = vld [vmem:[%s7760_s4 + $0xa8] sm:$0xff] }
 0x2f4   :  { %3597 = vmatprep.mubr.bf16.mxu0 %v2796_v17  ;;  %3638 = vmatprep.mubr.bf16.mxu1 %v2796_v17 }
 0x2f5   :  { %3598 = vmatmul.mubr.bf16.vlgmr.msra.gmra.mrb[32].mxu0 %v7233_v16  ;;  %3639 = vmatmul.mubr.bf16.vlgmr.msra.gmra.mrb[32].mxu1 %v7233_v16 }
 0x2f6   :  { %3648 = vmatpush1.bf16.msra.mxu0 %v6723_v32  ;;  %3689 = vmatpush1.bf16.msra.mxu1 %v6730_v8  ;;  %v7989_v8 = vld [vmem:[#allocation66_spill] sm:$0xff]  ;;  %v7990_v32 = vld [vmem:[#allocation67_spill] sm:$0xff] }
 0x2f7   :  { %3679 = vmatprep.mubr.bf16.mxu0 %v2796_v17  ;;  %3720 = vmatprep.mubr.bf16.mxu1 %v2796_v17 }
 0x2f8   :  { %3649 = vmatprep.subr.bf16.mxu0 %v6789_v51  ;;  %3690 = vmatprep.subr.bf16.mxu1 %v6791_v55  ;;  %v7991_v51 = vld [vmem:[#allocation68_spill] sm:$0xff]  ;;  %v7992_v55 = vld [vmem:[#allocation69_spill] sm:$0xff] }
 0x2fa   :  { %3650 = vmatpush1.bf16.msra.mxu0 %v6806_v57  ;;  %3691 = vmatpush1.bf16.msra.mxu1 %v6808_v63  ;;  %v7993_v57 = vld [vmem:[#allocation70_spill] sm:$0xff]  ;;  %v7994_v63 = vld [vmem:[#allocation71_spill] sm:$0xff] }
 0x2fb   :  { %3651 = vmatprep.subr.bf16.mxu0 %v6810_v38  ;;  %3692 = vmatprep.subr.bf16.mxu1 %v6812_v5  ;;  %v7995_v38 = vld [vmem:[#allocation72_spill] sm:$0xff]  ;;  %v7996_v5 = vld [vmem:[#allocation73_spill] sm:$0xff] }
 0x2fe   :  { %3652 = vmatpush1.bf16.msra.mxu0 %v6830_v39  ;;  %3693 = vmatpush1.bf16.msra.mxu1 %v6832_v36  ;;  %v7997_v39 = vld [vmem:[#allocation74_spill] sm:$0xff]  ;;  %v7998_v36 = vld [vmem:[#allocation75_spill] sm:$0xff] }
 0x2ff   :  { %3653 = vmatprep.subr.bf16.mxu0 %v6836_v46  ;;  %3694 = vmatprep.subr.bf16.mxu1 %v6838_v18  ;;  %v7999_v46 = vld [vmem:[#allocation76_spill] sm:$0xff]  ;;  %v8000_v18 = vld [vmem:[#allocation77_spill] sm:$0xff] }
 0x302   :  { %3654 = vmatpush1.bf16.msra.mxu0 %v7989_v8  ;;  %3695 = vmatpush1.bf16.msra.mxu1 %v7990_v32  ;;  %v5338_v8 = vcombine.high %v3833_v9, %v3837_v4  ;;  %v5340_v32 = vcombine.high %v3834_v20, %v3838_v15 }
 0x303   :  { %3655 = vmatprep.subr.bf16.mxu0 %v7991_v51  ;;  %3696 = vmatprep.subr.bf16.mxu1 %v7992_v55  ;;  %v3841_v51 = vld [vmem:[%s7760_s4 + $0xc0] sm:$0xff] }
 0x304   :  { %v3845_v55 = vld [vmem:[%s7760_s4 + $0xe0] sm:$0xff] }
 0x306   :  { %3656 = vmatpush1.bf16.msra.mxu0 %v7993_v57  ;;  %3697 = vmatpush1.bf16.msra.mxu1 %v7994_v63  ;;  %v3842_v57 = vld [vmem:[%s7760_s4 + $0xc8] sm:$0xff] }
 0x307   :  { %3657 = vmatprep.subr.bf16.mxu0 %v7995_v38  ;;  %3698 = vmatprep.subr.bf16.mxu1 %v7996_v5  ;;  %v3846_v63 = vld [vmem:[%s7760_s4 + $0xe8] sm:$0xff]  ;;  %v5337_v38 = vcombine.low %v3833_v9, %v3837_v4  ;;  %v5339_v5 = vcombine.low %v3834_v20, %v3838_v15 }
 0x308   :  { %v3890_v9 = vld [vmem:[%s7760_s4 + $0x248] sm:$0xff] }
 0x309   :  { %v3894_v4 = vld [vmem:[%s7760_s4 + $0x268] sm:$0xff] }
 0x30a   :  { %3658 = vmatpush1.bf16.msra.mxu0 %v7997_v39  ;;  %3699 = vmatpush1.bf16.msra.mxu1 %v7998_v36  ;;  %v5346_v39 = vcombine.high %v3841_v51, %v3845_v55  ;;  %v5348_v36 = vcombine.high %v3842_v57, %v3846_v63  ;;  %v5395_v15 = vcombine.low %v3890_v9, %v3894_v4 }
 0x30b   :  { %3659 = vmatprep.subr.bf16.mxu0 %v7999_v46  ;;  %3700 = vmatprep.subr.bf16.mxu1 %v8000_v18  ;;  %v3849_v46 = vld [vmem:[%s7760_s4 + $0x100] sm:$0xff] }
 0x30c   :  { %v3853_v18 = vld [vmem:[%s7760_s4 + $0x120] sm:$0xff] }
 0x30e   :  { %3660 = vmatpush1.bf16.msra.mxu0 %v8001_v19  ;;  %3701 = vmatpush1.bf16.msra.mxu1 %v8002_v47  ;;  %v3850_v19 = vld [vmem:[%s7760_s4 + $0x108] sm:$0xff] }
 0x30f   :  { %3661 = vmatprep.subr.bf16.mxu0 %v8003_v1  ;;  %3702 = vmatprep.subr.bf16.mxu1 %v8004_v37  ;;  %v3854_v47 = vld [vmem:[%s7760_s4 + $0x128] sm:$0xff]  ;;  %v5345_v1 = vcombine.low %v3841_v51, %v3845_v55  ;;  %v5347_v37 = vcombine.low %v3842_v57, %v3846_v63 }
 0x310   :  { %v3902_v55 = vld [vmem:[%s7760_s4 + $0x2a8] sm:$0xff] }
 0x312   :  { %3662 = vmatpush1.bf16.msra.mxu0 %v8005_v2  ;;  %3703 = vmatpush1.bf16.msra.mxu1 %v8006_v48  ;;  %v5354_v2 = vcombine.high %v3849_v46, %v3853_v18  ;;  %v5356_v48 = vcombine.high %v3850_v19, %v3854_v47 }
 0x313   :  { %3663 = vmatprep.subr.bf16.mxu0 %v8007_v29  ;;  %3704 = vmatprep.subr.bf16.mxu1 %v8008_v56  ;;  %v3857_v29 = vld [vmem:[%s7760_s4 + $0x140] sm:$0xff] }
 0x314   :  { %v3861_v56 = vld [vmem:[%s7760_s4 + $0x160] sm:$0xff] }
 0x316   :  { %3664 = vmatpush1.bf16.msra.mxu0 %v8009_v49  ;;  %3705 = vmatpush1.bf16.msra.mxu1 %v8010_v0  ;;  %v3858_v49 = vld [vmem:[%s7760_s4 + $0x148] sm:$0xff] }
 0x317   :  { %3665 = vmatprep.subr.bf16.mxu0 %v8011_v35  ;;  %3706 = vmatprep.subr.bf16.mxu1 %v8012_v44  ;;  %v3862_v0 = vld [vmem:[%s7760_s4 + $0x168] sm:$0xff]  ;;  %v5353_v35 = vcombine.low %v3849_v46, %v3853_v18  ;;  %v5355_v44 = vcombine.low %v3850_v19, %v3854_v47 }
 0x318   :  { %v3910_v18 = vld [vmem:[%s7760_s4 + $0x2e8] sm:$0xff] }
 0x31a   :  { %3666 = vmatpush1.bf16.msra.mxu0 %v8013_v23  ;;  %3707 = vmatpush1.bf16.msra.mxu1 %v8014_v24  ;;  %v5362_v23 = vcombine.high %v3857_v29, %v3861_v56  ;;  %v5364_v24 = vcombine.high %v3858_v49, %v3862_v0 }
 0x31b   :  { %3667 = vmatprep.subr.bf16.mxu0 %v8015_v27  ;;  %3708 = vmatprep.subr.bf16.mxu1 %v8016_v28  ;;  %v3865_v27 = vld [vmem:[%s7760_s4 + $0x180] sm:$0xff] }
 0x31c   :  { %v3869_v28 = vld [vmem:[%s7760_s4 + $0x1a0] sm:$0xff] }
 0x31e   :  { %3668 = vmatpush1.bf16.msra.mxu0 %v8017_v30  ;;  %3709 = vmatpush1.bf16.msra.mxu1 %v8018_v33  ;;  %v3866_v30 = vld [vmem:[%s7760_s4 + $0x188] sm:$0xff] }
 0x31f   :  { %3669 = vmatprep.subr.bf16.mxu0 %v8019_v3  ;;  %3710 = vmatprep.subr.bf16.mxu1 %v8020_v40  ;;  %v3870_v33 = vld [vmem:[%s7760_s4 + $0x1a8] sm:$0xff]  ;;  %v5361_v3 = vcombine.low %v3857_v29, %v3861_v56  ;;  %v5363_v40 = vcombine.low %v3858_v49, %v3862_v0 }
 0x320   :  { %v3918_v56 = vld [vmem:[%s7760_s4 + $0x328] sm:$0xff] }
 0x322   :  { %3670 = vmatpush1.bf16.msra.mxu0 %v8021_v41  ;;  %3711 = vmatpush1.bf16.msra.mxu1 %v8022_v43  ;;  %v5370_v41 = vcombine.high %v3865_v27, %v3869_v28  ;;  %v5372_v43 = vcombine.high %v3866_v30, %v3870_v33 }
 0x323   :  { %3671 = vmatprep.subr.bf16.mxu0 %v8023_v50  ;;  %3712 = vmatprep.subr.bf16.mxu1 %v8024_v53  ;;  %v5369_v50 = vcombine.low %v3865_v27, %v3869_v28  ;;  %v5371_v53 = vcombine.low %v3866_v30, %v3870_v33  ;;  %v3926_v28 = vld [vmem:[%s7760_s4 + $0x368] sm:$0xff] }
 0x326   :  { %3672 = vmatpush1.bf16.msra.mxu0 %v8025_v54  ;;  %3713 = vmatpush1.bf16.msra.mxu1 %v8026_v7  ;;  %v3873_v54 = vld [vmem:[%s7760_s4 + $0x1c0] sm:$0xff] }
 0x327   :  { %3673 = vmatprep.subr.bf16.mxu0 %v8027_v12  ;;  %3714 = vmatprep.subr.bf16.mxu1 %v8028_v14  ;;  %v3877_v7 = vld [vmem:[%s7760_s4 + $0x1e0] sm:$0xff]  ;;  %v3874_v12 = vld [vmem:[%s7760_s4 + $0x1c8] sm:$0xff] }
 0x328   :  { %v5378_v14 = vcombine.high %v3873_v54, %v3877_v7 }
 0x32a   :  { %3674 = vmatpush1.bf16.msra.mxu0 %v8029_v22  ;;  %3715 = vmatpush1.bf16.msra.mxu1 %v7096_v26  ;;  %v3825_v26 = vld [vmem:[%s7760_s4 + $0x40] sm:$0xff]  ;;  %v3878_v22 = vld [vmem:[%s7760_s4 + $0x1e8] sm:$0xff] }
 0x32b   :  { %3675 = vmatprep.subr.bf16.mxu0 %v7100_v34  ;;  %3716 = vmatprep.subr.bf16.mxu1 %v7102_v21  ;;  %v3817_v21 = vld [vmem:[%s7760_s4] sm:$0xff] }
 0x32c   :  { %v3821_v34 = vld [vmem:[%s7760_s4 + $0x20] sm:$0xff] }
 0x32e   :  { %3676 = vmatpush1.bf16.msra.mxu0 %v7118_v42  ;;  %3717 = vmatpush1.bf16.msra.mxu1 %v7120_v61  ;;  %v3829_v42 = vld [vmem:[%s7760_s4 + $0x60] sm:$0xff] }
 0x32f   :  { %3677 = vmatprep.subr.bf16.mxu0 %v7124_v10  ;;  %3718 = vmatprep.subr.bf16.mxu1 %v7126_v25  ;;  %v3818_v25 = vld [vmem:[%s7760_s4 + $0x8] sm:$0xff]  ;;  %v5321_v10 = vcombine.low %v3817_v21, %v3821_v34  ;;  %v5330_v31 = vcombine.high %v3825_v26, %v3829_v42  ;;  %v5329_v17 = vcombine.low %v3825_v26, %v3829_v42 }
 0x330   :  { %v3886_v42 = vld [vmem:[%s7760_s4 + $0x228] sm:$0xff] }
 0x332   :  { %3678 = vmatpush1.bf16.msra.mxu0 %v7130_v13  ;;  %3719 = vmatpush1.bf16.msra.mxu1 %v7132_v52  ;;  %v5322_v13 = vcombine.high %v3817_v21, %v3821_v34  ;;  %v3822_v52 = vld [vmem:[%s7760_s4 + $0x28] sm:$0xff]  ;;  %v5377_v21 = vcombine.low %v3873_v54, %v3877_v7  ;;  %v5379_v34 = vcombine.low %v3874_v12, %v3878_v22 }
 0x333   :  { %v5323_v61 = vcombine.low %v3818_v25, %v3822_v52  ;;  %v5324_v45 = vcombine.high %v3818_v25, %v3822_v52  ;;  %v5380_v25 = vcombine.high %v3874_v12, %v3878_v22  ;;  %v3882_v52 = vld [vmem:[%s7760_s4 + $0x208] sm:$0xff]  ;;  %v3941_v22 = vld [vmem:[%s7760_s4 + $0x3e0] sm:$0xff] }
 0x334   :  { %4585 = vmatprep.subr.bf16.mxu0 %v5322_v13  ;;  %v3885_v13 = vld [vmem:[%s7760_s4 + $0x220] sm:$0xff] }
 0x335   :  { %3680 = vmatmul.mubr.bf16.vlgmr.msra.gmra.mrb[36].mxu0 %v7233_v16  ;;  %3721 = vmatmul.mubr.bf16.vlgmr.msra.gmra.mrb[36].mxu1 %v7233_v16  ;;  %v5331_v16 = vcombine.low %v3826_v59, %v3830_v60  ;;  %v3889_v59 = vld [vmem:[%s7760_s4 + $0x240] sm:$0xff] }
 0x336   :  { %4626 = vmatprep.subr.bf16.mxu1 %v5324_v45  ;;  %4586 = vmatpush1.bf16.msra.mxu0 %v5321_v10  ;;  %v3881_v10 = vld [vmem:[%s7760_s4 + $0x200] sm:$0xff]  ;;  %v5387_v45 = vcombine.low %v3882_v52, %v3886_v42 }
 0x337   :  { %4627 = vmatpush1.bf16.msra.mxu1 %v5323_v61  ;;  %4587 = vmatprep.subr.bf16.mxu0 %v5330_v31  ;;  %v5386_v26 = vcombine.high %v3881_v10, %v3885_v13  ;;  %v5385_v61 = vcombine.low %v3881_v10, %v3885_v13  ;;  %v5388_v31 = vcombine.high %v3882_v52, %v3886_v42  ;;  %v3893_v60 = vld [vmem:[%s7760_s4 + $0x260] sm:$0xff]  ;;  %v7501_v42 = vld [vmem:[%s7760_s4 + $0x30] sm:$0xff] }
 0x338   :  { %4628 = vmatprep.subr.bf16.mxu1 %v5332_v62  ;;  %v5394_v62 = vcombine.high %v3889_v59, %v3893_v60  ;;  %v5393_v20 = vcombine.low %v3889_v59, %v3893_v60 }
 0x33a   :  { %4588 = vmatpush1.bf16.msra.mxu0 %v5329_v17  ;;  %v5396_v17 = vcombine.high %v3890_v9, %v3894_v4 }
 0x33b   :  { %4629 = vmatpush1.bf16.msra.mxu1 %v5331_v16  ;;  %4589 = vmatprep.subr.bf16.mxu0 %v5338_v8  ;;  %v3897_v16 = vld [vmem:[%s7760_s4 + $0x280] sm:$0xff] }
 0x33c   :  { %4630 = vmatprep.subr.bf16.mxu1 %v5340_v32  ;;  %v3901_v8 = vld [vmem:[%s7760_s4 + $0x2a0] sm:$0xff]  ;;  %v3898_v32 = vld [vmem:[%s7760_s4 + $0x288] sm:$0xff] }
 0x33d   :  { %v5402_v51 = vcombine.high %v3897_v16, %v3901_v8  ;;  %v5401_v57 = vcombine.low %v3897_v16, %v3901_v8  ;;  %v5403_v63 = vcombine.low %v3898_v32, %v3902_v55 }
 0x33e   :  { %4590 = vmatpush1.bf16.msra.mxu0 %v5337_v38  ;;  %v5404_v38 = vcombine.high %v3898_v32, %v3902_v55 }
 0x33f   :  { %4631 = vmatpush1.bf16.msra.mxu1 %v5339_v5  ;;  %4591 = vmatprep.subr.bf16.mxu0 %v5346_v39  ;;  %v3905_v5 = vld [vmem:[%s7760_s4 + $0x2c0] sm:$0xff] }
 0x340   :  { %4632 = vmatprep.subr.bf16.mxu1 %v5348_v36  ;;  %v3909_v39 = vld [vmem:[%s7760_s4 + $0x2e0] sm:$0xff]  ;;  %v3906_v36 = vld [vmem:[%s7760_s4 + $0x2c8] sm:$0xff] }
 0x341   :  { %v5410_v46 = vcombine.high %v3905_v5, %v3909_v39  ;;  %v5409_v19 = vcombine.low %v3905_v5, %v3909_v39  ;;  %v5411_v47 = vcombine.low %v3906_v36, %v3910_v18 }
 0x342   :  { %4592 = vmatpush1.bf16.msra.mxu0 %v5345_v1  ;;  %v5412_v1 = vcombine.high %v3906_v36, %v3910_v18 }
 0x343   :  { %4633 = vmatpush1.bf16.msra.mxu1 %v5347_v37  ;;  %4593 = vmatprep.subr.bf16.mxu0 %v5354_v2  ;;  %v3913_v37 = vld [vmem:[%s7760_s4 + $0x300] sm:$0xff] }
 0x344   :  { %4634 = vmatprep.subr.bf16.mxu1 %v5356_v48  ;;  %v3917_v2 = vld [vmem:[%s7760_s4 + $0x320] sm:$0xff]  ;;  %v3914_v48 = vld [vmem:[%s7760_s4 + $0x308] sm:$0xff] }
 0x345   :  { %v5418_v29 = vcombine.high %v3913_v37, %v3917_v2  ;;  %v5417_v49 = vcombine.low %v3913_v37, %v3917_v2  ;;  %v5419_v0 = vcombine.low %v3914_v48, %v3918_v56 }
 0x346   :  { %4594 = vmatpush1.bf16.msra.mxu0 %v5353_v35  ;;  %v5420_v35 = vcombine.high %v3914_v48, %v3918_v56 }
 0x347   :  { %4635 = vmatpush1.bf16.msra.mxu1 %v5355_v44  ;;  %4595 = vmatprep.subr.bf16.mxu0 %v5362_v23  ;;  %v3921_v44 = vld [vmem:[%s7760_s4 + $0x340] sm:$0xff] }
 0x348   :  { %4636 = vmatprep.subr.bf16.mxu1 %v5364_v24  ;;  %v3925_v23 = vld [vmem:[%s7760_s4 + $0x360] sm:$0xff]  ;;  %v3922_v24 = vld [vmem:[%s7760_s4 + $0x348] sm:$0xff] }
 0x349   :  { %v5426_v27 = vcombine.high %v3921_v44, %v3925_v23  ;;  %v5425_v30 = vcombine.low %v3921_v44, %v3925_v23  ;;  %v5427_v33 = vcombine.low %v3922_v24, %v3926_v28  ;;  %v8035_v44 = vld [vmem:[#allocation33_spill] sm:$0xff] }
 0x34a   :  { %4596 = vmatpush1.bf16.msra.mxu0 %v5361_v3  ;;  %v5428_v3 = vcombine.high %v3922_v24, %v3926_v28  ;;  %v8036_v28 = vld [vmem:[#allocation32_spill] sm:$0xff] }
 0x34b   :  { %4637 = vmatpush1.bf16.msra.mxu1 %v5363_v40  ;;  %4597 = vmatprep.subr.bf16.mxu0 %v5370_v41  ;;  %v3929_v40 = vld [vmem:[%s7760_s4 + $0x380] sm:$0xff] }
 0x34c   :  { %4638 = vmatprep.subr.bf16.mxu1 %v5372_v43  ;;  %v3933_v41 = vld [vmem:[%s7760_s4 + $0x3a0] sm:$0xff]  ;;  %v3930_v43 = vld [vmem:[%s7760_s4 + $0x388] sm:$0xff] }
 0x34d   :  { %v5433_v54 = vcombine.low %v3929_v40, %v3933_v41 }
 0x34e   :  { %4598 = vmatpush1.bf16.msra.mxu0 %v5369_v50  ;;  %v5434_v50 = vcombine.high %v3929_v40, %v3933_v41 }
 0x34f   :  { %4639 = vmatpush1.bf16.msra.mxu1 %v5371_v53  ;;  %4599 = vmatprep.subr.bf16.mxu0 %v5378_v14  ;;  %v3934_v53 = vld [vmem:[%s7760_s4 + $0x3a8] sm:$0xff]  ;;  %v3937_v14 = vld [vmem:[%s7760_s4 + $0x3c0] sm:$0xff] }
 0x350   :  { %4640 = vmatprep.subr.bf16.mxu1 %v5380_v25  ;;  %v5435_v7 = vcombine.low %v3930_v43, %v3934_v53  ;;  %v5436_v12 = vcombine.high %v3930_v43, %v3934_v53  ;;  %v3942_v25 = vld [vmem:[%s7760_s4 + $0x3e8] sm:$0xff]  ;;  %v5441_v10 = vcombine.low %v3937_v14, %v3941_v22 }
 0x352   :  { %4600 = vmatpush1.bf16.msra.mxu0 %v5377_v21  ;;  %v3938_v21 = vld [vmem:[%s7760_s4 + $0x3c8] sm:$0xff] }
 0x353   :  { %4641 = vmatpush1.bf16.msra.mxu1 %v5379_v34  ;;  %4601 = vmatprep.subr.bf16.mxu0 %v5386_v26  ;;  %v5442_v34 = vcombine.high %v3937_v14, %v3941_v22  ;;  %v5443_v13 = vcombine.low %v3938_v21, %v3942_v25  ;;  %v5444_v52 = vcombine.high %v3938_v21, %v3942_v25  ;;  %v7496_v26 = vld [vmem:[%s7760_s4 + $0x10] sm:$0xff] }
 0x354   :  { %4642 = vmatprep.subr.bf16.mxu1 %v5388_v31  ;;  %v7513_v31 = vld [vmem:[%s7760_s4 + $0x38] sm:$0xff]  ;;  %v5325_v59 = vcombine.low %v7496_v26, %v7501_v42 }
 0x356   :  { %4602 = vmatpush1.bf16.msra.mxu0 %v5385_v61  ;;  %v7506_v61 = vld [vmem:[%s7760_s4 + $0x18] sm:$0xff] }
 0x357   :  { %4643 = vmatpush1.bf16.msra.mxu1 %v5387_v45  ;;  %4603 = vmatprep.subr.bf16.mxu0 %v5394_v62  ;;  %v5326_v45 = vcombine.high %v7496_v26, %v7501_v42  ;;  %v5327_v60 = vcombine.low %v7506_v61, %v7513_v31  ;;  %v5328_v9 = vcombine.high %v7506_v61, %v7513_v31  ;;  %v3847_v26 = vld [vmem:[%s7760_s4 + $0xf0] sm:$0xff]  ;;  %v3844_v42 = vld [vmem:[%s7760_s4 + $0xd8] sm:$0xff] }
 0x358   :  { %4644 = vmatprep.subr.bf16.mxu1 %v5396_v17  ;;  %v8031_v17 = vld [vmem:[#allocation11_spill] sm:$0xff]  ;;  %v3848_v61 = vld [vmem:[%s7760_s4 + $0xf8] sm:$0xff] }
 0x35a   :  { %4604 = vmatpush1.bf16.msra.mxu0 %v5393_v20  ;;  %v8030_v20 = vld [vmem:[#allocation9_spill] sm:$0xff] }
 0x35b   :  { %4645 = vmatpush1.bf16.msra.mxu1 %v5395_v15  ;;  %4605 = vmatprep.subr.bf16.mxu0 %v5402_v51  ;;  %v8032_v51 = vld [vmem:[#allocation10_spill] sm:$0xff] }
 0x35c   :  { %4646 = vmatprep.subr.bf16.mxu1 %v5404_v38 }
 0x35e   :  { %4606 = vmatpush1.bf16.msra.mxu0 %v5401_v57  ;;  %v8033_v57 = vld [vmem:[#allocation13_spill] sm:$0xff] }
 0x35f   :  { %4647 = vmatpush1.bf16.msra.mxu1 %v5403_v63  ;;  %4607 = vmatprep.subr.bf16.mxu0 %v5410_v46 }
 0x360   :  { %4648 = vmatprep.subr.bf16.mxu1 %v5412_v1 }
 0x362   :  { %4608 = vmatpush1.bf16.msra.mxu0 %v5409_v19 }
 0x363   :  { %4649 = vmatpush1.bf16.msra.mxu1 %v5411_v47  ;;  %4609 = vmatprep.subr.bf16.mxu0 %v5418_v29  ;;  %v2773_v47 = vmul.f32 %v7224_v11, %v7219_v6 }
 0x364   :  { %4650 = vmatprep.subr.bf16.mxu1 %v5420_v35 }
 0x366   :  { %4610 = vmatpush1.bf16.msra.mxu0 %v5417_v49 }
 0x367   :  { %4651 = vmatpush1.bf16.msra.mxu1 %v5419_v0  ;;  %4611 = vmatprep.subr.bf16.mxu0 %v5426_v27  ;;  %v8034_v0 = vld [vmem:[#allocation28_spill] sm:$0xff] }
 0x368   :  { %4652 = vmatprep.subr.bf16.mxu1 %v5428_v3 }
 0x36a   :  { %4612 = vmatpush1.bf16.msra.mxu0 %v5425_v30 }
 0x36b   :  { %4653 = vmatpush1.bf16.msra.mxu1 %v5427_v33  ;;  %4613 = vmatprep.subr.bf16.mxu0 %v5434_v50  ;;  %v8037_v33 = vld [vmem:[#allocation35_spill] sm:$0xff] }
 0x36c   :  { %4654 = vmatprep.subr.bf16.mxu1 %v5436_v12 }
 0x36e   :  { %4614 = vmatpush1.bf16.msra.mxu0 %v5433_v54 }
 0x36f   :  { %4655 = vmatpush1.bf16.msra.mxu1 %v5435_v7  ;;  %4615 = vmatprep.subr.bf16.mxu0 %v5442_v34 }
 0x370   :  { %4656 = vmatprep.subr.bf16.mxu1 %v5444_v52 }
 0x372   :  { %4616 = vmatpush1.bf16.msra.mxu0 %v5441_v10 }
 0x373   :  { %4657 = vmatpush1.bf16.msra.mxu1 %v5443_v13  ;;  %4667 = vmatprep.subr.bf16.mxu0 %v5326_v45 }
 0x374   :  { %4708 = vmatprep.subr.bf16.mxu1 %v5328_v9 }
 0x3c8   :  { %v3599_v62 = vpop.f32.mrb[32].mxu0  ;;  %v3640_v4 = vpop.f32.mrb[32].mxu1 }
 0x3c9   :  { %v3729_v15 = vadd.f32 %v3599_v62, %v8030_v20  ;;  %v3731_v16 = vadd.f32 %v3640_v4, %v8031_v17  ;;  %v3601_v8 = vpop.f32.mrb[33].mxu0  ;;  %v3642_v32 = vpop.f32.mrb[33].mxu1 }
 0x3ca   :  { %v3730_v55 = vadd.f32 %v3601_v8, %v8032_v51  ;;  %v3732_v63 = vadd.f32 %v3642_v32, %v8033_v57  ;;  %v3603_v38 = vpop.f32.mrb[34].mxu0  ;;  %v3644_v5 = vpop.f32.mrb[34].mxu1 }
 0x3cb   :  { %v3604_v39 = vpop.f32.mrb[35].mxu0  ;;  %v3645_v36 = vpop.f32.mrb[35].mxu1  ;;  %v3745_v2 = vmul.f32 0.5, %v3731_v16  ;;  %v3737_v48 = vmul.f32 0.5, %v3729_v15 }
 0x3cc   :  { %v3746_v46 = vmul.f32 0.5, %v3732_v63  ;;  %v3738_v29 = vmul.f32 0.5, %v3730_v55  ;;  %v7538_v8 = vpop.permute.xlu0 %5463  ;;  %v8038_v39 = vld [vmem:[#allocation65_spill] sm:$0xff] }
 0x3cd   :  { %v5465_v57 = vunpack.i.l.bf16 %v7538_v8 }
 0x3ce   :  { %5509 = vtanh.f32 %v3746_v46  ;;  %v3827_v46 = vld [vmem:[%s7760_s4 + $0x50] sm:$0xff] }
 0x3cf   :  { %5511 = vtanh.f32 %v3745_v2  ;;  %v3835_v2 = vld [vmem:[%s7760_s4 + $0x90] sm:$0xff] }
 0x3d0   :  { %5513 = vtanh.f32 %v3737_v48 }
 0x3d1   :  { %5515 = vtanh.f32 %v3738_v29 }
 0x3d8   :  { %v5510_v18 = vpop.eup %5509 }
 0x3d9   :  { %v3750_v19 = vmul.f32 0.5, %v5510_v18  ;;  %v5512_v40 = vpop.eup %5511  ;;  %v3831_v18 = vld [vmem:[%s7760_s4 + $0x70] sm:$0xff] }
 0x3da   :  { %v5514_v50 = vpop.eup %5513  ;;  %v3749_v54 = vmul.f32 0.5, %v5512_v40  ;;  %v5334_v48 = vcombine.high %v3827_v46, %v3831_v18  ;;  %v5351_v40 = vcombine.low %v3844_v42, %v3848_v61 }
 0x3db   :  { %v3752_v1 = vadd.f32 0.5, %v3750_v19  ;;  %v5516_v53 = vpop.eup %5515  ;;  %v3741_v14 = vmul.f32 0.5, %v5514_v50  ;;  %v3828_v19 = vld [vmem:[%s7760_s4 + $0x58] sm:$0xff]  ;;  %v3859_v50 = vld [vmem:[%s7760_s4 + $0x150] sm:$0xff] }
 0x3dc   :  { %v3742_v22 = vmul.f32 0.5, %v5516_v53  ;;  %v3751_v21 = vadd.f32 0.5, %v3749_v54  ;;  %v3863_v53 = vld [vmem:[%s7760_s4 + $0x170] sm:$0xff]  ;;  %v3860_v54 = vld [vmem:[%s7760_s4 + $0x158] sm:$0xff] }
 0x3dd   :  { %v3764_v37 = vmul.f32 %v3752_v1, %v2773_v47  ;;  %v3743_v34 = vadd.f32 0.5, %v3741_v14  ;;  %v3832_v47 = vld [vmem:[%s7760_s4 + $0x78] sm:$0xff] }
 0x3de   :  { %v3744_v10 = vadd.f32 0.5, %v3742_v22  ;;  %v3763_v52 = vmul.f32 %v3751_v21, %v7217_v58  ;;  %v5336_v29 = vcombine.high %v3828_v19, %v3832_v47  ;;  %v5366_v22 = vcombine.high %v3859_v50, %v3863_v53 }
 0x408   :  { %v3681_v56 = vpop.f32.mrb[36].mxu0  ;;  %v3722_v49 = vpop.f32.mrb[36].mxu1 }
 0x409   :  { %v3733_v35 = vadd.f32 %v3681_v56, %v8034_v0  ;;  %v3735_v23 = vadd.f32 %v3722_v49, %v8035_v44  ;;  %v3683_v24 = vpop.f32.mrb[37].mxu0  ;;  %v3724_v27 = vpop.f32.mrb[37].mxu1  ;;  %v3839_v56 = vld [vmem:[%s7760_s4 + $0xb0] sm:$0xff]  ;;  %v3836_v49 = vld [vmem:[%s7760_s4 + $0x98] sm:$0xff]  ;;  %v5335_v44 = vcombine.low %v3828_v19, %v3832_v47 }
 0x40a   :  { %v3734_v30 = vadd.f32 %v3683_v24, %v8036_v28  ;;  %v3736_v6 = vadd.f32 %v3724_v27, %v8037_v33  ;;  %v3685_v11 = vpop.f32.mrb[38].mxu0  ;;  %v3726_v3 = vpop.f32.mrb[38].mxu1  ;;  %v3840_v0 = vld [vmem:[%s7760_s4 + $0xb8] sm:$0xff]  ;;  %v3843_v27 = vld [vmem:[%s7760_s4 + $0xd0] sm:$0xff]  ;;  %v5341_v31 = vcombine.low %v3835_v2, %v3839_v56  ;;  %v5352_v28 = vcombine.high %v3844_v42, %v3848_v61 }
 0x40b   :  { %5517 = vtanh.f32 %v3733_v35  ;;  %v3686_v41 = vpop.f32.mrb[39].mxu0  ;;  %v3727_v43 = vpop.f32.mrb[39].mxu1  ;;  %v3755_v7 = vmul.f32 0.5, %v3735_v23  ;;  %v5333_v35 = vcombine.low %v3827_v46, %v3831_v18  ;;  %v5342_v23 = vcombine.high %v3835_v2, %v3839_v56  ;;  %v3855_v33 = vld [vmem:[%s7760_s4 + $0x130] sm:$0xff]  ;;  %v3856_v11 = vld [vmem:[%s7760_s4 + $0x138] sm:$0xff] }
 0x40c   :  { %5519 = vtanh.f32 %v3734_v30  ;;  %v3756_v12 = vmul.f32 0.5, %v3736_v6  ;;  %v5344_v24 = vcombine.high %v3836_v49, %v3840_v0  ;;  %v3851_v30 = vld [vmem:[%s7760_s4 + $0x110] sm:$0xff]  ;;  %v3852_v6 = vld [vmem:[%s7760_s4 + $0x118] sm:$0xff]  ;;  %v5349_v3 = vcombine.low %v3843_v27, %v3847_v26 }
 0x40d   :  { %5521 = vtanh.f32 %v3755_v7  ;;  %v5358_v41 = vcombine.high %v3851_v30, %v3855_v33  ;;  %v5360_v43 = vcombine.high %v3852_v6, %v3856_v11  ;;  %v3864_v7 = vld [vmem:[%s7760_s4 + $0x178] sm:$0xff]  ;;  %v5359_v14 = vcombine.low %v3852_v6, %v3856_v11  ;;  %v3895_v2 = vld [vmem:[%s7760_s4 + $0x270] sm:$0xff] }
 0x40e   :  { %5523 = vtanh.f32 %v3756_v12  ;;  %v5357_v12 = vcombine.low %v3851_v30, %v3855_v33  ;;  %v5368_v21 = vcombine.high %v3860_v54, %v3864_v7  ;;  %v3912_v30 = vld [vmem:[%s7760_s4 + $0x2f8] sm:$0xff] }
 0x415   :  { %v5518_v25 = vpop.eup %5517 }
 0x416   :  { %v5520_v13 = vpop.eup %5519  ;;  %v3765_v45 = vmul.f32 %v5518_v25, %v3743_v34  ;;  %v3867_v34 = vld [vmem:[%s7760_s4 + $0x190] sm:$0xff] }
 0x417   :  { %v3766_v9 = vmul.f32 %v5520_v13, %v3744_v10  ;;  %v5522_v20 = vpop.eup %5521  ;;  %v3871_v25 = vld [vmem:[%s7760_s4 + $0x1b0] sm:$0xff]  ;;  %v3868_v10 = vld [vmem:[%s7760_s4 + $0x198] sm:$0xff] }
 0x418   :  { %v7532_v62 = vadd.f32 %v3765_v45, %v3763_v52  ;;  %v5524_v15 = vpop.eup %5523  ;;  %v3759_v17 = vmul.f32 0.5, %v5522_v20  ;;  %v3872_v13 = vld [vmem:[%s7760_s4 + $0x1b8] sm:$0xff]  ;;  %v5365_v52 = vcombine.low %v3859_v50, %v3863_v53  ;;  %v5367_v45 = vcombine.low %v3860_v54, %v3864_v7 }
 0x419   :  { %v7534_v4 = vadd.f32 %v3766_v9, %v3764_v37  ;;  %v3760_v16 = vmul.f32 0.5, %v5524_v15  ;;  %v5374_v9 = vcombine.high %v3867_v34, %v3871_v25  ;;  %v5376_v20 = vcombine.high %v3868_v10, %v3872_v13  ;;  %v3875_v15 = vld [vmem:[%s7760_s4 + $0x1d0] sm:$0xff]  ;;  %v3920_v50 = vld [vmem:[%s7760_s4 + $0x338] sm:$0xff] }
 0x41a   :  { %5525 = vtanh.f32 %v7532_v62  ;;  %v3761_v32 = vadd.f32 0.5, %v3759_v17  ;;  %v3879_v17 = vld [vmem:[%s7760_s4 + $0x1f0] sm:$0xff] }
 0x41b   :  { %5527 = vtanh.f32 %v7534_v4  ;;  %v3762_v55 = vadd.f32 0.5, %v3760_v16  ;;  %v3876_v16 = vld [vmem:[%s7760_s4 + $0x1d8] sm:$0xff]  ;;  %v5381_v46 = vcombine.low %v3875_v15, %v3879_v17 }
 0x424   :  { %v5526_v51 = vpop.eup %5525 }
 0x425   :  { %v5528_v58 = vpop.eup %5527  ;;  %v3771_v63 = vmul.f32 %v5526_v51, %v3761_v32  ;;  %v3880_v32 = vld [vmem:[%s7760_s4 + $0x1f8] sm:$0xff]  ;;  %v5373_v51 = vcombine.low %v3867_v34, %v3871_v25 }
 0x426   :  { %v3772_v38 = vmul.f32 %v5528_v58, %v3762_v55  ;;  %v5375_v55 = vcombine.low %v3868_v10, %v3872_v13  ;;  %v5382_v58 = vcombine.high %v3875_v15, %v3879_v17  ;;  %v5383_v18 = vcombine.low %v3876_v16, %v3880_v32  ;;  %v3928_v34 = vld [vmem:[%s7760_s4 + $0x378] sm:$0xff] }
 0x427   :  { %v3799_v5 = vmul.f32 %v5465_v57, %v3771_v63  ;;  %v7560_v37 = vpack.c.bf16 %v3771_v63, %v3771_v63  ;;  %v5384_v57 = vcombine.high %v3876_v16, %v3880_v32  ;;  %v3883_v63 = vld [vmem:[%s7760_s4 + $0x210] sm:$0xff]  ;;  %v3936_v15 = vld [vmem:[%s7760_s4 + $0x3b8] sm:$0xff] }
 0x428   :  { %v3791_v36 = vmul.f32 %v8038_v39, %v3772_v38  ;;  %v3887_v38 = vld [vmem:[%s7760_s4 + $0x230] sm:$0xff] }
 0x429   :  { %5319 = vst [vmem:[%s7763_s5 + $0x10] sm:$0xff] %v3799_v5  ;;  %v3884_v5 = vld [vmem:[%s7760_s4 + $0x218] sm:$0xff]  ;;  %v5390_v19 = vcombine.high %v3883_v63, %v3887_v38  ;;  %v5389_v56 = vcombine.low %v3883_v63, %v3887_v38 }
 0x42a   :  { %5320 = vst [vmem:[%s7764_s6 + $0x8] sm:$0xff] %v3791_v36  ;;  %v3816_v1 = vpack.c.bf16 %v3791_v36, %v3791_v36  ;;  %v3888_v36 = vld [vmem:[%s7760_s4 + $0x238] sm:$0xff] }
 0x42b   :  { %v5392_v47 = vcombine.high %v3884_v5, %v3888_v36  ;;  %v3944_v63 = vld [vmem:[%s7760_s4 + $0x3f8] sm:$0xff] }
 0x42c   :  { %4617 = vmatprep.mubr.bf16.mxu0 %v3816_v1  ;;  %4658 = vmatprep.mubr.bf16.mxu1 %v3816_v1 }
 0x42d   :  { %4618 = vmatmul.mubr.bf16.vlgmr.msra.gmra.mrb[40].mxu0 %v7560_v37  ;;  %4659 = vmatmul.mubr.bf16.vlgmr.msra.gmra.mrb[40].mxu1 %v7560_v37 }
 0x42e   :  { %4668 = vmatpush1.bf16.msra.mxu0 %v5325_v59  ;;  %4709 = vmatpush1.bf16.msra.mxu1 %v5327_v60  ;;  %v5343_v59 = vcombine.low %v3836_v49, %v3840_v0  ;;  %v5350_v60 = vcombine.high %v3843_v27, %v3847_v26  ;;  %v5391_v49 = vcombine.low %v3884_v5, %v3888_v36  ;;  %v3904_v27 = vld [vmem:[%s7760_s4 + $0x2b8] sm:$0xff] }
 0x42f   :  { %4699 = vmatprep.mubr.bf16.mxu0 %v3816_v1  ;;  %4740 = vmatprep.mubr.bf16.mxu1 %v3816_v1  ;;  %v3891_v1 = vld [vmem:[%s7760_s4 + $0x250] sm:$0xff] }
 0x430   :  { %4669 = vmatprep.subr.bf16.mxu0 %v5334_v48  ;;  %4710 = vmatprep.subr.bf16.mxu1 %v5336_v29  ;;  %v3892_v48 = vld [vmem:[%s7760_s4 + $0x258] sm:$0xff]  ;;  %v5398_v0 = vcombine.high %v3891_v1, %v3895_v2  ;;  %v5397_v26 = vcombine.low %v3891_v1, %v3895_v2 }
 0x431   :  { %v3896_v29 = vld [vmem:[%s7760_s4 + $0x278] sm:$0xff] }
 0x432   :  { %4670 = vmatpush1.bf16.msra.mxu0 %v5333_v35  ;;  %4711 = vmatpush1.bf16.msra.mxu1 %v5335_v44  ;;  %v5400_v35 = vcombine.high %v3892_v48, %v3896_v29  ;;  %v3899_v44 = vld [vmem:[%s7760_s4 + $0x290] sm:$0xff]  ;;  %v5399_v42 = vcombine.low %v3892_v48, %v3896_v29  ;;  %v8039_v2 = vld [vmem:[#allocation12_spill] sm:$0xff] }
 0x433   :  { %4671 = vmatprep.subr.bf16.mxu0 %v5342_v23  ;;  %4712 = vmatprep.subr.bf16.mxu1 %v5344_v24  ;;  %v3903_v23 = vld [vmem:[%s7760_s4 + $0x2b0] sm:$0xff]  ;;  %v3900_v24 = vld [vmem:[%s7760_s4 + $0x298] sm:$0xff] }
 0x434   :  { %v5406_v61 = vcombine.high %v3899_v44, %v3903_v23  ;;  %v5405_v33 = vcombine.low %v3899_v44, %v3903_v23  ;;  %v5407_v6 = vcombine.low %v3900_v24, %v3904_v27  ;;  %v8040_v29 = vld [vmem:[#allocation15_spill] sm:$0xff]  ;;  %v8042_v23 = vld [vmem:[#allocation16_spill] sm:$0xff] }
 0x436   :  { %4672 = vmatpush1.bf16.msra.mxu0 %v5341_v31  ;;  %4713 = vmatpush1.bf16.msra.mxu1 %v5343_v59  ;;  %v5408_v31 = vcombine.high %v3900_v24, %v3904_v27  ;;  %v3907_v59 = vld [vmem:[%s7760_s4 + $0x2d0] sm:$0xff] }
 0x437   :  { %4673 = vmatprep.subr.bf16.mxu0 %v5350_v60  ;;  %4714 = vmatprep.subr.bf16.mxu1 %v5352_v28  ;;  %v3911_v60 = vld [vmem:[%s7760_s4 + $0x2f0] sm:$0xff]  ;;  %v3908_v28 = vld [vmem:[%s7760_s4 + $0x2d8] sm:$0xff] }
 0x438   :  { %v5414_v11 = vcombine.high %v3907_v59, %v3911_v60  ;;  %v5413_v53 = vcombine.low %v3907_v59, %v3911_v60  ;;  %v5415_v54 = vcombine.low %v3908_v28, %v3912_v30  ;;  %v3793_v60 = vmul.f32 %v8038_v39, %v7534_v4 }
 0x43a   :  { %4674 = vmatpush1.bf16.msra.mxu0 %v5349_v3  ;;  %4715 = vmatpush1.bf16.msra.mxu1 %v5351_v40  ;;  %v5416_v3 = vcombine.high %v3908_v28, %v3912_v30  ;;  %v3915_v40 = vld [vmem:[%s7760_s4 + $0x310] sm:$0xff] }
 0x43b   :  { %4675 = vmatprep.subr.bf16.mxu0 %v5358_v41  ;;  %4716 = vmatprep.subr.bf16.mxu1 %v5360_v43  ;;  %v3919_v41 = vld [vmem:[%s7760_s4 + $0x330] sm:$0xff]  ;;  %v3916_v43 = vld [vmem:[%s7760_s4 + $0x318] sm:$0xff] }
 0x43c   :  { %v5422_v7 = vcombine.high %v3915_v40, %v3919_v41  ;;  %v5421_v25 = vcombine.low %v3915_v40, %v3919_v41  ;;  %v5423_v10 = vcombine.low %v3916_v43, %v3920_v50  ;;  %v8043_v41 = vld [vmem:[#allocation34_spill] sm:$0xff] }
 0x43e   :  { %4676 = vmatpush1.bf16.msra.mxu0 %v5357_v12  ;;  %4717 = vmatpush1.bf16.msra.mxu1 %v5359_v14  ;;  %v5424_v12 = vcombine.high %v3916_v43, %v3920_v50  ;;  %v3923_v14 = vld [vmem:[%s7760_s4 + $0x350] sm:$0xff]  ;;  %v8044_v50 = vld [vmem:[#allocation37_spill] sm:$0xff] }
 0x43f   :  { %4677 = vmatprep.subr.bf16.mxu0 %v5366_v22  ;;  %4718 = vmatprep.subr.bf16.mxu1 %v5368_v21  ;;  %v3927_v22 = vld [vmem:[%s7760_s4 + $0x370] sm:$0xff]  ;;  %v3924_v21 = vld [vmem:[%s7760_s4 + $0x358] sm:$0xff] }
 0x440   :  { %v5430_v13 = vcombine.high %v3923_v14, %v3927_v22  ;;  %v5429_v17 = vcombine.low %v3923_v14, %v3927_v22  ;;  %v5431_v16 = vcombine.low %v3924_v21, %v3928_v34  ;;  %v8046_v22 = vld [vmem:[#allocation39_spill] sm:$0xff] }
 0x442   :  { %4678 = vmatpush1.bf16.msra.mxu0 %v5365_v52  ;;  %4719 = vmatpush1.bf16.msra.mxu1 %v5367_v45  ;;  %v5432_v52 = vcombine.high %v3924_v21, %v3928_v34  ;;  %v3931_v45 = vld [vmem:[%s7760_s4 + $0x390] sm:$0xff] }
 0x443   :  { %4679 = vmatprep.subr.bf16.mxu0 %v5374_v9  ;;  %4720 = vmatprep.subr.bf16.mxu1 %v5376_v20  ;;  %v3935_v9 = vld [vmem:[%s7760_s4 + $0x3b0] sm:$0xff]  ;;  %v3932_v20 = vld [vmem:[%s7760_s4 + $0x398] sm:$0xff] }
 0x444   :  { %v5438_v32 = vcombine.high %v3931_v45, %v3935_v9  ;;  %v5437_v38 = vcombine.low %v3931_v45, %v3935_v9  ;;  %v5439_v5 = vcombine.low %v3932_v20, %v3936_v15 }
 0x446   :  { %4680 = vmatpush1.bf16.msra.mxu0 %v5373_v51  ;;  %4721 = vmatpush1.bf16.msra.mxu1 %v5375_v55  ;;  %v5440_v51 = vcombine.high %v3932_v20, %v3936_v15  ;;  %v3939_v55 = vld [vmem:[%s7760_s4 + $0x3d0] sm:$0xff] }
 0x447   :  { %4681 = vmatprep.subr.bf16.mxu0 %v5382_v58  ;;  %4722 = vmatprep.subr.bf16.mxu1 %v5384_v57  ;;  %v3943_v58 = vld [vmem:[%s7760_s4 + $0x3f0] sm:$0xff]  ;;  %v3940_v57 = vld [vmem:[%s7760_s4 + $0x3d8] sm:$0xff] }
 0x448   :  { %v5446_v36 = vcombine.high %v3939_v55, %v3943_v58 }
 0x44a   :  { %4682 = vmatpush1.bf16.msra.mxu0 %v5381_v46  ;;  %4723 = vmatpush1.bf16.msra.mxu1 %v5383_v18  ;;  %v5448_v46 = vcombine.high %v3940_v57, %v3944_v63  ;;  %v5445_v18 = vcombine.low %v3939_v55, %v3943_v58 }
 0x44b   :  { %4683 = vmatprep.subr.bf16.mxu0 %v5390_v19  ;;  %4724 = vmatprep.subr.bf16.mxu1 %v5392_v47  ;;  %v5447_v19 = vcombine.low %v3940_v57, %v3944_v63 }
 0x44e   :  { %4684 = vmatpush1.bf16.msra.mxu0 %v5389_v56  ;;  %4725 = vmatpush1.bf16.msra.mxu1 %v5391_v49 }
 0x44f   :  { %4685 = vmatprep.subr.bf16.mxu0 %v5398_v0  ;;  %4726 = vmatprep.subr.bf16.mxu1 %v5400_v35  ;;  %v8041_v35 = vld [vmem:[#allocation14_spill] sm:$0xff] }
 0x452   :  { %4686 = vmatpush1.bf16.msra.mxu0 %v5397_v26  ;;  %4727 = vmatpush1.bf16.msra.mxu1 %v5399_v42 }
 0x453   :  { %4687 = vmatprep.subr.bf16.mxu0 %v5406_v61  ;;  %4728 = vmatprep.subr.bf16.mxu1 %v5408_v31 }
 0x456   :  { %4688 = vmatpush1.bf16.msra.mxu0 %v5405_v33  ;;  %4729 = vmatpush1.bf16.msra.mxu1 %v5407_v6 }
 0x457   :  { %4689 = vmatprep.subr.bf16.mxu0 %v5414_v11  ;;  %4730 = vmatprep.subr.bf16.mxu1 %v5416_v3 }
 0x45a   :  { %4690 = vmatpush1.bf16.msra.mxu0 %v5413_v53  ;;  %4731 = vmatpush1.bf16.msra.mxu1 %v5415_v54 }
 0x45b   :  { %4691 = vmatprep.subr.bf16.mxu0 %v5422_v7  ;;  %4732 = vmatprep.subr.bf16.mxu1 %v5424_v12  ;;  %v8045_v12 = vld [vmem:[#allocation36_spill] sm:$0xff] }
 0x45e   :  { %4692 = vmatpush1.bf16.msra.mxu0 %v5421_v25  ;;  %4733 = vmatpush1.bf16.msra.mxu1 %v5423_v10 }
 0x45f   :  { %4693 = vmatprep.subr.bf16.mxu0 %v5430_v13  ;;  %4734 = vmatprep.subr.bf16.mxu1 %v5432_v52 }
 0x462   :  { %4694 = vmatpush1.bf16.msra.mxu0 %v5429_v17  ;;  %4735 = vmatpush1.bf16.msra.mxu1 %v5431_v16 }
 0x463   :  { %4695 = vmatprep.subr.bf16.mxu0 %v5438_v32  ;;  %4736 = vmatprep.subr.bf16.mxu1 %v5440_v51 }
 0x466   :  { %4696 = vmatpush1.bf16.msra.mxu0 %v5437_v38  ;;  %4737 = vmatpush1.bf16.msra.mxu1 %v5439_v5 }
 0x467   :  { %4697 = vmatprep.subr.bf16.mxu0 %v5446_v36  ;;  %4738 = vmatprep.subr.bf16.mxu1 %v5448_v46 }
 0x46a   :  { %4698 = vmatpush1.bf16.msra.mxu0 %v5445_v18  ;;  %4739 = vmatpush1.bf16.msra.mxu1 %v5447_v19 }
 0x46d   :  { %4700 = vmatmul.mubr.bf16.vlgmr.msra.gmra.mrb[44].mxu0 %v7560_v37  ;;  %4741 = vmatmul.mubr.bf16.vlgmr.msra.gmra.mrb[44].mxu1 %v7560_v37 }
 0x500   :  { %v4619_v47 = vpop.f32.mrb[40].mxu0  ;;  %v4660_v1 = vpop.f32.mrb[40].mxu1 }
 0x501   :  { %v4749_v48 = vadd.f32 %v4619_v47, %v8039_v2  ;;  %v4751_v56 = vadd.f32 %v4660_v1, %v8040_v29  ;;  %v4621_v49 = vpop.f32.mrb[41].mxu0  ;;  %v4662_v0 = vpop.f32.mrb[41].mxu1 }
 0x502   :  { %v4750_v44 = vadd.f32 %v4621_v49, %v8041_v35  ;;  %v4752_v24 = vadd.f32 %v4662_v0, %v8042_v23  ;;  %v4623_v27 = vpop.f32.mrb[42].mxu0  ;;  %v4664_v26 = vpop.f32.mrb[42].mxu1  ;;  %v5466_v49 = vunpack.i.h.bf16 %v7538_v8 }
 0x503   :  { %v4624_v42 = vpop.f32.mrb[43].mxu0  ;;  %v4665_v61 = vpop.f32.mrb[43].mxu1  ;;  %v4765_v33 = vmul.f32 0.5, %v4751_v56  ;;  %v4757_v6 = vmul.f32 0.5, %v4749_v48 }
 0x504   :  { %v4766_v31 = vmul.f32 0.5, %v4752_v24  ;;  %v4758_v11 = vmul.f32 0.5, %v4750_v44  ;;  %v4817_v0 = vpop.permute.xlu1 %4816 }
 0x506   :  { %5529 = vtanh.f32 %v4766_v31 }
 0x507   :  { %5531 = vtanh.f32 %v4765_v33 }
 0x508   :  { %5533 = vtanh.f32 %v4757_v6 }
 0x509   :  { %5535 = vtanh.f32 %v4758_v11 }
 0x510   :  { %v5530_v59 = vpop.eup %5529 }
 0x511   :  { %v4770_v37 = vmul.f32 0.5, %v5530_v59  ;;  %v5532_v34 = vpop.eup %5531 }
 0x512   :  { %v5534_v13 = vpop.eup %5533  ;;  %v4769_v45 = vmul.f32 0.5, %v5532_v34 }
 0x513   :  { %v4772_v28 = vadd.f32 0.5, %v4770_v37  ;;  %v5536_v52 = vpop.eup %5535  ;;  %v4761_v15 = vmul.f32 0.5, %v5534_v13 }
 0x514   :  { %v4762_v17 = vmul.f32 0.5, %v5536_v52  ;;  %v4771_v16 = vadd.f32 0.5, %v4769_v45 }
 0x515   :  { %v4784_v30 = vmul.f32 %v4772_v28, %v3793_v60  ;;  %v4763_v32 = vadd.f32 0.5, %v4761_v15 }
 0x516   :  { %v4764_v55 = vadd.f32 0.5, %v4762_v17  ;;  %v4783_v57 = vmul.f32 %v4771_v16, %v7532_v62 }
 0x540   :  { %v4701_v3 = vpop.f32.mrb[44].mxu0  ;;  %v4742_v40 = vpop.f32.mrb[44].mxu1 }
 0x541   :  { %v4753_v43 = vadd.f32 %v4701_v3, %v8043_v41  ;;  %v4755_v53 = vadd.f32 %v4742_v40, %v8044_v50  ;;  %v4703_v54 = vpop.f32.mrb[45].mxu0  ;;  %v4744_v7 = vpop.f32.mrb[45].mxu1 }
 0x542   :  { %v4754_v14 = vadd.f32 %v4703_v54, %v8045_v12  ;;  %v4756_v4 = vadd.f32 %v4744_v7, %v8046_v22  ;;  %v4705_v39 = vpop.f32.mrb[46].mxu0  ;;  %v4746_v21 = vpop.f32.mrb[46].mxu1 }
 0x543   :  { %5537 = vtanh.f32 %v4753_v43  ;;  %v4706_v25 = vpop.f32.mrb[47].mxu0  ;;  %v4747_v10 = vpop.f32.mrb[47].mxu1  ;;  %v4775_v9 = vmul.f32 0.5, %v4755_v53 }
 0x544   :  { %5539 = vtanh.f32 %v4754_v14  ;;  %v4776_v20 = vmul.f32 0.5, %v4756_v4 }
 0x545   :  { %5541 = vtanh.f32 %v4775_v9 }
 0x546   :  { %5543 = vtanh.f32 %v4776_v20 }
 0x54d   :  { %v5538_v51 = vpop.eup %5537 }
 0x54e   :  { %v5540_v58 = vpop.eup %5539  ;;  %v4785_v63 = vmul.f32 %v5538_v51, %v4763_v32 }
 0x54f   :  { %v4786_v38 = vmul.f32 %v5540_v58, %v4764_v55  ;;  %v5542_v46 = vpop.eup %5541 }
 0x550   :  { %v4787_v5 = vadd.f32 %v4785_v63, %v4783_v57  ;;  %v5544_v18 = vpop.eup %5543  ;;  %v4779_v19 = vmul.f32 0.5, %v5542_v46 }
 0x551   :  { %v4788_v36 = vadd.f32 %v4786_v38, %v4784_v30  ;;  %v4780_v47 = vmul.f32 0.5, %v5544_v18 }
 0x552   :  { %5545 = vtanh.f32 %v4787_v5  ;;  %v4781_v1 = vadd.f32 0.5, %v4779_v19 }
 0x553   :  { %5547 = vtanh.f32 %v4788_v36  ;;  %v4782_v48 = vadd.f32 0.5, %v4780_v47 }
 0x55c   :  { %v5546_v2 = vpop.eup %5545 }
 0x55d   :  { %v5548_v29 = vpop.eup %5547  ;;  %v4791_v56 = vmul.f32 %v5546_v2, %v4781_v1 }
 0x55e   :  { %v4792_v35 = vmul.f32 %v5548_v29, %v4782_v48 }
 0x55f   :  { %v4819_v62 = vmul.f32 %v4817_v0, %v4791_v56 }
 0x560   :  { %v4811_v44 = vmul.f32 %v5466_v49, %v4792_v35 }
 0x561   :  { %5451 = vst [vmem:[%s7763_s5 + $0x18] sm:$0xff] %v4819_v62 }
 0x562   :  { %4822 = vst [vmem:[%s7764_s6] sm:$0xff] %v4811_v44 }

</bundles_post_ra>
